<compile_context>
chip_gen: v5e
topology: v5e:2x2
jax: 0.10.0
libtpu: 0.0.40
codegen_flags: <defaults>
</compile_context>

<pallas_src>
import functools

import jax
import jax.numpy as jnp
from jax import lax
from jax.experimental import pallas as pl
from jax.experimental.pallas import tpu as pltpu


# MXU operand / activation dtype (accumulation is always f32 via
# preferred_element_type; BN + ReLU epilogue stays in f32).
_COMPUTE_DTYPE = jnp.bfloat16
_VMEM_LIMIT_BYTES = 32 * 1024 * 1024
_CONV_TILE_BUDGET = 4 * 1024 * 1024   # budget for the im2col patch tensor
_UP_TILE_BUDGET = 2 * 1024 * 1024


# ---------------------------------------------------------------------------
# Tiling helpers
# ---------------------------------------------------------------------------
def _largest_divisor_leq(n, cap):
    cap = int(max(1, min(cap, n)))
    for d in range(cap, 0, -1):
        if n % d == 0:
            return d
    return 1


def _choose_tile(total, row_bytes, budget_bytes, min_tiles=2):
    """Largest divisor of `total` that fits the byte budget and (when possible)
    yields at least `min_tiles` grid steps (keeps both v7x TCs busy)."""
    cap = max(1, budget_bytes // max(1, row_bytes))
    if total >= min_tiles:
        cap = min(cap, max(1, total // min_tiles))
    return _largest_divisor_leq(total, cap)


def _halo_tiles(x_padded, tile_h):
    """(N, H+2, Wp, C) halo-padded image -> (N, nT, tile_h+2, Wp, C) overlapping
    H tiles so each grid step gets its 3x3 halo with plain Blocked BlockSpecs."""
    n, hp, wp, c = x_padded.shape
    h = hp - 2
    n_t = h // tile_h
    tiles = [x_padded[:, t * tile_h:t * tile_h + tile_h + 2] for t in range(n_t)]
    return jnp.stack(tiles, axis=1)


# ---------------------------------------------------------------------------
# In-kernel helpers
# ---------------------------------------------------------------------------
def _hash_bits_u32(idx_i32, seed):
    """Counter-based uint32 hash (murmur-style finalizer) of a global index."""
    h = idx_i32.astype(jnp.uint32) * jnp.uint32(0x9E3779B1)
    h = h + jnp.uint32((int(seed) * 2654435761 + 0x5BD1E995) & 0xFFFFFFFF)
    h = h ^ (h >> 15)
    h = h * jnp.uint32(0x85EBCA6B)
    h = h ^ (h >> 13)
    h = h * jnp.uint32(0xC2B2AE35)
    h = h ^ (h >> 16)
    return h


def _im2col_3x3(x, th, w_out):
    """x: (th+2, w_out+2, cin) -> (th*w_out, 9*cin); column order (kh, kw, cin)."""
    cols = jnp.concatenate(
        [x[kh:kh + th, kw:kw + w_out, :] for kh in range(3) for kw in range(3)],
        axis=-1)
    return cols.reshape(th * w_out, 9 * x.shape[-1])


# ---------------------------------------------------------------------------
# Kernel 1: ConvTranspose2d(k=2, s=2) as a row-tiled matmul.
#   Output layout (rows, a, W1, b*C+c) == upsampled image after a free reshape.
# ---------------------------------------------------------------------------
def _up2x2_kernel(x_ref, w_ref, b_ref, o_ref, *, compute_dtype):
    tr, w1, c = x_ref.shape
    x = x_ref[...].astype(compute_dtype).reshape(tr * w1, c)
    bias = b_ref[0]                                           # (2C,) f32
    for a in range(2):
        y = jnp.dot(x, w_ref[a].astype(compute_dtype),
                    preferred_element_type=jnp.float32) + bias
        o_ref[:, a, :, :] = y.reshape(tr, w1, 2 * c).astype(o_ref.dtype)


def _conv_transpose_2x2(x1_nhwc, w_up, b_up, *, out_dtype, compute_dtype):
    n, h1, w1, c = x1_nhwc.shape
    rows = n * h1
    x_rows = x1_nhwc.reshape(rows, w1, c).astype(compute_dtype)
    itemsize = jnp.dtype(compute_dtype).itemsize
    row_bytes = w1 * c * itemsize * 5        # input row + 4x output row
    tr = _choose_tile(rows, row_bytes, _UP_TILE_BUDGET)
    y = pl.pallas_call(
        functools.partial(_up2x2_kernel, compute_dtype=compute_dtype),
        out_shape=jax.ShapeDtypeStruct((rows, 2, w1, 2 * c), out_dtype),
        grid=(rows // tr,),
        in_specs=[
            pl.BlockSpec((tr, w1, c), lambda i: (i, 0, 0)),
            pl.BlockSpec((2, c, 2 * c), lambda i: (0, 0, 0)),
            pl.BlockSpec((1, 2 * c), lambda i: (0, 0)),
        ],
        out_specs=pl.BlockSpec((tr, 2, w1, 2 * c), lambda i: (i, 0, 0, 0)),
        compiler_params=pltpu.CompilerParams(
            dimension_semantics=("parallel",),
            vmem_limit_bytes=_VMEM_LIMIT_BYTES),
    )(x_rows, w_up.astype(compute_dtype), b_up)
    # (N*H1, 2, W1, 2C) row-major == (N, 2*H1, 2*W1, C): pure (free) reshape.
    return y.reshape(n, 2 * h1, 2 * w1, c)


# ---------------------------------------------------------------------------
# Kernel 2: fused [channel concat + dropout + conv3x3(im2col) + BN + ReLU]
# ---------------------------------------------------------------------------
def _conv1_fused_kernel(x2_ref, x1_ref, w_ref, scale_ref, shift_ref, o_ref, *,
                        h_tot, w_tot, keep_thr, inv_keep, seed, compute_dtype):
    th = o_ref.shape[2]
    w_out = o_ref.shape[3]
    xa = x2_ref[0, 0]                               # (th+2, w_out+2, C)
    xb = x1_ref[0, 0]
    x = jnp.concatenate([xa, xb], axis=-1)          # cat([x2, x1], channel) in VMEM
    if keep_thr is not None:
        # Inverted dropout, mask hashed from the global (n, h, w, c) position:
        # integer-threshold compare, identical across halo-overlapped tiles.
        n = pl.program_id(0)
        t = pl.program_id(1)
        shp = x.shape
        r = lax.broadcasted_iota(jnp.int32, shp, 0)
        q = lax.broadcasted_iota(jnp.int32, shp, 1)
        cc = lax.broadcasted_iota(jnp.int32, shp, 2)
        h = t * th + r - 1                          # -1 undoes the conv halo
        w = q - 1
        flat = ((n * h_tot + h) * w_tot + w) * shp[-1] + cc
        bits = _hash_bits_u32(flat, seed)
        x = jnp.where(bits >= jnp.uint32(keep_thr), x * inv_keep, 0.0)
    cols = _im2col_3x3(x.astype(compute_dtype), th, w_out)    # K = 9*in_ch
    acc = jnp.dot(cols, w_ref[...], preferred_element_type=jnp.float32)
    y = jnp.maximum(acc * scale_ref[0] + shift_ref[0], 0.0)
    o_ref[0, 0] = y.reshape(th, w_out, -1).astype(o_ref.dtype)


def _conv1_fused(x2_t, x1_t, w_col, scale, shift, *, tile_h, h_tot, w_tot,
                 drop_rate, seed, out_dtype, compute_dtype):
    n, n_t, thp, wp, c_half = x2_t.shape
    w_out = wp - 2
    cout = w_col.shape[-1]
    if drop_rate > 0.0:
        keep_thr = min(int(round(drop_rate * 4294967296.0)), 4294967295)
        inv_keep = 0.0 if drop_rate >= 1.0 else 1.0 / (1.0 - drop_rate)
    else:
        keep_thr, inv_keep = None, 1.0
    kernel = functools.partial(
        _conv1_fused_kernel, h_tot=h_tot, w_tot=w_tot, keep_thr=keep_thr,
        inv_keep=inv_keep, seed=seed, compute_dtype=compute_dtype)
    return pl.pallas_call(
        kernel,
        out_shape=jax.ShapeDtypeStruct((n, n_t, tile_h, w_out, cout), out_dtype),
        grid=(n, n_t),
        in_specs=[
            pl.BlockSpec((1, 1, thp, wp, c_half), lambda i, j: (i, j, 0, 0, 0)),
            pl.BlockSpec((1, 1, thp, wp, c_half), lambda i, j: (i, j, 0, 0, 0)),
            pl.BlockSpec(w_col.shape, lambda i, j: (0, 0)),
            pl.BlockSpec((1, cout), lambda i, j: (0, 0)),
            pl.BlockSpec((1, cout), lambda i, j: (0, 0)),
        ],
        out_specs=pl.BlockSpec((1, 1, tile_h, w_out, cout),
                               lambda i, j: (i, j, 0, 0, 0)),
        compiler_params=pltpu.CompilerParams(
            dimension_semantics=("parallel", "parallel"),
            vmem_limit_bytes=_VMEM_LIMIT_BYTES),
    )(x2_t, x1_t, w_col, scale, shift)


# ---------------------------------------------------------------------------
# Kernel 3: conv3x3 (im2col) + folded BN + ReLU  (second conv of double_conv)
# ---------------------------------------------------------------------------
def _conv3x3_bn_relu_kernel(x_ref, w_ref, scale_ref, shift_ref, o_ref, *,
                            compute_dtype):
    th = o_ref.shape[2]
    w_out = o_ref.shape[3]
    cols = _im2col_3x3(x_ref[0, 0].astype(compute_dtype), th, w_out)
    acc = jnp.dot(cols, w_ref[...], preferred_element_type=jnp.float32)
    y = jnp.maximum(acc * scale_ref[0] + shift_ref[0], 0.0)
    o_ref[0, 0] = y.reshape(th, w_out, -1).astype(o_ref.dtype)


def _conv3x3_bn_relu(x_t, w_col, scale, shift, *, tile_h, out_dtype,
                     compute_dtype):
    n, n_t, thp, wp, cin = x_t.shape
    w_out = wp - 2
    cout = w_col.shape[-1]
    kernel = functools.partial(_conv3x3_bn_relu_kernel,
                               compute_dtype=compute_dtype)
    return pl.pallas_call(
        kernel,
        out_shape=jax.ShapeDtypeStruct((n, n_t, tile_h, w_out, cout), out_dtype),
        grid=(n, n_t),
        in_specs=[
            pl.BlockSpec((1, 1, thp, wp, cin), lambda i, j: (i, j, 0, 0, 0)),
            pl.BlockSpec(w_col.shape, lambda i, j: (0, 0)),
            pl.BlockSpec((1, cout), lambda i, j: (0, 0)),
            pl.BlockSpec((1, cout), lambda i, j: (0, 0)),
        ],
        out_specs=pl.BlockSpec((1, 1, tile_h, w_out, cout),
                               lambda i, j: (i, j, 0, 0, 0)),
        compiler_params=pltpu.CompilerParams(
            dimension_semantics=("parallel", "parallel"),
            vmem_limit_bytes=_VMEM_LIMIT_BYTES),
    )(x_t, w_col, scale, shift)


# ---------------------------------------------------------------------------
# Parameter init (deterministic, synthetic)
# ---------------------------------------------------------------------------
def init_up_params(key, in_ch, out_ch):
    half = in_ch // 2
    ks = jax.random.split(key, 12)

    def nrm(k, shape, s=0.1):
        return jax.random.normal(k, shape, jnp.float32) * s

    p = {}
    # ConvTranspose2d(half, half, 2, stride=2): weight (in, out, kH, kW), bias (out,)
    p["up_w"] = nrm(ks[0], (half, half, 2, 2))
    p["up_b"] = nrm(ks[1], (half,))
    # double_conv: Conv2d(in_ch, out_ch, 3, pad=1) + BN
    p["c1_w"] = nrm(ks[2], (out_ch, in_ch, 3, 3))
    p["c1_b"] = nrm(ks[3], (out_ch,))
    p["bn1_g"] = 1.0 + nrm(ks[4], (out_ch,))
    p["bn1_b"] = nrm(ks[5], (out_ch,))
    p["bn1_m"] = nrm(ks[6], (out_ch,))
    p["bn1_v"] = jnp.abs(nrm(ks[7], (out_ch,))) + 0.5
    # Conv2d(out_ch, out_ch, 3, pad=1) + BN
    p["c2_w"] = nrm(ks[8], (out_ch, out_ch, 3, 3))
    p["c2_b"] = nrm(ks[9], (out_ch,))
    p["bn2_g"] = 1.0 + nrm(ks[10], (out_ch,))
    p["bn2_b"] = nrm(ks[11], (out_ch,))
    p["bn2_m"] = jnp.zeros((out_ch,), jnp.float32)
    p["bn2_v"] = jnp.ones((out_ch,), jnp.float32)
    return p


# ---------------------------------------------------------------------------
# Forward pass of `up` (wrapper; PyTorch-compatible NCHW in/out).
# drop_rate and seed must be Python (static) values.
# ---------------------------------------------------------------------------
def up_forward(params, x1_nchw, x2_nchw, drop_rate, seed=0, eps=1e-5,
               compute_dtype=_COMPUTE_DTYPE):
    f32 = jnp.float32
    x1 = jnp.transpose(x1_nchw, (0, 2, 3, 1)).astype(f32)    # NHWC
    x2 = jnp.transpose(x2_nchw, (0, 2, 3, 1)).astype(f32)
    n, h1, w1, c = x1.shape
    h, w = 2 * h1, 2 * w1
    act_dtype = compute_dtype
    itemsize = jnp.dtype(compute_dtype).itemsize

    # --- ConvTranspose2d(k=2, s=2): two fused matmuls, scatter folded into the
    #     output layout (no wrapper transpose round trip).
    wt = params["up_w"]                                      # (Cin, Cout, kH, kW)
    w_up = jnp.transpose(wt, (2, 0, 3, 1)).reshape(2, c, 2 * c)   # [a][k, b*C+c]
    b_up = jnp.tile(params["up_b"], 2).reshape(1, 2 * c).astype(f32)
    x1u = _conv_transpose_2x2(x1, w_up, b_up, out_dtype=act_dtype,
                              compute_dtype=compute_dtype)   # (N, H, W, C)

    # --- pad x2 exactly like the (quirky) PyTorch source: height-diff pads W,
    #     width-diff pads H, sides (diff//2, int(diff/2)).  The +1 per side is
    #     the 3x3-conv halo, fused into the same pad op.
    diff_x = h - x2.shape[1]          # x1.size(2) - x2.size(2)
    diff_y = w - x2.shape[2]          # x1.size(3) - x2.size(3)
    pad_w_lo, pad_w_hi = diff_x // 2, int(diff_x / 2)
    pad_h_lo, pad_h_hi = diff_y // 2, int(diff_y / 2)
    x2p = jnp.pad(x2.astype(act_dtype),
                  ((0, 0), (pad_h_lo + 1, pad_h_hi + 1),
                   (pad_w_lo + 1, pad_w_hi + 1), (0, 0)))
    assert x2p.shape == (n, h + 2, w + 2, c), x2p.shape
    x1u_p = jnp.pad(x1u, ((0, 0), (1, 1), (1, 1), (0, 0)))

    in_ch = 2 * c
    out_ch = params["c1_w"].shape[0]

    def bn_fold(conv_b, g, beta, m, v):
        scale = g / jnp.sqrt(v + eps)
        shift = beta + (conv_b - m) * scale
        return scale.reshape(1, -1).astype(f32), shift.reshape(1, -1).astype(f32)

    # --- conv1: fused concat + dropout + 3x3 conv + BN + ReLU, tiled (N, H-tiles)
    th1 = _choose_tile(h, w * 9 * in_ch * itemsize, _CONV_TILE_BUDGET)
    x2_t = _halo_tiles(x2p, th1)
    x1_t = _halo_tiles(x1u_p, th1)
    w1_col = jnp.transpose(params["c1_w"], (2, 3, 1, 0)).reshape(9 * in_ch, out_ch)
    s1, sh1 = bn_fold(params["c1_b"], params["bn1_g"], params["bn1_b"],
                      params["bn1_m"], params["bn1_v"])
    y1 = _conv1_fused(x2_t, x1_t, w1_col.astype(compute_dtype), s1, sh1,
                      tile_h=th1, h_tot=h, w_tot=w,
                      drop_rate=float(drop_rate), seed=int(seed),
                      out_dtype=act_dtype, compute_dtype=compute_dtype)
    y1 = y1.reshape(n, h, w, out_ch)

    # --- conv2: 3x3 conv + BN + ReLU, tiled (N, H-tiles)
    th2 = _choose_tile(h, w * 9 * out_ch * itemsize, _CONV_TILE_BUDGET)
    y1_t = _halo_tiles(jnp.pad(y1, ((0, 0), (1, 1), (1, 1), (0, 0))), th2)
    w2_col = jnp.transpose(params["c2_w"], (2, 3, 1, 0)).reshape(9 * out_ch, out_ch)
    s2, sh2 = bn_fold(params["c2_b"], params["bn2_g"], params["bn2_b"],
                      params["bn2_m"], params["bn2_v"])
    y2 = _conv3x3_bn_relu(y1_t, w2_col.astype(compute_dtype), s2, sh2,
                          tile_h=th2, out_dtype=f32, compute_dtype=compute_dtype)
    y2 = y2.reshape(n, h, w, out_ch)

    return jnp.transpose(y2, (0, 3, 1, 2))                   # back to NCHW


if __name__ == "__main__":
    key = jax.random.PRNGKey(0)
    k1, k2, kp = jax.random.split(key, 3)

    in_ch, out_ch = 8, 4
    drop_rate = 0.1
    # x1: decoder feature (N, in_ch//2, 8, 8); x2: skip connection (N, in_ch//2, 16, 16)
    x1 = jax.random.normal(k1, (2, in_ch // 2, 8, 8), jnp.float32)
    x2 = jax.random.normal(k2, (2, in_ch // 2, 16, 16), jnp.float32)
    params = init_up_params(kp, in_ch, out_ch)

    fwd = jax.jit(functools.partial(up_forward, drop_rate=drop_rate, seed=0))
    out = fwd(params, x1, x2)
    jax.block_until_ready(out)
    assert out.shape == (2, out_ch, 16, 16), out.shape
    assert jnp.isfinite(out).all()
    print("KERNEL_OK")
</pallas_src>

<mosaic_0001>
module attributes {stable_mosaic.version = 11 : i64} {
  func.func @_up2x2_kernel(%arg0: i32, %arg1: memref<8x8x4xbf16, #tpu.memory_space<vmem>>, %arg2: memref<2x4x8xbf16, #tpu.memory_space<vmem>>, %arg3: memref<1x8xf32, #tpu.memory_space<vmem>>, %arg4: memref<8x2x8x8xbf16, #tpu.memory_space<vmem>>) attributes {dimension_semantics = [#tpu.dimension_semantics<parallel>], iteration_bounds = array<i64: 2>, scalar_prefetch = 0 : i64, scratch_operands = 0 : i64, tpu.core_type = #tpu.core_type<tc>, window_params = [{transform_indices = @transform_0, window_bounds = array<i64: 8, 8, 4>}, {pipeline_mode = #tpu.pipeline_mode<synchronous>, transform_indices = @transform_1, window_bounds = array<i64: 2, 4, 8>}, {pipeline_mode = #tpu.pipeline_mode<synchronous>, transform_indices = @transform_2, window_bounds = array<i64: 1, 8>}, {transform_indices = @transform_3, window_bounds = array<i64: 8, 2, 8, 8>}]} {
    %c0 = arith.constant 0 : index
    %c0_0 = arith.constant 0 : index
    %c0_1 = arith.constant 0 : index
    %0 = vector.load %arg1[%c0, %c0_0, %c0_1] : memref<8x8x4xbf16, #tpu.memory_space<vmem>>, vector<8x8x4xbf16>
    %1 = vector.shape_cast %0 : vector<8x8x4xbf16> to vector<64x4xbf16>
    %c0_2 = arith.constant 0 : index
    %c0_3 = arith.constant 0 : index
    %2 = vector.load %arg3[%c0_2, %c0_3] : memref<1x8xf32, #tpu.memory_space<vmem>>, vector<1x8xf32>
    %3 = vector.shape_cast %2 : vector<1x8xf32> to vector<8xf32>
    %c0_4 = arith.constant 0 : index
    %c0_5 = arith.constant 0 : index
    %c0_6 = arith.constant 0 : index
    %4 = vector.load %arg2[%c0_4, %c0_5, %c0_6] : memref<2x4x8xbf16, #tpu.memory_space<vmem>>, vector<1x4x8xbf16>
    %5 = vector.shape_cast %4 : vector<1x4x8xbf16> to vector<4x8xbf16>
    %cst = arith.constant dense<0.000000e+00> : vector<64x8xf32>
    %6 = tpu.matmul %1, %5, %cst {dimension_numbers = #tpu.dot_dimension_numbers<[1], [0], [0], [1], [0, 0, 1, 1], [], []>} : vector<64x4xbf16>, vector<4x8xbf16>, vector<64x8xf32> -> vector<64x8xf32>
    %7 = vector.shape_cast %3 : vector<8xf32> to vector<1x8xf32>
    %8 = vector.broadcast %7 : vector<1x8xf32> to vector<64x8xf32>
    %9 = arith.addf %6, %8 : vector<64x8xf32>
    %10 = vector.shape_cast %9 : vector<64x8xf32> to vector<8x8x8xf32>
    %11 = arith.truncf %10 : vector<8x8x8xf32> to vector<8x8x8xbf16>
    %c0_7 = arith.constant 0 : index
    %c0_8 = arith.constant 0 : index
    %c0_9 = arith.constant 0 : index
    %c0_10 = arith.constant 0 : index
    %12 = vector.load %arg4[%c0_7, %c0_8, %c0_9, %c0_10] : memref<8x2x8x8xbf16, #tpu.memory_space<vmem>>, vector<8x1x8x8xbf16>
    %13 = vector.shape_cast %12 : vector<8x1x8x8xbf16> to vector<8x8x8xbf16>
    %14 = vector.shape_cast %11 : vector<8x8x8xbf16> to vector<8x1x8x8xbf16>
    tpu.vector_store %arg4[%c0_7, %c0_8, %c0_9, %c0_10], %14 {strides = array<i32>} : memref<8x2x8x8xbf16, #tpu.memory_space<vmem>>, vector<8x1x8x8xbf16>,
    %c1 = arith.constant 1 : index
    %c0_11 = arith.constant 0 : index
    %c0_12 = arith.constant 0 : index
    %15 = vector.load %arg2[%c1, %c0_11, %c0_12] : memref<2x4x8xbf16, #tpu.memory_space<vmem>>, vector<1x4x8xbf16>
    %16 = vector.shape_cast %15 : vector<1x4x8xbf16> to vector<4x8xbf16>
    %cst_13 = arith.constant dense<0.000000e+00> : vector<64x8xf32>
    %17 = tpu.matmul %1, %16, %cst_13 {dimension_numbers = #tpu.dot_dimension_numbers<[1], [0], [0], [1], [0, 0, 1, 1], [], []>} : vector<64x4xbf16>, vector<4x8xbf16>, vector<64x8xf32> -> vector<64x8xf32>
    %18 = vector.shape_cast %3 : vector<8xf32> to vector<1x8xf32>
    %19 = vector.broadcast %18 : vector<1x8xf32> to vector<64x8xf32>
    %20 = arith.addf %17, %19 : vector<64x8xf32>
    %21 = vector.shape_cast %20 : vector<64x8xf32> to vector<8x8x8xf32>
    %22 = arith.truncf %21 : vector<8x8x8xf32> to vector<8x8x8xbf16>
    %c0_14 = arith.constant 0 : index
    %c1_15 = arith.constant 1 : index
    %c0_16 = arith.constant 0 : index
    %c0_17 = arith.constant 0 : index
    %23 = vector.load %arg4[%c0_14, %c1_15, %c0_16, %c0_17] : memref<8x2x8x8xbf16, #tpu.memory_space<vmem>>, vector<8x1x8x8xbf16>
    %24 = vector.shape_cast %23 : vector<8x1x8x8xbf16> to vector<8x8x8xbf16>
    %25 = vector.shape_cast %22 : vector<8x8x8xbf16> to vector<8x1x8x8xbf16>
    tpu.vector_store %arg4[%c0_14, %c1_15, %c0_16, %c0_17], %25 {strides = array<i32>} : memref<8x2x8x8xbf16, #tpu.memory_space<vmem>>, vector<8x1x8x8xbf16>,
    return
  }
  func.func @transform_0(%arg0: i32) -> (i32, i32, i32) {
    %c0_i32 = arith.constant 0 : i32
    %c0_i32_0 = arith.constant 0 : i32
    %c0_i32_1 = arith.constant 0 : i32
    return %arg0, %c0_i32, %c0_i32_0 : i32, i32, i32
  }
  func.func @transform_1(%arg0: i32) -> (i32, i32, i32) {
    %c0_i32 = arith.constant 0 : i32
    %c0_i32_0 = arith.constant 0 : i32
    %c0_i32_1 = arith.constant 0 : i32
    %c0_i32_2 = arith.constant 0 : i32
    return %c0_i32, %c0_i32_0, %c0_i32_1 : i32, i32, i32
  }
  func.func @transform_2(%arg0: i32) -> (i32, i32) {
    %c0_i32 = arith.constant 0 : i32
    %c0_i32_0 = arith.constant 0 : i32
    %c0_i32_1 = arith.constant 0 : i32
    return %c0_i32, %c0_i32_0 : i32, i32
  }
  func.func @transform_3(%arg0: i32) -> (i32, i32, i32, i32) {
    %c0_i32 = arith.constant 0 : i32
    %c0_i32_0 = arith.constant 0 : i32
    %c0_i32_1 = arith.constant 0 : i32
    %c0_i32_2 = arith.constant 0 : i32
    return %arg0, %c0_i32, %c0_i32_0, %c0_i32_1 : i32, i32, i32, i32
  }
}

module attributes {stable_mosaic.version = 11 : i64} {
  func.func @_conv1_fused_kernel(%arg0: i32, %arg1: i32, %arg2: memref<1x1x10x18x4xbf16, #tpu.memory_space<vmem>>, %arg3: memref<1x1x10x18x4xbf16, #tpu.memory_space<vmem>>, %arg4: memref<72x4xbf16, #tpu.memory_space<vmem>>, %arg5: memref<1x4xf32, #tpu.memory_space<vmem>>, %arg6: memref<1x4xf32, #tpu.memory_space<vmem>>, %arg7: memref<1x1x8x16x4xbf16, #tpu.memory_space<vmem>>) attributes {dimension_semantics = [#tpu.dimension_semantics<parallel>, #tpu.dimension_semantics<parallel>], iteration_bounds = array<i64: 2, 2>, scalar_prefetch = 0 : i64, scratch_operands = 0 : i64, tpu.core_type = #tpu.core_type<tc>, window_params = [{transform_indices = @transform_0, window_bounds = array<i64: 1, 1, 10, 18, 4>}, {transform_indices = @transform_1, window_bounds = array<i64: 1, 1, 10, 18, 4>}, {pipeline_mode = #tpu.pipeline_mode<synchronous>, transform_indices = @transform_2, window_bounds = array<i64: 72, 4>}, {pipeline_mode = #tpu.pipeline_mode<synchronous>, transform_indices = @transform_3, window_bounds = array<i64: 1, 4>}, {pipeline_mode = #tpu.pipeline_mode<synchronous>, transform_indices = @transform_4, window_bounds = array<i64: 1, 4>}, {transform_indices = @transform_5, window_bounds = array<i64: 1, 1, 8, 16, 4>}]} {
    %c0 = arith.constant 0 : index
    %c0_0 = arith.constant 0 : index
    %c0_1 = arith.constant 0 : index
    %c0_2 = arith.constant 0 : index
    %c0_3 = arith.constant 0 : index
    %0 = vector.load %arg2[%c0, %c0_0, %c0_1, %c0_2, %c0_3] : memref<1x1x10x18x4xbf16, #tpu.memory_space<vmem>>, vector<1x1x10x18x4xbf16>
    %1 = vector.shape_cast %0 : vector<1x1x10x18x4xbf16> to vector<10x18x4xbf16>
    %c0_4 = arith.constant 0 : index
    %c0_5 = arith.constant 0 : index
    %c0_6 = arith.constant 0 : index
    %c0_7 = arith.constant 0 : index
    %c0_8 = arith.constant 0 : index
    %2 = vector.load %arg3[%c0_4, %c0_5, %c0_6, %c0_7, %c0_8] : memref<1x1x10x18x4xbf16, #tpu.memory_space<vmem>>, vector<1x1x10x18x4xbf16>
    %3 = vector.shape_cast %2 : vector<1x1x10x18x4xbf16> to vector<10x18x4xbf16>
    %4 = tpu.concatenate %1, %3 in 2 : vector<10x18x4xbf16>, vector<10x18x4xbf16> -> vector<10x18x8xbf16>
    %5 = tpu.iota {dimensions = array<i32: 0>} : vector<10x18x8xi32>
    %6 = tpu.iota {dimensions = array<i32: 1>} : vector<10x18x8xi32>
    %7 = tpu.iota {dimensions = array<i32: 2>} : vector<10x18x8xi32>
    %c8_i32 = arith.constant 8 : i32
    %8 = arith.muli %arg1, %c8_i32 : i32
    %9 = vector.broadcast %8 : i32 to vector<10x18x8xi32>
    %10 = arith.addi %9, %5 : vector<10x18x8xi32>
    %c1_i32 = arith.constant 1 : i32
    %11 = vector.broadcast %c1_i32 : i32 to vector<10x18x8xi32>
    %12 = arith.subi %10, %11 : vector<10x18x8xi32>
    %c1_i32_9 = arith.constant 1 : i32
    %13 = vector.broadcast %c1_i32_9 : i32 to vector<10x18x8xi32>
    %14 = arith.subi %6, %13 : vector<10x18x8xi32>
    %c16_i32 = arith.constant 16 : i32
    %15 = arith.muli %arg0, %c16_i32 : i32
    %16 = vector.broadcast %15 : i32 to vector<10x18x8xi32>
    %17 = arith.addi %16, %12 : vector<10x18x8xi32>
    %c16_i32_10 = arith.constant 16 : i32
    %18 = vector.broadcast %c16_i32_10 : i32 to vector<10x18x8xi32>
    %19 = arith.muli %17, %18 : vector<10x18x8xi32>
    %20 = arith.addi %19, %14 : vector<10x18x8xi32>
    %c8_i32_11 = arith.constant 8 : i32
    %21 = vector.broadcast %c8_i32_11 : i32 to vector<10x18x8xi32>
    %22 = arith.muli %20, %21 : vector<10x18x8xi32>
    %23 = arith.addi %22, %7 : vector<10x18x8xi32>
    %c-1640531535_i32 = arith.constant -1640531535 : i32
    %24 = vector.broadcast %c-1640531535_i32 : i32 to vector<10x18x8xi32>
    %25 = arith.muli %23, %24 : vector<10x18x8xi32>
    %c1540483477_i32 = arith.constant 1540483477 : i32
    %26 = vector.broadcast %c1540483477_i32 : i32 to vector<10x18x8xi32>
    %27 = arith.addi %25, %26 : vector<10x18x8xi32>
    %c15_i32 = arith.constant 15 : i32
    %28 = vector.broadcast %c15_i32 : i32 to vector<10x18x8xi32>
    %29 = arith.shrui %27, %28 : vector<10x18x8xi32>
    %30 = arith.xori %27, %29 : vector<10x18x8xi32>
    %c-2048144789_i32 = arith.constant -2048144789 : i32
    %31 = vector.broadcast %c-2048144789_i32 : i32 to vector<10x18x8xi32>
    %32 = arith.muli %30, %31 : vector<10x18x8xi32>
    %c13_i32 = arith.constant 13 : i32
    %33 = vector.broadcast %c13_i32 : i32 to vector<10x18x8xi32>
    %34 = arith.shrui %32, %33 : vector<10x18x8xi32>
    %35 = arith.xori %32, %34 : vector<10x18x8xi32>
    %c-1028477387_i32 = arith.constant -1028477387 : i32
    %36 = vector.broadcast %c-1028477387_i32 : i32 to vector<10x18x8xi32>
    %37 = arith.muli %35, %36 : vector<10x18x8xi32>
    %c16_i32_12 = arith.constant 16 : i32
    %38 = vector.broadcast %c16_i32_12 : i32 to vector<10x18x8xi32>
    %39 = arith.shrui %37, %38 : vector<10x18x8xi32>
    %40 = arith.xori %37, %39 : vector<10x18x8xi32>
    %c429496730_i32 = arith.constant 429496730 : i32
    %41 = vector.broadcast %c429496730_i32 : i32 to vector<10x18x8xi32>
    %42 = arith.cmpi uge, %40, %41 : vector<10x18x8xi32>
    %cst = arith.constant 1.109380e+00 : bf16
    %43 = vector.broadcast %cst : bf16 to vector<10x18x8xbf16>
    %44 = arith.mulf %4, %43 : vector<10x18x8xbf16>
    %cst_13 = arith.constant 0.000000e+00 : f32
    %45 = arith.truncf %cst_13 : f32 to bf16
    %46 = vector.broadcast %45 : bf16 to vector<10x18x8xbf16>
    %47 = arith.select %42, %44, %46 : vector<10x18x8xi1>, vector<10x18x8xbf16>
    %48 = vector.extract_strided_slice %47 {offsets = [0, 0, 0], sizes = [8, 16, 8], strides = [1, 1, 1]} : vector<10x18x8xbf16> to vector<8x16x8xbf16>
    %49 = vector.extract_strided_slice %47 {offsets = [0, 1, 0], sizes = [8, 16, 8], strides = [1, 1, 1]} : vector<10x18x8xbf16> to vector<8x16x8xbf16>
    %50 = vector.extract_strided_slice %47 {offsets = [0, 2, 0], sizes = [8, 16, 8], strides = [1, 1, 1]} : vector<10x18x8xbf16> to vector<8x16x8xbf16>
    %51 = vector.extract_strided_slice %47 {offsets = [1, 0, 0], sizes = [8, 16, 8], strides = [1, 1, 1]} : vector<10x18x8xbf16> to vector<8x16x8xbf16>
    %52 = vector.extract_strided_slice %47 {offsets = [1, 1, 0], sizes = [8, 16, 8], strides = [1, 1, 1]} : vector<10x18x8xbf16> to vector<8x16x8xbf16>
    %53 = vector.extract_strided_slice %47 {offsets = [1, 2, 0], sizes = [8, 16, 8], strides = [1, 1, 1]} : vector<10x18x8xbf16> to vector<8x16x8xbf16>
    %54 = vector.extract_strided_slice %47 {offsets = [2, 0, 0], sizes = [8, 16, 8], strides = [1, 1, 1]} : vector<10x18x8xbf16> to vector<8x16x8xbf16>
    %55 = vector.extract_strided_slice %47 {offsets = [2, 1, 0], sizes = [8, 16, 8], strides = [1, 1, 1]} : vector<10x18x8xbf16> to vector<8x16x8xbf16>
    %56 = vector.extract_strided_slice %47 {offsets = [2, 2, 0], sizes = [8, 16, 8], strides = [1, 1, 1]} : vector<10x18x8xbf16> to vector<8x16x8xbf16>
    %57 = tpu.concatenate %48, %49, %50, %51, %52, %53, %54, %55, %56 in 2 : vector<8x16x8xbf16>, vector<8x16x8xbf16>, vector<8x16x8xbf16>, vector<8x16x8xbf16>, vector<8x16x8xbf16>, vector<8x16x8xbf16>, vector<8x16x8xbf16>, vector<8x16x8xbf16>, vector<8x16x8xbf16> -> vector<8x16x72xbf16>
    %58 = vector.shape_cast %57 : vector<8x16x72xbf16> to vector<128x72xbf16>
    %c0_14 = arith.constant 0 : index
    %c0_15 = arith.constant 0 : index
    %59 = vector.load %arg4[%c0_14, %c0_15] : memref<72x4xbf16, #tpu.memory_space<vmem>>, vector<72x4xbf16>
    %cst_16 = arith.constant dense<0.000000e+00> : vector<128x4xf32>
    %60 = tpu.matmul %58, %59, %cst_16 {dimension_numbers = #tpu.dot_dimension_numbers<[1], [0], [0], [1], [0, 0, 1, 1], [], []>} : vector<128x72xbf16>, vector<72x4xbf16>, vector<128x4xf32> -> vector<128x4xf32>
    %c0_17 = arith.constant 0 : index
    %c0_18 = arith.constant 0 : index
    %61 = vector.load %arg5[%c0_17, %c0_18] : memref<1x4xf32, #tpu.memory_space<vmem>>, vector<1x4xf32>
    %62 = vector.shape_cast %61 : vector<1x4xf32> to vector<4xf32>
    %63 = vector.shape_cast %62 : vector<4xf32> to vector<1x4xf32>
    %64 = vector.broadcast %63 : vector<1x4xf32> to vector<128x4xf32>
    %65 = arith.mulf %60, %64 : vector<128x4xf32>
    %c0_19 = arith.constant 0 : index
    %c0_20 = arith.constant 0 : index
    %66 = vector.load %arg6[%c0_19, %c0_20] : memref<1x4xf32, #tpu.memory_space<vmem>>, vector<1x4xf32>
    %67 = vector.shape_cast %66 : vector<1x4xf32> to vector<4xf32>
    %68 = vector.shape_cast %67 : vector<4xf32> to vector<1x4xf32>
    %69 = vector.broadcast %68 : vector<1x4xf32> to vector<128x4xf32>
    %70 = arith.addf %65, %69 : vector<128x4xf32>
    %cst_21 = arith.constant 0.000000e+00 : f32
    %71 = vector.broadcast %cst_21 : f32 to vector<128x4xf32>
    %72 = arith.maximumf %70, %71 : vector<128x4xf32>
    %73 = vector.shape_cast %72 : vector<128x4xf32> to vector<8x16x4xf32>
    %74 = arith.truncf %73 : vector<8x16x4xf32> to vector<8x16x4xbf16>
    %c0_22 = arith.constant 0 : index
    %c0_23 = arith.constant 0 : index
    %c0_24 = arith.constant 0 : index
    %c0_25 = arith.constant 0 : index
    %c0_26 = arith.constant 0 : index
    %75 = vector.load %arg7[%c0_22, %c0_23, %c0_24, %c0_25, %c0_26] : memref<1x1x8x16x4xbf16, #tpu.memory_space<vmem>>, vector<1x1x8x16x4xbf16>
    %76 = vector.shape_cast %75 : vector<1x1x8x16x4xbf16> to vector<8x16x4xbf16>
    %77 = vector.shape_cast %74 : vector<8x16x4xbf16> to vector<1x1x8x16x4xbf16>
    tpu.vector_store %arg7[%c0_22, %c0_23, %c0_24, %c0_25, %c0_26], %77 {strides = array<i32>} : memref<1x1x8x16x4xbf16, #tpu.memory_space<vmem>>, vector<1x1x8x16x4xbf16>,
    return
  }
  func.func @transform_0(%arg0: i32, %arg1: i32) -> (i32, i32, i32, i32, i32) {
    %c0_i32 = arith.constant 0 : i32
    %c0_i32_0 = arith.constant 0 : i32
    %c0_i32_1 = arith.constant 0 : i32
    %c0_i32_2 = arith.constant 0 : i32
    return %arg0, %arg1, %c0_i32, %c0_i32_0, %c0_i32_1 : i32, i32, i32, i32, i32
  }
  func.func @transform_1(%arg0: i32, %arg1: i32) -> (i32, i32, i32, i32, i32) {
    %c0_i32 = arith.constant 0 : i32
    %c0_i32_0 = arith.constant 0 : i32
    %c0_i32_1 = arith.constant 0 : i32
    %c0_i32_2 = arith.constant 0 : i32
    return %arg0, %arg1, %c0_i32, %c0_i32_0, %c0_i32_1 : i32, i32, i32, i32, i32
  }
  func.func @transform_2(%arg0: i32, %arg1: i32) -> (i32, i32) {
    %c0_i32 = arith.constant 0 : i32
    %c0_i32_0 = arith.constant 0 : i32
    %c0_i32_1 = arith.constant 0 : i32
    return %c0_i32, %c0_i32_0 : i32, i32
  }
  func.func @transform_3(%arg0: i32, %arg1: i32) -> (i32, i32) {
    %c0_i32 = arith.constant 0 : i32
    %c0_i32_0 = arith.constant 0 : i32
    %c0_i32_1 = arith.constant 0 : i32
    return %c0_i32, %c0_i32_0 : i32, i32
  }
  func.func @transform_4(%arg0: i32, %arg1: i32) -> (i32, i32) {
    %c0_i32 = arith.constant 0 : i32
    %c0_i32_0 = arith.constant 0 : i32
    %c0_i32_1 = arith.constant 0 : i32
    return %c0_i32, %c0_i32_0 : i32, i32
  }
  func.func @transform_5(%arg0: i32, %arg1: i32) -> (i32, i32, i32, i32, i32) {
    %c0_i32 = arith.constant 0 : i32
    %c0_i32_0 = arith.constant 0 : i32
    %c0_i32_1 = arith.constant 0 : i32
    %c0_i32_2 = arith.constant 0 : i32
    return %arg0, %arg1, %c0_i32, %c0_i32_0, %c0_i32_1 : i32, i32, i32, i32, i32
  }
}

module attributes {stable_mosaic.version = 11 : i64} {
  func.func @_conv3x3_bn_relu_kernel(%arg0: i32, %arg1: i32, %arg2: memref<1x1x10x18x4xbf16, #tpu.memory_space<vmem>>, %arg3: memref<36x4xbf16, #tpu.memory_space<vmem>>, %arg4: memref<1x4xf32, #tpu.memory_space<vmem>>, %arg5: memref<1x4xf32, #tpu.memory_space<vmem>>, %arg6: memref<1x1x8x16x4xf32, #tpu.memory_space<vmem>>) attributes {dimension_semantics = [#tpu.dimension_semantics<parallel>, #tpu.dimension_semantics<parallel>], iteration_bounds = array<i64: 2, 2>, scalar_prefetch = 0 : i64, scratch_operands = 0 : i64, tpu.core_type = #tpu.core_type<tc>, window_params = [{transform_indices = @transform_0, window_bounds = array<i64: 1, 1, 10, 18, 4>}, {pipeline_mode = #tpu.pipeline_mode<synchronous>, transform_indices = @transform_1, window_bounds = array<i64: 36, 4>}, {pipeline_mode = #tpu.pipeline_mode<synchronous>, transform_indices = @transform_2, window_bounds = array<i64: 1, 4>}, {pipeline_mode = #tpu.pipeline_mode<synchronous>, transform_indices = @transform_3, window_bounds = array<i64: 1, 4>}, {transform_indices = @transform_4, window_bounds = array<i64: 1, 1, 8, 16, 4>}]} {
    %c0 = arith.constant 0 : index
    %c0_0 = arith.constant 0 : index
    %c0_1 = arith.constant 0 : index
    %c0_2 = arith.constant 0 : index
    %c0_3 = arith.constant 0 : index
    %0 = vector.load %arg2[%c0, %c0_0, %c0_1, %c0_2, %c0_3] : memref<1x1x10x18x4xbf16, #tpu.memory_space<vmem>>, vector<1x1x10x18x4xbf16>
    %1 = vector.shape_cast %0 : vector<1x1x10x18x4xbf16> to vector<10x18x4xbf16>
    %2 = vector.extract_strided_slice %1 {offsets = [0, 0, 0], sizes = [8, 16, 4], strides = [1, 1, 1]} : vector<10x18x4xbf16> to vector<8x16x4xbf16>
    %3 = vector.extract_strided_slice %1 {offsets = [0, 1, 0], sizes = [8, 16, 4], strides = [1, 1, 1]} : vector<10x18x4xbf16> to vector<8x16x4xbf16>
    %4 = vector.extract_strided_slice %1 {offsets = [0, 2, 0], sizes = [8, 16, 4], strides = [1, 1, 1]} : vector<10x18x4xbf16> to vector<8x16x4xbf16>
    %5 = vector.extract_strided_slice %1 {offsets = [1, 0, 0], sizes = [8, 16, 4], strides = [1, 1, 1]} : vector<10x18x4xbf16> to vector<8x16x4xbf16>
    %6 = vector.extract_strided_slice %1 {offsets = [1, 1, 0], sizes = [8, 16, 4], strides = [1, 1, 1]} : vector<10x18x4xbf16> to vector<8x16x4xbf16>
    %7 = vector.extract_strided_slice %1 {offsets = [1, 2, 0], sizes = [8, 16, 4], strides = [1, 1, 1]} : vector<10x18x4xbf16> to vector<8x16x4xbf16>
    %8 = vector.extract_strided_slice %1 {offsets = [2, 0, 0], sizes = [8, 16, 4], strides = [1, 1, 1]} : vector<10x18x4xbf16> to vector<8x16x4xbf16>
    %9 = vector.extract_strided_slice %1 {offsets = [2, 1, 0], sizes = [8, 16, 4], strides = [1, 1, 1]} : vector<10x18x4xbf16> to vector<8x16x4xbf16>
    %10 = vector.extract_strided_slice %1 {offsets = [2, 2, 0], sizes = [8, 16, 4], strides = [1, 1, 1]} : vector<10x18x4xbf16> to vector<8x16x4xbf16>
    %11 = tpu.concatenate %2, %3, %4, %5, %6, %7, %8, %9, %10 in 2 : vector<8x16x4xbf16>, vector<8x16x4xbf16>, vector<8x16x4xbf16>, vector<8x16x4xbf16>, vector<8x16x4xbf16>, vector<8x16x4xbf16>, vector<8x16x4xbf16>, vector<8x16x4xbf16>, vector<8x16x4xbf16> -> vector<8x16x36xbf16>
    %12 = vector.shape_cast %11 : vector<8x16x36xbf16> to vector<128x36xbf16>
    %c0_4 = arith.constant 0 : index
    %c0_5 = arith.constant 0 : index
    %13 = vector.load %arg3[%c0_4, %c0_5] : memref<36x4xbf16, #tpu.memory_space<vmem>>, vector<36x4xbf16>
    %cst = arith.constant dense<0.000000e+00> : vector<128x4xf32>
    %14 = tpu.matmul %12, %13, %cst {dimension_numbers = #tpu.dot_dimension_numbers<[1], [0], [0], [1], [0, 0, 1, 1], [], []>} : vector<128x36xbf16>, vector<36x4xbf16>, vector<128x4xf32> -> vector<128x4xf32>
    %c0_6 = arith.constant 0 : index
    %c0_7 = arith.constant 0 : index
    %15 = vector.load %arg4[%c0_6, %c0_7] : memref<1x4xf32, #tpu.memory_space<vmem>>, vector<1x4xf32>
    %16 = vector.shape_cast %15 : vector<1x4xf32> to vector<4xf32>
    %17 = vector.shape_cast %16 : vector<4xf32> to vector<1x4xf32>
    %18 = vector.broadcast %17 : vector<1x4xf32> to vector<128x4xf32>
    %19 = arith.mulf %14, %18 : vector<128x4xf32>
    %c0_8 = arith.constant 0 : index
    %c0_9 = arith.constant 0 : index
    %20 = vector.load %arg5[%c0_8, %c0_9] : memref<1x4xf32, #tpu.memory_space<vmem>>, vector<1x4xf32>
    %21 = vector.shape_cast %20 : vector<1x4xf32> to vector<4xf32>
    %22 = vector.shape_cast %21 : vector<4xf32> to vector<1x4xf32>
    %23 = vector.broadcast %22 : vector<1x4xf32> to vector<128x4xf32>
    %24 = arith.addf %19, %23 : vector<128x4xf32>
    %cst_10 = arith.constant 0.000000e+00 : f32
    %25 = vector.broadcast %cst_10 : f32 to vector<128x4xf32>
    %26 = arith.maximumf %24, %25 : vector<128x4xf32>
    %27 = vector.shape_cast %26 : vector<128x4xf32> to vector<8x16x4xf32>
    %c0_11 = arith.constant 0 : index
    %c0_12 = arith.constant 0 : index
    %c0_13 = arith.constant 0 : index
    %c0_14 = arith.constant 0 : index
    %c0_15 = arith.constant 0 : index
    %28 = vector.load %arg6[%c0_11, %c0_12, %c0_13, %c0_14, %c0_15] : memref<1x1x8x16x4xf32, #tpu.memory_space<vmem>>, vector<1x1x8x16x4xf32>
    %29 = vector.shape_cast %28 : vector<1x1x8x16x4xf32> to vector<8x16x4xf32>
    %30 = vector.shape_cast %27 : vector<8x16x4xf32> to vector<1x1x8x16x4xf32>
    tpu.vector_store %arg6[%c0_11, %c0_12, %c0_13, %c0_14, %c0_15], %30 {strides = array<i32>} : memref<1x1x8x16x4xf32, #tpu.memory_space<vmem>>, vector<1x1x8x16x4xf32>,
    return
  }
  func.func @transform_0(%arg0: i32, %arg1: i32) -> (i32, i32, i32, i32, i32) {
    %c0_i32 = arith.constant 0 : i32
    %c0_i32_0 = arith.constant 0 : i32
    %c0_i32_1 = arith.constant 0 : i32
    %c0_i32_2 = arith.constant 0 : i32
    return %arg0, %arg1, %c0_i32, %c0_i32_0, %c0_i32_1 : i32, i32, i32, i32, i32
  }
  func.func @transform_1(%arg0: i32, %arg1: i32) -> (i32, i32) {
    %c0_i32 = arith.constant 0 : i32
    %c0_i32_0 = arith.constant 0 : i32
    %c0_i32_1 = arith.constant 0 : i32
    return %c0_i32, %c0_i32_0 : i32, i32
  }
  func.func @transform_2(%arg0: i32, %arg1: i32) -> (i32, i32) {
    %c0_i32 = arith.constant 0 : i32
    %c0_i32_0 = arith.constant 0 : i32
    %c0_i32_1 = arith.constant 0 : i32
    return %c0_i32, %c0_i32_0 : i32, i32
  }
  func.func @transform_3(%arg0: i32, %arg1: i32) -> (i32, i32) {
    %c0_i32 = arith.constant 0 : i32
    %c0_i32_0 = arith.constant 0 : i32
    %c0_i32_1 = arith.constant 0 : i32
    return %c0_i32, %c0_i32_0 : i32, i32
  }
  func.func @transform_4(%arg0: i32, %arg1: i32) -> (i32, i32, i32, i32, i32) {
    %c0_i32 = arith.constant 0 : i32
    %c0_i32_0 = arith.constant 0 : i32
    %c0_i32_1 = arith.constant 0 : i32
    %c0_i32_2 = arith.constant 0 : i32
    return %arg0, %arg1, %c0_i32, %c0_i32_0, %c0_i32_1 : i32, i32, i32, i32, i32
  }
}

</mosaic_0001>

<bundles_post_ra>
// kernel: tile.9
= control target key start
LH: loop header
LB: loop body
LE: loop exit
PB: predicated region body
PF: predicated region fallthrough
CT: control target
= control target key end

     0   :  { %vm7_vm0 = vcmask 31744   ;;  %vm13_vm1 = vcmask 64544   ;;  %s39_s0 = inlined_call_operand.vmem [shape: f32[2,4], index: 0, kind: input, shape index: {}]   ;;  %s40_s1 = inlined_call_operand.vmem [shape: f32[1,8], index: 1, kind: output, shape index: {}]  }
   0x1   :  { %v4_v0 = vld [vmem:[%s39_s0] sm:$0x3]  ;;  %s22_s0 = smov 4  }
   0x2   :  { %5 = vst [vmem:[#allocation1] sm:$0x3] %v4_v0 }
   0x9   :  { %v10_v1 = vld [vmem:[#allocation1 + $0x1] sm:$0x1]   ;;  %v6_v2 = vld [vmem:[#allocation1] sm:$0x1]  }
   0xa   :  { %11 = vrot.lane.b32.xlu0 %v10_v1, %s22_s0  ;;  %8 = vst.msk [vmem:[#allocation0] sm:$0x1] %vm7_vm0, %v6_v2  }
  0x7c   :  { %v12_v3 = vpop.permute.xlu0 %11  }
  0x7d   :  { %14 = vst.msk [vmem:[#allocation0] sm:$0x1] %vm13_vm1, %v12_v3  }
  0x84   :  { %v17_v4 = vld [vmem:[#allocation0] sm:$0x1] }
  0x85   :  { %20 = vst [vmem:[%s40_s1] sm:$0x1] %v17_v4 }

// kernel: tile.8
= control target key start
LH: loop header
LB: loop body
LE: loop exit
PB: predicated region body
PF: predicated region fallthrough
CT: control target
= control target key end

     0   :  { %s22_s0 = inlined_call_operand.vmem [shape: f32[4], index: 0, kind: input, shape index: {}]   ;;  %s23_s1 = inlined_call_operand.vmem [shape: f32[2,4], index: 1, kind: output, shape index: {}]  }
   0x1   :  { %v4_v0 = vld [vmem:[%s22_s0] ss:$0 sm:$0xff] }
   0x2   :  { %5 = vst [vmem:[%s23_s1] sm:$0x3] %v4_v0 }

// kernel: up_forward.3
= control target key start
LH: loop header
LB: loop body
LE: loop exit
PB: predicated region body
PF: predicated region fallthrough
CT: control target
= control target key end

     0   :  { %s471_s12 = smov 0   ;;  %s549_s0 = inlined_call_operand.vmem [shape: bf16[16,8,4], index: 0, kind: input, shape index: {}]   ;;  %s550_s1 = inlined_call_operand.vmem [shape: bf16[2,4,8], index: 1, kind: input, shape index: {}]   ;;  %s551_s2 = inlined_call_operand.vmem [shape: f32[1,8], index: 2, kind: input, shape index: {}]   ;;  %s552_s3 = inlined_call_operand.vmem [shape: bf16[16,2,8,8], index: 3, kind: output, shape index: {}]  }
   0x1 LB: > { %s382_s13 = sadd.s32 4294967295, %s449_s12   ;;  %p386_p0 = scmp.ge.s32.totalorder %s449_s12, 1  ;;  %s449_s12 = sphi %s471_s12, %s13_s12  }
   0x2   : > { %p138_p1 = scmp.lt.s32.totalorder %s449_s12, 3 }
   0x4   : > { %p139_p2 = pnand %p386_p0, %p138_p1 }
   0x5   : > { %s387_s18 = sshll.u32 (!%p139_p2), %s382_s13, 3 }
   0x6   : > { %142 = sbr.rel (%p139_p2) target bundleno = 178 (0xb2), region = 32  ;;  %p164_p3 = scmp.lt.s32.totalorder (!%p139_p2), %s387_s18, 15 }
   0xb   : > { %v186_v0 = vld [vmem:[%s550_s1] sm:$0x3]  ;;  %vm223_vm0 = vcmask 1041408   ;;  %v412_v1 = vld [vmem:[%s550_s1 + $0x2] sm:$0x3]  ;;  %s554_s18 = smov (!%p164_p3, %s387_s18), 15 }
   0xc   : > { %v225_v2 = vsel %vm223_vm0, %v186_v0, 0  ;;  %v276_v3 = vsel %vm223_vm0, %v412_v1, 0  ;;  %s388_s19 = sshll.u32 %s554_s18, 2  ;;  %vm210_vm1 = vcmask 31744   ;;  %v491_v8 = vld [vmem:[%s551_s2] ss:$0 sm:$0xff] }
   0xd   : > { %234 = vmatpush.bf16.msra.mxu0 %v225_v2  ;;  %432 = vmatpush.bf16.msra.mxu2 %v225_v2  ;;  %s167_s22 = scalar_lea.vmem %s549_s0, %s388_s19  ;;  %s427_s25 = sshll.u32 %s554_s18, 3  ;;  %vm264_vm2 = vcmask 60416  }
   0xe   : > { %285 = vmatpush.bf16.msra.mxu1 %v276_v3  ;;  %433 = vmatpush.bf16.msra.mxu3 %v276_v3  ;;  %v428_v4 = vld [vmem:[%s167_s22] sm:$0xff]  ;;  %v430_v5 = vld [vmem:[%s167_s22 + $0x10] sm:$0xff]  ;;  %v429_v6 = vld [vmem:[%s167_s22 + $0x8] sm:$0xff]  ;;  %s497_s28 = scalar_lea.vmem %s552_s3, %s427_s25 }
   0xf   : > { %v431_v7 = vld [vmem:[%s167_s22 + $0x18] sm:$0xff] }
  0x10   : > { %408 = vmatmul.msk.bf16.vlgmr.msra.gmra.mxu0 %vm210_vm1, %v428_v4  ;;  %410 = vmatmul.msk.bf16.vlgmr.msra.gmra.mxu2 %vm210_vm1, %v430_v5 }
  0x11   : > { %413 = vmatmul.msk.bf16.vlgmr.msra.gmra.mxu1 %vm210_vm1, %v428_v4  ;;  %415 = vmatmul.msk.bf16.vlgmr.msra.gmra.mxu3 %vm210_vm1, %v430_v5 }
  0x20   : > { %409 = vmatmul.msk.bf16.gmra.mxu0 %vm210_vm1, %v429_v6  ;;  %411 = vmatmul.msk.bf16.gmra.mxu2 %vm210_vm1, %v431_v7 }
  0x21   : > { %414 = vmatmul.msk.bf16.gmra.mxu1 %vm210_vm1, %v429_v6  ;;  %416 = vmatmul.msk.bf16.gmra.mxu3 %vm210_vm1, %v431_v7 }
  0x8d   : > { %v236_v9 = vpop.f32.mrf.mxu0 }
  0x8e   : > { %v237_v10 = vadd.f32 %v491_v8, %v236_v9  ;;  %v287_v11 = vpop.f32.mrf.mxu1 }
  0x8f   : > { %v288_v12 = vadd.f32 %v491_v8, %v287_v11 }
  0x90   : > { %v256_v13 = vpack.c.bf16 %v237_v10, %v237_v10 }
  0x91   : > { %v307_v14 = vpack.c.bf16 %v288_v12, %v288_v12 }
  0x92   : > { %265 = vst.msk [vmem:[%s497_s28] sm:$0xf] %vm264_vm2, %v256_v13 }
  0x93   : > { %417 = vst.msk [vmem:[%s497_s28 + $0x4] sm:$0xf] %vm264_vm2, %v307_v14  ;;  %v246_v15 = vpop.f32.mrf.mxu2 }
  0x94   : > { %v247_v16 = vadd.f32 %v491_v8, %v246_v15  ;;  %v297_v17 = vpop.f32.mrf.mxu3 }
  0x95   : > { %v298_v18 = vadd.f32 %v491_v8, %v297_v17  ;;  %v238_v19 = vpop.f32.mrf.mxu0 }
  0x96   : > { %v260_v20 = vpack.c.bf16 %v247_v16, %v247_v16  ;;  %v239_v21 = vadd.f32 %v491_v8, %v238_v19  ;;  %v289_v22 = vpop.f32.mrf.mxu1 }
  0x97   : > { %v311_v23 = vpack.c.bf16 %v298_v18, %v298_v18  ;;  %v290_v24 = vadd.f32 %v491_v8, %v289_v22 }
  0x98   : > { %269 = vst.msk [vmem:[%s497_s28 + $0x20] sm:$0xf] %vm264_vm2, %v260_v20  ;;  %v257_v25 = vpack.c.bf16 %v239_v21, %v239_v21 }
  0x99   : > { %421 = vst.msk [vmem:[%s497_s28 + $0x24] sm:$0xf] %vm264_vm2, %v311_v23  ;;  %v308_v26 = vpack.c.bf16 %v290_v24, %v290_v24 }
  0x9a   : > { %266 = vst.msk [vmem:[%s497_s28 + $0x8] sm:$0xf] %vm264_vm2, %v257_v25 }
  0x9b   : > { %418 = vst.msk [vmem:[%s497_s28 + $0xc] sm:$0xf] %vm264_vm2, %v308_v26  ;;  %v248_v27 = vpop.f32.mrf.mxu2 }
  0x9c   : > { %v249_v28 = vadd.f32 %v491_v8, %v248_v27  ;;  %v299_v29 = vpop.f32.mrf.mxu3 }
  0x9d   : > { %v300_v30 = vadd.f32 %v491_v8, %v299_v29  ;;  %v241_v31 = vpop.f32.mrf.mxu0 }
  0x9e   : > { %v261_v32 = vpack.c.bf16 %v249_v28, %v249_v28  ;;  %v242_v33 = vadd.f32 %v491_v8, %v241_v31  ;;  %v292_v34 = vpop.f32.mrf.mxu1 }
  0x9f   : > { %v312_v35 = vpack.c.bf16 %v300_v30, %v300_v30  ;;  %v293_v36 = vadd.f32 %v491_v8, %v292_v34 }
  0xa0   : > { %270 = vst.msk [vmem:[%s497_s28 + $0x28] sm:$0xf] %vm264_vm2, %v261_v32  ;;  %v258_v37 = vpack.c.bf16 %v242_v33, %v242_v33 }
  0xa1   : > { %422 = vst.msk [vmem:[%s497_s28 + $0x2c] sm:$0xf] %vm264_vm2, %v312_v35  ;;  %v309_v38 = vpack.c.bf16 %v293_v36, %v293_v36 }
  0xa2   : > { %267 = vst.msk [vmem:[%s497_s28 + $0x10] sm:$0xf] %vm264_vm2, %v258_v37 }
  0xa3   : > { %419 = vst.msk [vmem:[%s497_s28 + $0x14] sm:$0xf] %vm264_vm2, %v309_v38  ;;  %v251_v39 = vpop.f32.mrf.mxu2 }
  0xa4   : > { %v252_v40 = vadd.f32 %v491_v8, %v251_v39  ;;  %v302_v41 = vpop.f32.mrf.mxu3 }
  0xa5   : > { %v303_v42 = vadd.f32 %v491_v8, %v302_v41  ;;  %v243_v43 = vpop.f32.mrf.mxu0 }
  0xa6   : > { %v262_v44 = vpack.c.bf16 %v252_v40, %v252_v40  ;;  %v244_v45 = vadd.f32 %v491_v8, %v243_v43  ;;  %v294_v46 = vpop.f32.mrf.mxu1 }
  0xa7   : > { %v313_v47 = vpack.c.bf16 %v303_v42, %v303_v42  ;;  %v295_v48 = vadd.f32 %v491_v8, %v294_v46 }
  0xa8   : > { %271 = vst.msk [vmem:[%s497_s28 + $0x30] sm:$0xf] %vm264_vm2, %v262_v44  ;;  %v259_v49 = vpack.c.bf16 %v244_v45, %v244_v45 }
  0xa9   : > { %423 = vst.msk [vmem:[%s497_s28 + $0x34] sm:$0xf] %vm264_vm2, %v313_v47  ;;  %v310_v50 = vpack.c.bf16 %v295_v48, %v295_v48 }
  0xaa   : > { %268 = vst.msk [vmem:[%s497_s28 + $0x18] sm:$0xf] %vm264_vm2, %v259_v49 }
  0xab   : > { %420 = vst.msk [vmem:[%s497_s28 + $0x1c] sm:$0xf] %vm264_vm2, %v310_v50  ;;  %v253_v51 = vpop.f32.mrf.mxu2 }
  0xac   : > { %v254_v52 = vadd.f32 %v491_v8, %v253_v51  ;;  %v304_v53 = vpop.f32.mrf.mxu3 }
  0xad   : > { %v305_v54 = vadd.f32 %v491_v8, %v304_v53 }
  0xae   : > { %v263_v55 = vpack.c.bf16 %v254_v52, %v254_v52 }
  0xaf   : > { %v314_v56 = vpack.c.bf16 %v305_v54, %v305_v54 }
  0xb0   : > { %272 = vst.msk [vmem:[%s497_s28 + $0x38] sm:$0xf] %vm264_vm2, %v263_v55 }
  0xb1   : > { %424 = vst.msk [vmem:[%s497_s28 + $0x3c] sm:$0xf] %vm264_vm2, %v314_v56 }
  0xb2 PF: > { %s13_s12 = sadd.s32 1, %s449_s12  }
  0xb3   : > { %p10_p4 = scmp.ge.s32.totalorder %s13_s12, 4  }
  0xb5   :  { %12 = sbr.rel (!%p10_p4) target bundleno = 1 (0x1), region = 64 }

// kernel: up_forward.5
= control target key start
LH: loop header
LB: loop body
LE: loop exit
PB: predicated region body
PF: predicated region fallthrough
CT: control target
= control target key end

     0   :  { %s1231_s15 = smov 0   ;;  %s1233_s16 = smov 0   ;;  %s1706_s0 = inlined_call_operand.vmem [shape: bf16[2,2,10,18,4], index: 0, kind: input, shape index: {}]   ;;  %s1707_s1 = inlined_call_operand.vmem [shape: bf16[36,4], index: 1, kind: input, shape index: {}]   ;;  %s1708_s2 = inlined_call_operand.vmem [shape: f32[1,4], index: 2, kind: input, shape index: {}]   ;;  %s1709_s3 = inlined_call_operand.vmem [shape: f32[1,4], index: 3, kind: input, shape index: {}]   ;;  %s1710_s4 = inlined_call_operand.vmem [shape: f32[2,2,8,16,4], index: 4, kind: output, shape index: {}]  }
   0x1   :  { %s1235_s17 = smov 0   ;;  %s1237_s18 = smov 0  }
   0x2   :  { %s1239_s19 = smov 0  }
   0x3 LB: > { %s23_s20 = sadd.s32 1, %s1188_s17  ;;  %s26_s21 = sadd.s32 1, %s1192_s18  ;;  %s1196_s19 = sphi %s1239_s19, %s14_s19   ;;  %s1192_s18 = sphi %s1237_s18, %s1714_s18   ;;  %s1188_s17 = sphi %s1235_s17, %s1713_s17   ;;  %s1184_s16 = sphi %s1233_s16, %s1712_s16   ;;  %s1180_s15 = sphi %s1231_s15, %s1711_s15  }
   0x4   : > { %p24_p0 = scmp.ge.s32.totalorder %s23_s20, 2  ;;  %p1022_p1 = scmp.ge.s32.totalorder %s1196_s19, 1 }
   0x5   : > { %p182_p2 = scmp.lt.s32.totalorder %s1196_s19, 5 }
   0x6   : > { %s1716_s20 = smov (%p24_p0, %s23_s20), 0  ;;  %s1718_s21 = smov (!%p24_p0, %s26_s21), %s1192_s18 }
   0x7   : > { %p183_p3 = pnand %p1022_p1, %p182_p2  ;;  %p28_p4 = scmp.ge.s32.totalorder %s1718_s21, 2 }
   0x8   : > { %p216_p5 = scmp.lt.s32.totalorder (!%p183_p3), %s1184_s16, 1  ;;  %p218_p6 = scmp.lt.s32.totalorder (!%p183_p3), %s1180_s15, 1 }
   0x9   : > { %s1720_s21 = smov (%p28_p4, %s1718_s21), 0  ;;  %186 = sbr.rel (%p183_p3) target bundleno = 456 (0x1c8), region = 36 }
   0xa   : > { %s1198_s29 = smov (!%p183_p3), 12   ;;  %s1199_s30 = smov (!%p183_p3), 8  }
   0xb   : > { %s1200_s5 = smov (!%p183_p3), 4   ;;  %s1201_s6 = smov (!%p183_p3), 20  }
   0xc   : > { %s1202_s7 = smov (!%p183_p3), 16   ;;  %s1203_s8 = smov (!%p183_p3), 24  }
   0xd   : > { %s1204_s9 = smov (!%p183_p3), 28   ;;  %s1205_s10 = smov (!%p183_p3), 32  }
   0xe   : > { %s1722_s16 = smov (!%p216_p5, %s1184_s16), 1  ;;  %s1724_s15 = smov (!%p218_p6, %s1180_s15), 1  ;;  %vm442_vm0 = vcmask 1046528   ;;  %vm329_vm1 = vsmask.f32 7424  ;;  %vm798_vm2 = vcmask 1041408  }
   0xf   : > { %s1107_s22 = smul.u32 60, %s1722_s16  ;;  %vm625_vm3 = vcmask 31744   ;;  %vm642_vm4 = vcmask 64512   ;;  %vm659_vm5 = vcmask 97280   ;;  %vm676_vm6 = vcmask 130048  }
  0x10   : > { %s1106_s23 = smul.u32 30, %s1724_s15  ;;  %vm693_vm7 = vcmask 162816   ;;  %vm710_vm8 = vcmask 195584   ;;  %vm744_vm9 = vcmask 261120   ;;  %vm727_vm10 = vcmask 228352  }
  0x11   : > { %vm781_vm11 = vcmask 293888  }
  0x12   : > { %s222_s24 = sadd.s32 %s1107_s22, %s1106_s23 }
  0x13   : > { %s1023_s25 = sshll.u32 %s222_s24, 2  ;;  %s1024_s24 = sshll.u32 %s1724_s15, 4 }
  0x14   : > { %s1270_s28 = scalar_lea.vmem %s1706_s0, %s1023_s25  ;;  %s1025_s25 = sshll.u32 %s1722_s16, 5 }
  0x15   : > { %v1273_v0 = vld [vmem:[%s1270_s28 + $0x30] sm:$0xff]  ;;  %v249_v1 = vld [vmem:[%s1270_s28 + $0x38] sm:$0x1]  ;;  %v1277_v2 = vld [vmem:[%s1270_s28 + $0x48] sm:$0xff] }
  0x16   : > { %v317_v3 = vunpack.c.l.b16 %v249_v1  ;;  %v255_v4 = vld [vmem:[%s1270_s28 + $0x50] sm:$0x1]  ;;  %v379_v5 = vshrl.u32 %v1273_v0, 16  ;;  %v381_v6 = vshll.u32 %v1273_v0, 16  ;;  %v258_v8 = vld [vmem:[%s1270_s28 + $0x5c] sm:$0x1] }
  0x17   : > { %v319_v7 = vunpack.c.l.b16 %v255_v4  ;;  %v1284_v9 = vld [vmem:[%s1270_s28 + $0x3c] sm:$0xff]  ;;  %v455_v11 = vrot.slane %v1273_v0, 1  ;;  %v405_v12 = vshll.u32 %v1277_v2, 16  ;;  %v1289_v15 = vld [vmem:[%s1270_s28 + $0x54] sm:$0xff]  ;;  %v320_v18 = vunpack.c.l.b16 %v258_v8  ;;  %v252_v19 = vld [vmem:[%s1270_s28 + $0x44] sm:$0x1] }
  0x18   : > { %v325_v10 = vpack.c.b16 %v317_v3, %v317_v3  ;;  %v383_v13 = vrot.slane %v381_v6, 1  ;;  %496 = vrot.lane.b32.xlu2 %v1284_v9, %s1198_s29  ;;  %v403_v21 = vshrl.u32 %v1277_v2, 16  ;;  %v417_v26 = vshll.u32 %v1289_v15, 16  ;;  %v243_v49 = vld [vmem:[%s1270_s28 + $0x20] sm:$0x1]  ;;  %v1334_v54 = vld [vmem:[%s1270_s28 + $0x18] sm:$0xff] }
  0x19   : > { %v327_v14 = vpack.c.b16 %v319_v7, %v319_v7  ;;  %v407_v24 = vrot.slane %v405_v12, 1  ;;  %v318_v27 = vunpack.c.l.b16 %v252_v19  ;;  %v461_v29 = vrot.slane %v1277_v2, 1  ;;  %v237_v52 = vld [vmem:[%s1270_s28 + $0x8] sm:$0x1]  ;;  %v1340_v57 = vld [vmem:[%s1270_s28] sm:$0xff] }
  0x1a   : > { %v456_v16 = vrot.slane %v325_v10, 1  ;;  %v386_v17 = vshll.u32 %v325_v10, 16  ;;  %v384_v20 = vor.u32 %v383_v13, %v379_v5  ;;  %v328_v31 = vpack.c.b16 %v320_v18, %v320_v18  ;;  %v1349_v63 = vld [vmem:[%s1270_s28 + $0x60] sm:$0xff]  ;;  %v261_v4 = vld [vmem:[%s1270_s28 + $0x68] sm:$0x1] }
  0x1b   : > { %v410_v25 = vshll.u32 %v327_v14, 16  ;;  %v462_v30 = vrot.slane %v327_v14, 1  ;;  %v408_v32 = vor.u32 %v407_v24, %v403_v21  ;;  %v326_v34 = vpack.c.b16 %v318_v27, %v318_v27 }
  0x1c   : > { %v1296_v22 = vsel %vm442_vm0, %v455_v11, %v456_v16  ;;  %v388_v23 = vrot.slane %v386_v17, 1  ;;  %v393_v35 = vshll.u32 %v1284_v9, 16  ;;  %v415_v36 = vshrl.u32 %v1289_v15, 16 }
  0x1d   : > { %475 = vrot.lane.b32.xlu1 %v1296_v22, %s1199_s30  ;;  %v412_v33 = vrot.slane %v410_v25, 1  ;;  %v419_v37 = vrot.slane %v417_v26, 1  ;;  %v1312_v38 = vsel %vm442_vm0, %v461_v29, %v462_v30  ;;  %v422_v39 = vshll.u32 %v328_v31, 16  ;;  %v246_v30 = vld [vmem:[%s1270_s28 + $0x2c] sm:$0x1] }
  0x1e   : > { %v1302_v28 = vsel %vm329_vm1, %v384_v20, %v388_v23  ;;  %v458_v40 = vrot.slane %v1284_v9, 1  ;;  %v459_v41 = vrot.slane %v326_v34, 1  ;;  %v391_v43 = vshrl.u32 %v1284_v9, 16 }
  0x1f   : > { %434 = vrot.lane.b32.xlu0 %v1302_v28, %s1200_s5  ;;  %v1316_v42 = vsel %vm329_vm1, %v408_v32, %v412_v33  ;;  %v395_v44 = vrot.slane %v393_v35, 1  ;;  %v398_v45 = vshll.u32 %v326_v34, 16  ;;  %v420_v46 = vor.u32 %v419_v37, %v415_v36  ;;  %v240_v33 = vld [vmem:[%s1270_s28 + $0x14] sm:$0x1]  ;;  %v1383_v37 = vld [vmem:[%s1270_s28 + $0x24] sm:$0xff] }
  0x20   : > { %500 = vrot.lane.b32.xlu2 %v1289_v15, %s1198_s29  ;;  %v424_v47 = vrot.slane %v422_v39, 1  ;;  %v1322_v48 = vsel %vm442_vm0, %v458_v40, %v459_v41  ;;  %v315_v55 = vunpack.c.l.b16 %v243_v49  ;;  %v313_v58 = vunpack.c.l.b16 %v237_v52 }
  0x21   : > { %v396_v50 = vor.u32 %v395_v44, %v391_v43  ;;  %v400_v51 = vrot.slane %v398_v45, 1  ;;  %v357_v60 = vshll.u32 %v1334_v54, 16  ;;  %v464_v61 = vrot.slane %v1289_v15, 1  ;;  %v1389_v43 = vld [vmem:[%s1270_s28 + $0xc] sm:$0xff] }
  0x22   : > { %v1331_v53 = vsel %vm329_vm1, %v420_v46, %v424_v47  ;;  %v323_v59 = vpack.c.b16 %v315_v55, %v315_v55  ;;  %v465_v62 = vrot.slane %v328_v31, 1  ;;  %v321_v1 = vpack.c.b16 %v313_v58, %v313_v58 }
  0x23   : > { %v1337_v56 = vsel %vm329_vm1, %v396_v50, %v400_v51  ;;  %v333_v3 = vshll.u32 %v1340_v57, 16  ;;  %v355_v5 = vshrl.u32 %v1334_v54, 16  ;;  %v359_v6 = vrot.slane %v357_v60, 1 }
  0x24   : > { %v362_v7 = vshll.u32 %v323_v59, 16  ;;  %v1357_v8 = vsel %vm442_vm0, %v464_v61, %v465_v62  ;;  %v331_v10 = vshrl.u32 %v1340_v57, 16  ;;  %v338_v12 = vshll.u32 %v321_v1, 16 }
  0x25   : > { %479 = vrot.lane.b32.xlu1 %v1312_v38, %s1199_s30  ;;  %v335_v11 = vrot.slane %v333_v3, 1  ;;  %v505_v13 = vunpack.c.l.b16 %v261_v4  ;;  %v360_v14 = vor.u32 %v359_v6, %v355_v5  ;;  %v510_v20 = vshll.u32 %v1349_v63, 16 }
  0x26   : > { %v364_v16 = vrot.slane %v362_v7, 1  ;;  %v340_v18 = vrot.slane %v338_v12, 1  ;;  %v449_v23 = vrot.slane %v1334_v54, 1  ;;  %v450_v24 = vrot.slane %v323_v59, 1 }
  0x27   : > { %438 = vrot.lane.b32.xlu0 %v1316_v42, %s1200_s5  ;;  %v336_v17 = vor.u32 %v335_v11, %v331_v10  ;;  %v506_v19 = vpack.c.b16 %v505_v13, %v505_v13  ;;  %v508_v26 = vshrl.u32 %v1349_v63, 16  ;;  %v512_v27 = vrot.slane %v510_v20, 1 }
  0x28   : > { %546 = vrot.lane.b32.xlu2 %v1322_v48, %s1201_s6  ;;  %v1368_v21 = vsel %vm329_vm1, %v360_v14, %v364_v16  ;;  %v443_v31 = vrot.slane %v1340_v57, 1  ;;  %v444_v32 = vrot.slane %v321_v1, 1  ;;  %v1379_v34 = vsel %vm442_vm0, %v449_v23, %v450_v24  ;;  %v1094_v23 = vld [vmem:[%s1270_s28 + $0x6c] sm:$0xff] }
  0x29   : > { %v341_v25 = vsel %vm329_vm1, %v336_v17, %v340_v18  ;;  %v515_v29 = vshll.u32 %v506_v19, 16  ;;  %v513_v35 = vor.u32 %v512_v27, %v508_v26  ;;  %v316_v39 = vunpack.c.l.b16 %v246_v30 }
  0x2a   : > { %v314_v40 = vunpack.c.l.b16 %v240_v33  ;;  %v445_v41 = vsel %vm442_vm0, %v443_v31, %v444_v32  ;;  %v369_v44 = vshll.u32 %v1383_v37, 16  ;;  %v535_v47 = vrot.slane %v1349_v63, 1 }
  0x2b   : > { %v517_v36 = vrot.slane %v515_v29, 1  ;;  %v324_v46 = vpack.c.b16 %v316_v39, %v316_v39  ;;  %v536_v49 = vrot.slane %v506_v19, 1  ;;  %v345_v51 = vshll.u32 %v1389_v43, 16  ;;  %v264_v19 = vld [vmem:[%s1270_s28 + $0x74] sm:$0x1]  ;;  %s231_s28 = sadd.s32 %s1025_s25, %s1024_s24 }
  0x2c   : > { %v322_v50 = vpack.c.b16 %v314_v40, %v314_v40  ;;  %v367_v52 = vshrl.u32 %v1383_v37, 16  ;;  %v371_v55 = vrot.slane %v369_v44, 1  ;;  %v343_v60 = vshrl.u32 %v1389_v43, 16 }
  0x2d   : > { %531 = vrot.lane.b32.xlu1 %v1331_v53, %s1202_s7  ;;  %v518_v45 = vsel %vm329_vm1, %v513_v35, %v517_v36  ;;  %v374_v58 = vshll.u32 %v324_v46, 16  ;;  %v537_v59 = vsel %vm442_vm0, %v535_v47, %v536_v49  ;;  %v347_v61 = vrot.slane %v345_v51, 1  ;;  %v1095_v47 = vld [vmem:[%s1707_s1] sm:$0xff] }
  0x2e   : > { %v350_v62 = vshll.u32 %v322_v50, 16  ;;  %v372_v1 = vor.u32 %v371_v55, %v367_v52  ;;  %v452_v10 = vrot.slane %v1383_v37, 1  ;;  %v453_v11 = vrot.slane %v324_v46, 1 }
  0x2f   : > { %527 = vrot.lane.b32.xlu0 %v1337_v56, %s1202_s7  ;;  %v376_v3 = vrot.slane %v374_v58, 1  ;;  %v348_v4 = vor.u32 %v347_v61, %v343_v60  ;;  %v446_v12 = vrot.slane %v1389_v43, 1  ;;  %v447_v13 = vrot.slane %v322_v50, 1 }
  0x30   : > { %571 = vrot.lane.b32.xlu2 %v1349_v63, %s1203_s8  ;;  %v352_v5 = vrot.slane %v350_v62, 1  ;;  %v1419_v14 = vsel %vm442_vm0, %v452_v10, %v453_v11  ;;  %v576_v20 = vunpack.c.l.b16 %v264_v19 }
  0x31   : > { %v1404_v6 = vsel %vm329_vm1, %v372_v1, %v376_v3  ;;  %v1422_v16 = vsel %vm442_vm0, %v446_v12, %v447_v13 }
  0x32   : > { %v353_v7 = vsel %vm329_vm1, %v348_v4, %v352_v5  ;;  %v577_v24 = vpack.c.b16 %v576_v20, %v576_v20 }
  0x34   : > { %v586_v29 = vshll.u32 %v577_v24, 16  ;;  %v607_v50 = vrot.slane %v577_v24, 1 }
  0x35   : > { %567 = vrot.lane.b32.xlu1 %v1277_v2, %s1203_s8 }
  0x36   : > { %v588_v30 = vrot.slane %v586_v29, 1 }
  0x37   : > { %550 = vrot.lane.b32.xlu0 %v1357_v8, %s1201_s6 }
  0x38   : > { %598 = vrot.lane.b32.xlu2 %v1316_v42, %s1204_s9 }
  0x3d   : > { %430 = vrot.lane.b32.xlu1 %v1368_v21, %s1200_s5 }
  0x3f   : > { %426 = vrot.lane.b32.xlu0 %v341_v25, %s1200_s5  ;;  %v581_v25 = vshll.u32 %v1094_v23, 16 }
  0x40   : > { %471 = vrot.lane.b32.xlu2 %v1379_v34, %s1199_s30 }
  0x41   : > { %v583_v27 = vrot.slane %v581_v25, 1 }
  0x45   : > { %467 = vrot.lane.b32.xlu1 %v445_v41, %s1199_s30 }
  0x47   : > { %602 = vrot.lane.b32.xlu0 %v518_v45, %s1204_s9 }
  0x48   : > { %488 = vrot.lane.b32.xlu2 %v1389_v43, %s1198_s29 }
  0x4d   : > { %621 = vrot.lane.b32.xlu1 %v537_v59, %s1205_s10 }
  0x4f   : > { %617 = vrot.lane.b32.xlu0 %v1312_v38, %s1205_s10 }
  0x50   : > { %523 = vrot.lane.b32.xlu2 %v1404_v6, %s1202_s7 }
  0x55   : > { %519 = vrot.lane.b32.xlu1 %v353_v7, %s1202_s7 }
  0x57   : > { %492 = vrot.lane.b32.xlu0 %v1383_v37, %s1198_s29 }
  0x58   : > { %559 = vrot.lane.b32.xlu2 %v1334_v54, %s1203_s8 }
  0x5d   : > { %542 = vrot.lane.b32.xlu1 %v1419_v14, %s1201_s6 }
  0x5f   : > { %538 = vrot.lane.b32.xlu0 %v1422_v16, %s1201_s6 }
  0x60   : > { %594 = vrot.lane.b32.xlu2 %v1302_v28, %s1204_s9 }
  0x65   : > { %590 = vrot.lane.b32.xlu1 %v1368_v21, %s1204_s9 }
  0x67   : > { %563 = vrot.lane.b32.xlu0 %v1273_v0, %s1203_s8 }
  0x68   : > { %436 = vrot.lane.b32.xlu2 %v1337_v56, %s1200_s5 }
  0x6d   : > { %613 = vrot.lane.b32.xlu1 %v1296_v22, %s1205_s10 }
  0x6f   : > { %609 = vrot.lane.b32.xlu0 %v1379_v34, %s1205_s10 }
  0x70   : > { %481 = vrot.lane.b32.xlu2 %v1357_v8, %s1199_s30 }
  0x72   : > { %v1442_v17 = vpop.permute.xlu2 %496 }
  0x75   : > { %477 = vrot.lane.b32.xlu1 %v1322_v48, %s1199_s30 }
  0x77   : > { %440 = vrot.lane.b32.xlu0 %v1331_v53, %s1200_s5 }
  0x78   : > { %529 = vrot.lane.b32.xlu2 %v1316_v42, %s1202_s7  ;;  %v579_v42 = vshrl.u32 %v1094_v23, 16 }
  0x7a   : > { %v1450_v18 = vpop.permute.xlu2 %500 }
  0x7d   : > { %502 = vrot.lane.b32.xlu1 %v1349_v63, %s1198_s29  ;;  %v584_v63 = vor.u32 %v583_v27, %v579_v42 }
  0x7f   : > { %498 = vrot.lane.b32.xlu0 %v1277_v2, %s1198_s29  ;;  %v589_v32 = vsel %vm329_vm1, %v584_v63, %v588_v30 }
  0x80   : > { %552 = vrot.lane.b32.xlu2 %v537_v59, %s1201_s6 }
  0x82   : > { %v1459_v26 = vpop.permute.xlu2 %546 }
  0x85   : > { %548 = vrot.lane.b32.xlu1 %v1312_v38, %s1201_s6  ;;  %v765_v38 = vld [vmem:[%s1707_s1 + $0x10] sm:$0x3] }
  0x86   : > { %v775_v36 = vunpack.c.l.b16 %v765_v38 }
  0x87   : > { %533 = vrot.lane.b32.xlu0 %v518_v45, %s1202_s7  ;;  %v1096_v45 = vld [vmem:[%s1707_s1 + $0x8] sm:$0xff] }
  0x88   : > { %428 = vrot.lane.b32.xlu2 %v353_v7, %s1200_s5  ;;  %v778_v40 = vpack.c.b16 %v775_v36, %v775_v36 }
  0x8a   : > { %v1465_v31 = vpop.permute.xlu2 %571  ;;  %v800_v41 = vsel %vm798_vm2, %v778_v40, 0 }
  0x8b   : > { %1099 = vmatpush.bf16.msra.mxu3 %v800_v41  ;;  %1098 = vmatpush.bf16.msra.mxu2 %v800_v41 }
  0x8c   : > { %1097 = vmatpush.bf16.msra.mxu1 %v800_v41  ;;  %807 = vmatpush.bf16.msra.mxu0 %v800_v41 }
  0x8d   : > { %573 = vrot.lane.b32.xlu1 %v1094_v23, %s1203_s8 }
  0x8f   : > { %v476_v33 = vpop.permute.xlu1 %475  ;;  %569 = vrot.lane.b32.xlu0 %v1289_v15, %s1203_s8  ;;  %1102 = vmatpush.bf16.msra.mxu3 %v1096_v45 }
  0x90   : > { %604 = vrot.lane.b32.xlu2 %v589_v32, %s1204_s9  ;;  %1101 = vmatpush.bf16.msra.mxu2 %v1096_v45 }
  0x91   : > { %v435_v35 = vpop.permute.xlu0 %434  ;;  %1100 = vmatpush.bf16.msra.mxu1 %v1096_v45  ;;  %808 = vmatpush.bf16.msra.mxu0 %v1096_v45 }
  0x92   : > { %v1475_v39 = vpop.permute.xlu2 %598  ;;  %v635_v1 = vsel %vm625_vm3, %v1273_v0, %v435_v35 }
  0x93   : > { %1105 = vmatpush.bf16.msra.mxu3 %v1095_v47 }
  0x94   : > { %1104 = vmatpush.bf16.msra.mxu2 %v1095_v47 }
  0x95   : > { %600 = vrot.lane.b32.xlu1 %v1331_v53, %s1204_s9  ;;  %1103 = vmatpush.bf16.msra.mxu1 %v1095_v47 }
  0x96   : > { %809 = vmatpush.bf16.msra.mxu0 %v1095_v47 }
  0x97   : > { %v480_v44 = vpop.permute.xlu1 %479  ;;  %432 = vrot.lane.b32.xlu0 %v1404_v6, %s1200_s5  ;;  %s1026_s5 = sshll.u32 %s231_s28, 3 }
  0x98   : > { %619 = vrot.lane.b32.xlu2 %v1357_v8, %s1205_s10  ;;  %v606_v8 = vrot.slane %v1094_v23, 1 }
  0x99   : > { %v439_v46 = vpop.permute.xlu0 %438 }
  0x9a   : > { %v1486_v53 = vpop.permute.xlu2 %471  ;;  %v608_v55 = vsel %vm442_vm0, %v606_v8, %v607_v50 }
  0x9d   : > { %473 = vrot.lane.b32.xlu1 %v1419_v14, %s1199_s30 }
  0x9f   : > { %v532_v49 = vpop.permute.xlu1 %531  ;;  %469 = vrot.lane.b32.xlu0 %v1422_v16, %s1199_s30 }
  0xa0   : > { %494 = vrot.lane.b32.xlu2 %v1273_v0, %s1198_s29 }
  0xa1   : > { %v528_v51 = vpop.permute.xlu0 %527 }
  0xa2   : > { %v1497_v52 = vpop.permute.xlu2 %488 }
  0xa5   : > { %490 = vrot.lane.b32.xlu1 %v1334_v54, %s1198_s29 }
  0xa7   : > { %v568_v58 = vpop.permute.xlu1 %567  ;;  %623 = vrot.lane.b32.xlu0 %v608_v55, %s1205_s10 }
  0xa8   : > { %540 = vrot.lane.b32.xlu2 %v1379_v34, %s1201_s6  ;;  %v639_v34 = vsel %vm625_vm3, %v1277_v2, %v439_v46 }
  0xa9   : > { %v551_v59 = vpop.permute.xlu0 %550  ;;  %v656_v3 = vsel %vm642_vm4, %v639_v34, %v480_v44 }
  0xaa   : > { %v524_v60 = vpop.permute.xlu2 %523  ;;  %v673_v0 = vsel %vm659_vm5, %v656_v3, %v1450_v18 }
  0xab   : > { %v690_v7 = vsel %vm676_vm6, %v673_v0, %v532_v49 }
  0xac   : > { %v707_v11 = vsel %vm693_vm7, %v690_v7, %v551_v59 }
  0xad   : > { %525 = vrot.lane.b32.xlu1 %v1302_v28, %s1202_s7  ;;  %v652_v28 = vsel %vm642_vm4, %v635_v1, %v476_v33  ;;  %v724_v13 = vsel %vm710_vm8, %v707_v11, %v1465_v31 }
  0xae   : > { %v669_v2 = vsel %vm659_vm5, %v652_v28, %v1442_v17 }
  0xaf   : > { %v431_v61 = vpop.permute.xlu1 %430  ;;  %521 = vrot.lane.b32.xlu0 %v1368_v21, %s1202_s7  ;;  %v686_v10 = vsel %vm676_vm6, %v669_v2, %v528_v51 }
  0xb0   : > { %565 = vrot.lane.b32.xlu2 %v1284_v9, %s1203_s8  ;;  %v631_v42 = vsel %vm625_vm3, %v1334_v54, %v431_v61 }
  0xb1   : > { %v427_v62 = vpop.permute.xlu0 %426  ;;  %v648_v29 = vsel %vm642_vm4, %v631_v42, %v1486_v53 }
  0xb2   : > { %v560_v21 = vpop.permute.xlu2 %559  ;;  %v627_v63 = vsel %vm625_vm3, %v1340_v57, %v427_v62 }
  0xb5   : > { %561 = vrot.lane.b32.xlu1 %v1383_v37, %s1203_s8 }
  0xb7   : > { %v468_v4 = vpop.permute.xlu1 %467  ;;  %544 = vrot.lane.b32.xlu0 %v1296_v22, %s1201_s6  ;;  %v703_v22 = vsel %vm693_vm7, %v686_v10, %v1459_v26  ;;  %s1628_s6 = scalar_lea.vmem %s1710_s4, %s1026_s5 }
  0xb8   : > { %611 = vrot.lane.b32.xlu2 %v1419_v14, %s1205_s10  ;;  %v720_v12 = vsel %vm710_vm8, %v703_v22, %v568_v58  ;;  %v644_v32 = vsel %vm642_vm4, %v627_v63, %v468_v4 }
  0xb9   : > { %v603_v5 = vpop.permute.xlu0 %602  ;;  %v661_v38 = vsel %vm659_vm5, %v644_v32, %v1497_v52 }
  0xba   : > { %v741_v14 = vsel %vm727_vm10, %v724_v13, %v603_v5  ;;  %v595_v18 = vpop.permute.xlu2 %594 }
  0xbd   : > { %596 = vrot.lane.b32.xlu1 %v1337_v56, %s1204_s9  ;;  %v737_v56 = vsel %vm727_vm10, %v720_v12, %v1475_v39 }
  0xbf   : > { %v622_v16 = vpop.permute.xlu1 %621  ;;  %592 = vrot.lane.b32.xlu0 %v1404_v6, %s1204_s9 }
  0xc0   : > { %v758_v17 = vsel %vm744_vm9, %v741_v14, %v622_v16 }
  0xc1   : > { %1081 = vmatmul.msk.bf16.vlgmr.msra.gmra.mxu3 %vm781_vm11, %v758_v17  ;;  %v618_v19 = vpop.permute.xlu0 %617 }
  0xc2   : > { %v754_v20 = vsel %vm744_vm9, %v737_v56, %v618_v19  ;;  %v437_v25 = vpop.permute.xlu2 %436 }
  0xc3   : > { %1079 = vmatmul.msk.bf16.vlgmr.msra.gmra.mxu2 %vm781_vm11, %v754_v20  ;;  %v637_v61 = vsel %vm625_vm3, %v1284_v9, %v437_v25 }
  0xc7   : > { %v520_v23 = vpop.permute.xlu1 %519  ;;  %615 = vrot.lane.b32.xlu0 %v1322_v48, %s1205_s10 }
  0xc8   : > { %v678_v35 = vsel %vm676_vm6, %v661_v38, %v520_v23 }
  0xc9   : > { %v493_v24 = vpop.permute.xlu0 %492 }
  0xca   : > { %v482_v27 = vpop.permute.xlu2 %481  ;;  %v665_v30 = vsel %vm659_vm5, %v648_v29, %v493_v24 }
  0xcb   : > { %v682_v33 = vsel %vm676_vm6, %v665_v30, %v524_v60 }
  0xcf   : > { %v543_v6 = vpop.permute.xlu1 %542 }
  0xd0   : > { %v699_v54 = vsel %vm693_vm7, %v682_v33, %v543_v6 }
  0xd1   : > { %v539_v26 = vpop.permute.xlu0 %538 }
  0xd2   : > { %v695_v39 = vsel %vm693_vm7, %v678_v35, %v539_v26  ;;  %v530_v57 = vpop.permute.xlu2 %529 }
  0xd3   : > { %v712_v44 = vsel %vm710_vm8, %v695_v39, %v560_v21 }
  0xd7   : > { %v591_v31 = vpop.permute.xlu1 %590 }
  0xd8   : > { %v729_v46 = vsel %vm727_vm10, %v712_v44, %v591_v31 }
  0xd9   : > { %v564_v48 = vpop.permute.xlu0 %563 }
  0xda   : > { %v716_v36 = vsel %vm710_vm8, %v699_v54, %v564_v48  ;;  %v553_v8 = vpop.permute.xlu2 %552 }
  0xdb   : > { %v733_v41 = vsel %vm727_vm10, %v716_v36, %v595_v18 }
  0xdf   : > { %v614_v40 = vpop.permute.xlu1 %613 }
  0xe0   : > { %v750_v45 = vsel %vm744_vm9, %v733_v41, %v614_v40 }
  0xe1   : > { %1077 = vmatmul.msk.bf16.vlgmr.msra.gmra.mxu1 %vm781_vm11, %v750_v45  ;;  %v610_v53 = vpop.permute.xlu0 %609 }
  0xe2   : > { %v746_v47 = vsel %vm744_vm9, %v729_v46, %v610_v53  ;;  %v429_v55 = vpop.permute.xlu2 %428  ;;  %v1615_v46 = vld [vmem:[%s1708_s2] ss:$0 sm:$0xff] }
  0xe3   : > { %1075 = vmatmul.msk.bf16.vlgmr.msra.gmra.mxu0 %vm781_vm11, %v746_v47  ;;  %v629_v42 = vsel %vm625_vm3, %v1389_v43, %v429_v55  ;;  %v1620_v53 = vld [vmem:[%s1709_s3] ss:$0 sm:$0xff] }
  0xe7   : > { %v478_v49 = vpop.permute.xlu1 %477 }
  0xe8   : > { %v654_v1 = vsel %vm642_vm4, %v637_v61, %v478_v49 }
  0xe9   : > { %v441_v50 = vpop.permute.xlu0 %440 }
  0xea   : > { %v605_v60 = vpop.permute.xlu2 %604  ;;  %v641_v9 = vsel %vm625_vm3, %v1289_v15, %v441_v50 }
  0xeb   : > { %v658_v22 = vsel %vm642_vm4, %v641_v9, %v482_v27 }
  0xef   : > { %v503_v51 = vpop.permute.xlu1 %502 }
  0xf0   : > { %v675_v12 = vsel %vm659_vm5, %v658_v22, %v503_v51 }
  0xf1   : > { %v499_v52 = vpop.permute.xlu0 %498 }
  0xf2   : > { %v671_v28 = vsel %vm659_vm5, %v654_v1, %v499_v52  ;;  %v620_v4 = vpop.permute.xlu2 %619 }
  0xf3   : > { %v688_v3 = vsel %vm676_vm6, %v671_v28, %v530_v57 }
  0xf7   : > { %v549_v58 = vpop.permute.xlu1 %548 }
  0xf8   : > { %v705_v21 = vsel %vm693_vm7, %v688_v3, %v549_v58 }
  0xf9   : > { %v534_v59 = vpop.permute.xlu0 %533 }
  0xfa   : > { %v692_v14 = vsel %vm676_vm6, %v675_v12, %v534_v59  ;;  %v495_v16 = vpop.permute.xlu2 %494 }
  0xfb   : > { %v709_v17 = vsel %vm693_vm7, %v692_v14, %v553_v8 }
  0xff   : > { %v574_v62 = vpop.permute.xlu1 %573 }
 0x100   : > { %v726_v18 = vsel %vm710_vm8, %v709_v17, %v574_v62 }
 0x101   : > { %v570_v34 = vpop.permute.xlu0 %569  ;;  %v743_v19 = vsel %vm727_vm10, %v726_v18, %v605_v60 }
 0x102   : > { %v722_v0 = vsel %vm710_vm8, %v705_v21, %v570_v34  ;;  %v541_v15 = vpop.permute.xlu2 %540 }
 0x107   : > { %v601_v2 = vpop.permute.xlu1 %600 }
 0x108   : > { %v739_v5 = vsel %vm727_vm10, %v722_v0, %v601_v2 }
 0x109   : > { %v433_v7 = vpop.permute.xlu0 %432  ;;  %v756_v10 = vsel %vm744_vm9, %v739_v5, %v620_v4 }
 0x10a   : > { %1080 = vmatmul.msk.bf16.gmra.mxu2 %vm781_vm11, %v756_v10  ;;  %v566_v6 = vpop.permute.xlu2 %565  ;;  %v633_v31 = vsel %vm625_vm3, %v1383_v37, %v433_v7 }
 0x10f   : > { %v474_v11 = vpop.permute.xlu1 %473 }
 0x110   : > { %v650_v32 = vsel %vm642_vm4, %v633_v31, %v474_v11 }
 0x111   : > { %v470_v13 = vpop.permute.xlu0 %469  ;;  %v667_v35 = vsel %vm659_vm5, %v650_v32, %v495_v16 }
 0x112   : > { %v646_v27 = vsel %vm642_vm4, %v629_v42, %v470_v13  ;;  %v612_v33 = vpop.permute.xlu2 %611 }
 0x117   : > { %v491_v56 = vpop.permute.xlu1 %490 }
 0x118   : > { %v663_v29 = vsel %vm659_vm5, %v646_v27, %v491_v56 }
 0x119   : > { %v624_v20 = vpop.permute.xlu0 %623 }
 0x11a   : > { %v760_v23 = vsel %vm744_vm9, %v743_v19, %v624_v20 }
 0x11b   : > { %1082 = vmatmul.msk.bf16.gmra.mxu3 %vm781_vm11, %v760_v23 }
 0x11f   : > { %v526_v25 = vpop.permute.xlu1 %525 }
 0x120   : > { %v684_v39 = vsel %vm676_vm6, %v667_v35, %v526_v25 }
 0x121   : > { %v522_v24 = vpop.permute.xlu0 %521 }
 0x122   : > { %v680_v30 = vsel %vm676_vm6, %v663_v29, %v522_v24 }
 0x123   : > { %v697_v48 = vsel %vm693_vm7, %v680_v30, %v541_v15 }
 0x127   : > { %v562_v63 = vpop.permute.xlu1 %561 }
 0x128   : > { %v714_v38 = vsel %vm710_vm8, %v697_v48, %v562_v63 }
 0x129   : > { %v545_v26 = vpop.permute.xlu0 %544 }
 0x12a   : > { %v701_v37 = vsel %vm693_vm7, %v684_v39, %v545_v26 }
 0x12b   : > { %v718_v40 = vsel %vm710_vm8, %v701_v37, %v566_v6 }
 0x12f   : > { %v597_v57 = vpop.permute.xlu1 %596 }
 0x130   : > { %v735_v41 = vsel %vm727_vm10, %v718_v40, %v597_v57 }
 0x131   : > { %v593_v43 = vpop.permute.xlu0 %592 }
 0x132   : > { %v731_v54 = vsel %vm727_vm10, %v714_v38, %v593_v43 }
 0x133   : > { %v748_v36 = vsel %vm744_vm9, %v731_v54, %v612_v33 }
 0x134   : > { %1076 = vmatmul.msk.bf16.gmra.mxu0 %vm781_vm11, %v748_v36 }
 0x139   : > { %v616_v44 = vpop.permute.xlu0 %615 }
 0x13a   : > { %v752_v45 = vsel %vm744_vm9, %v735_v41, %v616_v44 }
 0x13b   : > { %1078 = vmatmul.msk.bf16.gmra.mxu1 %vm781_vm11, %v752_v45 }
 0x144   : > { %v841_v47 = vpop.f32.mrf.mxu3 }
 0x145   : > { %v867_v49 = vmul.f32 %v1615_v46, %v841_v47 }
 0x146   : > { %v831_v8 = vpop.f32.mrf.mxu2 }
 0x147   : > { %v887_v50 = vadd.f32 %v1620_v53, %v867_v49  ;;  %v863_v51 = vmul.f32 %v1615_v46, %v831_v8 }
 0x149   : > { %v903_v52 = vmax.f32 %v887_v50, 0.0  ;;  %v883_v55 = vadd.f32 %v1620_v53, %v863_v51 }
 0x14b   : > { %919 = vst.msk [vmem:[%s1628_s6 + $0x60] sm:$0xff] %vm625_vm3, %v903_v52  ;;  %v899_v58 = vmax.f32 %v883_v55, 0.0 }
 0x14c   : > { %v843_v59 = vpop.f32.mrf.mxu3 }
 0x14d   : > { %915 = vst.msk [vmem:[%s1628_s6 + $0x40] sm:$0xff] %vm625_vm3, %v899_v58  ;;  %v868_v60 = vmul.f32 %v1615_v46, %v843_v59 }
 0x14e   : > { %v833_v61 = vpop.f32.mrf.mxu2 }
 0x14f   : > { %v888_v62 = vadd.f32 %v1620_v53, %v868_v60  ;;  %v864_v1 = vmul.f32 %v1615_v46, %v833_v61 }
 0x151   : > { %v904_v34 = vmax.f32 %v888_v62, 0.0  ;;  %v884_v28 = vadd.f32 %v1620_v53, %v864_v1 }
 0x153   : > { %920 = vst.msk [vmem:[%s1628_s6 + $0x68] sm:$0xff] %vm625_vm3, %v904_v34  ;;  %v900_v3 = vmax.f32 %v884_v28, 0.0 }
 0x155   : > { %916 = vst.msk [vmem:[%s1628_s6 + $0x48] sm:$0xff] %vm625_vm3, %v900_v3 }
 0x15e   : > { %v821_v21 = vpop.f32.mrf.mxu1 }
 0x15f   : > { %v859_v4 = vmul.f32 %v1615_v46, %v821_v21 }
 0x160   : > { %v811_v0 = vpop.f32.mrf.mxu0 }
 0x161   : > { %v879_v2 = vadd.f32 %v1620_v53, %v859_v4  ;;  %v855_v5 = vmul.f32 %v1615_v46, %v811_v0 }
 0x163   : > { %v895_v7 = vmax.f32 %v879_v2, 0.0  ;;  %v875_v10 = vadd.f32 %v1620_v53, %v855_v5 }
 0x165   : > { %911 = vst.msk [vmem:[%s1628_s6 + $0x20] sm:$0xff] %vm625_vm3, %v895_v7  ;;  %v891_v9 = vmax.f32 %v875_v10, 0.0 }
 0x166   : > { %v823_v11 = vpop.f32.mrf.mxu1 }
 0x167   : > { %907 = vst.msk [vmem:[%s1628_s6] sm:$0xff] %vm625_vm3, %v891_v9  ;;  %v860_v22 = vmul.f32 %v1615_v46, %v823_v11 }
 0x168   : > { %v813_v12 = vpop.f32.mrf.mxu0 }
 0x169   : > { %v880_v13 = vadd.f32 %v1620_v53, %v860_v22  ;;  %v856_v14 = vmul.f32 %v1615_v46, %v813_v12 }
 0x16b   : > { %v896_v16 = vmax.f32 %v880_v13, 0.0  ;;  %v876_v17 = vadd.f32 %v1620_v53, %v856_v14 }
 0x16d   : > { %912 = vst.msk [vmem:[%s1628_s6 + $0x28] sm:$0xff] %vm625_vm3, %v896_v16  ;;  %v892_v18 = vmax.f32 %v876_v17, 0.0 }
 0x16f   : > { %908 = vst.msk [vmem:[%s1628_s6 + $0x8] sm:$0xff] %vm625_vm3, %v892_v18 }
 0x18d   : > { %v836_v56 = vpop.f32.mrf.mxu2 }
 0x18e   : > { %v865_v19 = vmul.f32 %v1615_v46, %v836_v56 }
 0x190   : > { %v885_v20 = vadd.f32 %v1620_v53, %v865_v19 }
 0x192   : > { %v901_v23 = vmax.f32 %v885_v20, 0.0 }
 0x194   : > { %917 = vst.msk [vmem:[%s1628_s6 + $0x50] sm:$0xff] %vm625_vm3, %v901_v23 }
 0x195   : > { %v838_v15 = vpop.f32.mrf.mxu2 }
 0x196   : > { %v866_v24 = vmul.f32 %v1615_v46, %v838_v15 }
 0x198   : > { %v886_v25 = vadd.f32 %v1620_v53, %v866_v24 }
 0x19a   : > { %v902_v6 = vmax.f32 %v886_v25, 0.0 }
 0x19c   : > { %918 = vst.msk [vmem:[%s1628_s6 + $0x58] sm:$0xff] %vm625_vm3, %v902_v6 }
 0x19e   : > { %v846_v26 = vpop.f32.mrf.mxu3 }
 0x19f   : > { %v869_v42 = vmul.f32 %v1615_v46, %v846_v26 }
 0x1a1   : > { %v889_v27 = vadd.f32 %v1620_v53, %v869_v42 }
 0x1a3   : > { %v905_v29 = vmax.f32 %v889_v27, 0.0 }
 0x1a5   : > { %921 = vst.msk [vmem:[%s1628_s6 + $0x70] sm:$0xff] %vm625_vm3, %v905_v29 }
 0x1a6   : > { %v848_v63 = vpop.f32.mrf.mxu3 }
 0x1a7   : > { %v870_v30 = vmul.f32 %v1615_v46, %v848_v63 }
 0x1a9   : > { %v890_v31 = vadd.f32 %v1620_v53, %v870_v30 }
 0x1ab   : > { %v906_v32 = vmax.f32 %v890_v31, 0.0 }
 0x1ad   : > { %922 = vst.msk [vmem:[%s1628_s6 + $0x78] sm:$0xff] %vm625_vm3, %v906_v32 }
 0x1b1   : > { %v816_v48 = vpop.f32.mrf.mxu0 }
 0x1b2   : > { %v857_v33 = vmul.f32 %v1615_v46, %v816_v48 }
 0x1b4   : > { %v877_v38 = vadd.f32 %v1620_v53, %v857_v33 }
 0x1b6   : > { %v893_v43 = vmax.f32 %v877_v38, 0.0 }
 0x1b8   : > { %909 = vst.msk [vmem:[%s1628_s6 + $0x10] sm:$0xff] %vm625_vm3, %v893_v43  ;;  %v826_v54 = vpop.f32.mrf.mxu1 }
 0x1b9   : > { %v861_v35 = vmul.f32 %v1615_v46, %v826_v54  ;;  %v818_v36 = vpop.f32.mrf.mxu0 }
 0x1ba   : > { %v858_v39 = vmul.f32 %v1615_v46, %v818_v36 }
 0x1bb   : > { %v881_v37 = vadd.f32 %v1620_v53, %v861_v35 }
 0x1bc   : > { %v878_v57 = vadd.f32 %v1620_v53, %v858_v39 }
 0x1bd   : > { %v897_v40 = vmax.f32 %v881_v37, 0.0 }
 0x1be   : > { %v894_v41 = vmax.f32 %v878_v57, 0.0 }
 0x1bf   : > { %913 = vst.msk [vmem:[%s1628_s6 + $0x30] sm:$0xff] %vm625_vm3, %v897_v40 }
 0x1c0   : > { %910 = vst.msk [vmem:[%s1628_s6 + $0x18] sm:$0xff] %vm625_vm3, %v894_v41  ;;  %v828_v44 = vpop.f32.mrf.mxu1 }
 0x1c1   : > { %v862_v45 = vmul.f32 %v1615_v46, %v828_v44 }
 0x1c3   : > { %v882_v47 = vadd.f32 %v1620_v53, %v862_v45 }
 0x1c5   : > { %v898_v49 = vmax.f32 %v882_v47, 0.0 }
 0x1c7   : > { %914 = vst.msk [vmem:[%s1628_s6 + $0x38] sm:$0xff] %vm625_vm3, %v898_v49 }
 0x1c8 PF: > { %s14_s19 = sadd.s32 1, %s1196_s19   ;;  %s1711_s15 = smov %s1188_s17 }
 0x1c9   : > { %p11_p7 = scmp.ge.s32.totalorder %s14_s19, 6   ;;  %s1712_s16 = smov %s1192_s18 }
 0x1ca   : > { %s1713_s17 = smov %s1716_s20  ;;  %s1714_s18 = smov %s1720_s21 }
 0x1cb   :  { %13 = sbr.rel (!%p11_p7) target bundleno = 3 (0x3), region = 66 }

// kernel: up_forward.4
= control target key start
LH: loop header
LB: loop body
LE: loop exit
PB: predicated region body
PF: predicated region fallthrough
CT: control target
= control target key end

     0   :  { %s2455_s18 = smov 0   ;;  %s2457_s19 = smov 0   ;;  %s3455_s0 = inlined_call_operand.vmem [shape: bf16[2,2,10,18,4], index: 0, kind: input, shape index: {}]   ;;  %s3456_s1 = inlined_call_operand.vmem [shape: bf16[2,2,10,18,4], index: 1, kind: input, shape index: {}]   ;;  %s3457_s2 = inlined_call_operand.vmem [shape: bf16[72,4], index: 2, kind: input, shape index: {}]   ;;  %s3458_s3 = inlined_call_operand.vmem [shape: f32[1,4], index: 3, kind: input, shape index: {}]   ;;  %s3459_s4 = inlined_call_operand.vmem [shape: f32[1,4], index: 4, kind: input, shape index: {}]   ;;  %s3460_s5 = inlined_call_operand.vmem [shape: bf16[2,2,8,16,4], index: 5, kind: output, shape index: {}]  }
   0x1   :  { %s2459_s20 = smov 0   ;;  %s2461_s21 = smov 0  }
   0x2   :  { %s2463_s22 = smov 0  }
   0x3 LB: > { %s24_s23 = sadd.s32 1, %s2406_s20  ;;  %s27_s24 = sadd.s32 1, %s2410_s21  ;;  %s2414_s22 = sphi %s2463_s22, %s15_s22   ;;  %s2410_s21 = sphi %s2461_s21, %s3500_s21   ;;  %s2406_s20 = sphi %s2459_s20, %s3499_s20   ;;  %s2402_s19 = sphi %s2457_s19, %s3498_s19   ;;  %s2398_s18 = sphi %s2455_s18, %s3497_s18  }
   0x4   : > { %p25_p0 = scmp.ge.s32.totalorder %s24_s23, 2  ;;  %p2128_p1 = scmp.ge.s32.totalorder %s2414_s22, 1 }
   0x5   : > { %p223_p2 = scmp.lt.s32.totalorder %s2414_s22, 5 }
   0x6   : > { %s3502_s23 = smov (%p25_p0, %s24_s23), 0  ;;  %s3504_s24 = smov (!%p25_p0, %s27_s24), %s2410_s21 }
   0x7   : > { %p224_p3 = pnand %p2128_p1, %p223_p2  ;;  %p29_p4 = scmp.ge.s32.totalorder %s3504_s24, 2 }
   0x8   : > { %p268_p5 = scmp.lt.s32.totalorder (!%p224_p3), %s2402_s19, 1  ;;  %p270_p6 = scmp.lt.s32.totalorder (!%p224_p3), %s2398_s18, 1 }
   0x9   : > { %s3506_s24 = smov (%p29_p4, %s3504_s24), 0  ;;  %227 = sbr.rel (%p224_p3) target bundleno = 635 (0x27b), region = 40 }
   0xa   : > { %s2416_s9 = smov (!%p224_p3), 4   ;;  %s2214_s10 = sshll.u32 (!%p224_p3), %s2398_s18, 3 }
   0xb   : > { %s2227_s11 = sshll.u32 (!%p224_p3), %s2402_s19, 4  ;;  %s2417_s15 = smov (!%p224_p3), 24  }
   0xc   : > { %s2418_s16 = smov (!%p224_p3), 48   ;;  %s2419_s17 = smov (!%p224_p3), 16  }
   0xe   : > { %s2492_s25 = scalar_select %p268_p5, %s2402_s19, 1  ;;  %v2525_v16 = vstv %s2214_s10  ;;  %v637_v21 = vlaneseq  ;;  %v2535_v27 = vstv %s2227_s11  ;;  %vm556_vm0 = vcmask 31744  }
   0xf   : > { %s2495_s26 = scalar_select %p270_p6, %s2398_s18, 1  ;;  %v648_v19 = vadd.s32 5, %v2525_v16  ;;  %v647_v58 = vadd.s32 4, %v2525_v16 }
  0x10   : > { %s2324_s27 = smul.u32 60, %s2492_s25  ;;  %v638_v26 = vshrl.u32 %v637_v21, 7  ;;  %v2560_v47 = vand.u32 127, %v637_v21  ;;  %s2420_s18 = smov 64  }
  0x11   : > { %s2323_s28 = smul.u32 30, %s2495_s26  ;;  %v2219_v24 = vadd.s32 4294967295, %v648_v19  ;;  %v2218_v61 = vadd.s32 4294967295, %v647_v58  ;;  %s2421_s19 = smov 40  }
  0x12   : > { %v639_v32 = vadd.s32 8, %v638_v26  ;;  %v2543_v35 = vadd.s32 4294967295, %v638_v26 }
  0x13   : > { %s2499_s29 = sadd.s32 %s2324_s27, %s2323_s28  ;;  %v672_v31 = vadd.s32 %v2219_v24, %v2535_v27  ;;  %v671_v62 = vadd.s32 %v2218_v61, %v2535_v27  ;;  %s2422_s27 = smov 56  }
  0x14   : > { %s2129_s30 = sshll.u32 %s2499_s29, 2  ;;  %v2548_v38 = vadd.s32 4294967295, %v639_v32  ;;  %s2423_s28 = smov 8  }
  0x15   : > { %s2507_s8 = scalar_lea.vmem %s3456_s1, %s2129_s30  ;;  %v2545_v36 = vmul.u32 16, %v672_v31  ;;  %s2601_s14 = scalar_lea.vmem %s3455_s0, %s2129_s30 }
  0x16   : > { %v2298_v0 = vld [vmem:[%s2507_s8 + $0x30] sm:$0xff]  ;;  %v340_v1 = vld [vmem:[%s2507_s8 + $0x38] sm:$0x1]  ;;  %v2299_v4 = vld [vmem:[%s2507_s8 + $0x3c] sm:$0xff]  ;;  %s2424_s29 = smov 32  }
  0x17   : > { %v480_v2 = vunpack.c.l.b16 %v340_v1  ;;  %532 = vrot.lane.b32.xlu0 %v2298_v0, %s2416_s9  ;;  %v346_v3 = vld [vmem:[%s2507_s8 + $0x50] sm:$0x1]  ;;  %536 = vrot.lane.b32.xlu2 %v2299_v4, %s2416_s9  ;;  %v2300_v7 = vld [vmem:[%s2507_s8 + $0x48] sm:$0xff]  ;;  %v702_v42 = vadd.s32 %v2543_v35, %v2545_v36  ;;  %v703_v44 = vadd.s32 %v2548_v38, %v2545_v36  ;;  %v681_v1 = vmul.u32 16, %v671_v62 }
  0x18   : > { %v486_v6 = vunpack.c.l.b16 %v346_v3  ;;  %v343_v8 = vld [vmem:[%s2507_s8 + $0x44] sm:$0x1]  ;;  %v2301_v9 = vld [vmem:[%s2507_s8 + $0x54] sm:$0xff]  ;;  %v349_v12 = vld [vmem:[%s2507_s8 + $0x5c] sm:$0x1] }
  0x19   : > { %v505_v5 = vpack.c.b16 %v480_v2, %v480_v2  ;;  %v483_v11 = vunpack.c.l.b16 %v343_v8  ;;  %v489_v13 = vunpack.c.l.b16 %v349_v12  ;;  %v2294_v15 = vld [vmem:[%s2507_s8] sm:$0xff]  ;;  %v328_v18 = vld [vmem:[%s2507_s8 + $0x8] sm:$0x1]  ;;  %v2296_v22 = vld [vmem:[%s2507_s8 + $0x18] sm:$0xff]  ;;  %v732_v48 = vmul.u32 8, %v702_v42 }
  0x1a   : > { %v509_v10 = vpack.c.b16 %v486_v6, %v486_v6  ;;  %v468_v20 = vunpack.c.l.b16 %v328_v18  ;;  %v334_v23 = vld [vmem:[%s2507_s8 + $0x20] sm:$0x1]  ;;  %v352_v30 = vld [vmem:[%s2507_s8 + $0x68] sm:$0x1]  ;;  %v2295_v37 = vld [vmem:[%s2507_s8 + $0xc] sm:$0xff]  ;;  %v733_v50 = vmul.u32 8, %v703_v44  ;;  %v699_v3 = vadd.s32 %v2543_v35, %v681_v1 }
  0x1b   : > { %534 = vrot.lane.b32.xlu1 %v505_v5, %s2416_s9  ;;  %v507_v14 = vpack.c.b16 %v483_v11, %v483_v11  ;;  %v511_v17 = vpack.c.b16 %v489_v13, %v489_v13  ;;  %v2302_v28 = vld [vmem:[%s2507_s8 + $0x60] sm:$0xff]  ;;  %v474_v29 = vunpack.c.l.b16 %v334_v23  ;;  %v492_v33 = vunpack.c.l.b16 %v352_v30  ;;  %v337_v40 = vld [vmem:[%s2507_s8 + $0x2c] sm:$0x1]  ;;  %v331_v41 = vld [vmem:[%s2507_s8 + $0x14] sm:$0x1] }
  0x1c   : > { %v497_v25 = vpack.c.b16 %v468_v20, %v468_v20  ;;  %v477_v43 = vunpack.c.l.b16 %v337_v40  ;;  %v471_v45 = vunpack.c.l.b16 %v331_v41  ;;  %v2297_v46 = vld [vmem:[%s2507_s8 + $0x24] sm:$0xff]  ;;  %v762_v52 = vadd.s32 %v732_v48, %v2560_v47 }
  0x1d   : > { %v501_v34 = vpack.c.b16 %v474_v29, %v474_v29  ;;  %v513_v39 = vpack.c.b16 %v492_v33, %v492_v33  ;;  %v763_v53 = vadd.s32 %v733_v50, %v2560_v47  ;;  %v640_v2 = vadd.s32 16, %v638_v26 }
  0x1e   : > { %v503_v49 = vpack.c.b16 %v477_v43, %v477_v43  ;;  %v499_v51 = vpack.c.b16 %v471_v45, %v471_v45  ;;  %v792_v54 = vmul.u32 2654435761, %v762_v52  ;;  %v700_v4 = vadd.s32 %v2548_v38, %v681_v1 }
  0x1f   : > { %540 = vrot.lane.b32.xlu0 %v2300_v7, %s2416_s9  ;;  %544 = vrot.lane.b32.xlu2 %v2301_v9, %s2416_s9  ;;  %v793_v55 = vmul.u32 2654435761, %v763_v53  ;;  %v649_v5 = vadd.s32 6, %v2525_v16  ;;  %v2572_v7 = vadd.s32 4294967295, %v640_v2  ;;  %v729_v9 = vmul.u32 8, %v699_v3 }
  0x20   : > { %v822_v56 = vadd.s32 1540483477, %v792_v54  ;;  %v730_v11 = vmul.u32 8, %v700_v4  ;;  %v650_v18 = vadd.s32 7, %v2525_v16 }
  0x21   : > { %v823_v57 = vadd.s32 1540483477, %v793_v55  ;;  %v701_v12 = vadd.s32 %v2572_v7, %v681_v1 }
  0x22   : > { %v852_v59 = vshrl.u32 %v822_v56, 15  ;;  %v760_v20 = vadd.s32 %v730_v11, %v2560_v47 }
  0x23   : > { %542 = vrot.lane.b32.xlu1 %v509_v10, %s2416_s9  ;;  %v853_v60 = vshrl.u32 %v823_v57, 15  ;;  %v2220_v10 = vadd.s32 4294967295, %v649_v5  ;;  %v731_v21 = vmul.u32 8, %v701_v12 }
  0x24   : > { %v882_v63 = vxor.u32 %v852_v59, %v822_v56  ;;  %v790_v33 = vmul.u32 2654435761, %v760_v20 }
  0x25   : > { %v883_v0 = vxor.u32 %v853_v60, %v823_v57  ;;  %v673_v13 = vadd.s32 %v2220_v10, %v2535_v27 }
  0x26   : > { %v912_v6 = vmul.u32 2246822507, %v882_v63  ;;  %v820_v50 = vadd.s32 1540483477, %v790_v33 }
  0x27   : > { %538 = vrot.lane.b32.xlu0 %v507_v14, %s2416_s9  ;;  %516 = vrot.lane.b32.xlu2 %v2294_v15, %s2416_s9  ;;  %v913_v8 = vmul.u32 2246822507, %v883_v0  ;;  %v759_v15 = vadd.s32 %v729_v9, %v2560_v47  ;;  %v683_v19 = vmul.u32 16, %v673_v13 }
  0x28   : > { %v942_v14 = vshrl.u32 %v912_v6, 13  ;;  %v850_v62 = vshrl.u32 %v820_v50, 15 }
  0x29   : > { %v705_v23 = vadd.s32 %v2543_v35, %v683_v19  ;;  %v706_v26 = vadd.s32 %v2548_v38, %v683_v19  ;;  %v707_v32 = vadd.s32 %v2572_v7, %v683_v19 }
  0x2a   : > { %v972_v24 = vxor.u32 %v942_v14, %v912_v6  ;;  %v880_v11 = vxor.u32 %v850_v62, %v820_v50 }
  0x2b   : > { %546 = vrot.lane.b32.xlu1 %v511_v17, %s2416_s9  ;;  %v943_v17 = vshrl.u32 %v913_v8, 13  ;;  %v735_v30 = vmul.u32 8, %v705_v23  ;;  %v736_v31 = vmul.u32 8, %v706_v26 }
  0x2c   : > { %v1002_v40 = vmul.u32 3266489909, %v972_v24  ;;  %v910_v26 = vmul.u32 2246822507, %v880_v11 }
  0x2d   : > { %v766_v42 = vadd.s32 %v736_v31, %v2560_v47  ;;  %v2289_v31 = vld [vmem:[%s2601_s14 + $0x3c] sm:$0xff] }
  0x2e   : > { %v1032_v54 = vshrl.u32 %v1002_v40, 16 }
  0x2f   : > { %524 = vrot.lane.b32.xlu0 %v2296_v22, %s2416_s9  ;;  %518 = vrot.lane.b32.xlu2 %v497_v25, %s2416_s9  ;;  %v2221_v22 = vadd.s32 4294967295, %v650_v18  ;;  %v789_v25 = vmul.u32 2654435761, %v759_v15 }
  0x30   : > { %v1062_v1 = vxor.u32 %v1032_v54, %v1002_v40 }
  0x31   : > { %v674_v29 = vadd.s32 %v2221_v22, %v2535_v27  ;;  %v819_v41 = vadd.s32 1540483477, %v789_v25  ;;  %v704_v22 = vadd.s32 %v2572_v7, %v2545_v36 }
  0x32   : > { %v2243_v14 = vxor.u32 2147483648, %v1062_v1 }
  0x33   : > { %548 = vrot.lane.b32.xlu1 %v2302_v28, %s2416_s9  ;;  %v973_v28 = vxor.u32 %v943_v17, %v913_v8  ;;  %v849_v55 = vshrl.u32 %v819_v41, 15  ;;  %v2303_v17 = vld [vmem:[%s2507_s8 + $0x6c] sm:$0xff]  ;;  %v734_v40 = vmul.u32 8, %v704_v22 }
  0x34   : > { %vm2608_vm1 = vcmp.ge.s32.totalorder %v2243_v14, 2576980378  ;;  %v2215_v14 = vadd.s32 4294967295, %v2525_v16 }
  0x35   : > { %v1003_v43 = vmul.u32 3266489909, %v973_v28  ;;  %v879_v2 = vxor.u32 %v849_v55, %v819_v41  ;;  %vm1272_vm3 = vmpackc.low %vm2608_vm1, %vm2608_vm1 }
  0x37   : > { %526 = vrot.lane.b32.xlu0 %v501_v34, %s2416_s9  ;;  %520 = vrot.lane.b32.xlu2 %v2295_v37, %s2416_s9  ;;  %v761_v34 = vadd.s32 %v731_v21, %v2560_v47  ;;  %v2584_v37 = vmul.u32 16, %v674_v29  ;;  %v1033_v56 = vshrl.u32 %v1003_v43, 16  ;;  %v909_v15 = vmul.u32 2246822507, %v879_v2 }
  0x39   : > { %v708_v44 = vadd.s32 %v2543_v35, %v2584_v37  ;;  %v709_v45 = vadd.s32 %v2548_v38, %v2584_v37  ;;  %v1063_v4 = vxor.u32 %v1033_v56, %v1003_v43 }
  0x3b   : > { %550 = vrot.lane.b32.xlu1 %v513_v39, %s2416_s9  ;;  %v765_v39 = vadd.s32 %v735_v30, %v2560_v47  ;;  %v738_v52 = vmul.u32 8, %v708_v44  ;;  %v739_v53 = vmul.u32 8, %v709_v45  ;;  %v2244_v19 = vxor.u32 2147483648, %v1063_v4  ;;  %v2291_v4 = vld [vmem:[%s2601_s14 + $0x54] sm:$0xff] }
  0x3c   : > { %v940_v45 = vshrl.u32 %v910_v26, 13 }
  0x3d   : > { %v795_v48 = vmul.u32 2654435761, %v765_v39  ;;  %v768_v57 = vadd.s32 %v738_v52, %v2560_v47  ;;  %v769_v58 = vadd.s32 %v739_v53, %v2560_v47  ;;  %vm2613_vm2 = vcmp.ge.s32.totalorder %v2244_v19, 2576980378 }
  0x3e   : > { %v764_v53 = vadd.s32 %v734_v40, %v2560_v47  ;;  %vm1273_vm4 = vmpackc.low %vm2613_vm2, %vm2613_vm2  ;;  %v2628_v1 = vxor.u32 %v940_v45, %v910_v26 }
  0x3f   : > { %528 = vrot.lane.b32.xlu0 %v2297_v46, %s2416_s9  ;;  %530 = vrot.lane.b32.xlu2 %v503_v49, %s2416_s9  ;;  %v737_v46 = vmul.u32 8, %v707_v32  ;;  %v796_v49 = vmul.u32 2654435761, %v766_v42  ;;  %v825_v60 = vadd.s32 1540483477, %v795_v48  ;;  %v939_v32 = vshrl.u32 %v909_v15, 13 }
  0x40   : > { %v798_v0 = vmul.u32 2654435761, %v768_v57  ;;  %v799_v3 = vmul.u32 2654435761, %v769_v58 }
  0x41   : > { %v767_v59 = vadd.s32 %v737_v46, %v2560_v47  ;;  %v826_v61 = vadd.s32 1540483477, %v796_v49  ;;  %v855_v9 = vshrl.u32 %v825_v60, 15 }
  0x42   : > { %v828_v5 = vadd.s32 1540483477, %v798_v0  ;;  %v829_v8 = vadd.s32 1540483477, %v799_v3 }
  0x43   : > { %522 = vrot.lane.b32.xlu1 %v499_v51, %s2416_s9  ;;  %v791_v51 = vmul.u32 2654435761, %v761_v34  ;;  %v797_v6 = vmul.u32 2654435761, %v767_v59  ;;  %v856_v10 = vshrl.u32 %v826_v61, 15  ;;  %v885_v24 = vxor.u32 %v855_v9, %v825_v60 }
  0x44   : > { %v858_v13 = vshrl.u32 %v828_v5, 15  ;;  %v859_v18 = vshrl.u32 %v829_v8, 15  ;;  %v710_v34 = vadd.s32 %v2572_v7, %v2584_v37 }
  0x45   : > { %v821_v63 = vadd.s32 1540483477, %v791_v51  ;;  %v827_v21 = vadd.s32 1540483477, %v797_v6  ;;  %v886_v25 = vxor.u32 %v856_v10, %v826_v61  ;;  %v915_v42 = vmul.u32 2246822507, %v885_v24 }
  0x46   : > { %v888_v20 = vxor.u32 %v858_v13, %v828_v5  ;;  %v889_v23 = vxor.u32 %v859_v18, %v829_v8  ;;  %v2619_v51 = vxor.u32 %v939_v32, %v909_v15  ;;  %v794_v5 = vmul.u32 2654435761, %v764_v53 }
  0x47   : > { %v851_v12 = vshrl.u32 %v821_v63, 15  ;;  %552 = vrot.lane.b32.xlu0 %v2303_v17, %s2416_s9  ;;  %v857_v39 = vshrl.u32 %v827_v21, 15  ;;  %v916_v43 = vmul.u32 2246822507, %v886_v25  ;;  %v945_v59 = vshrl.u32 %v915_v42, 13 }
  0x48   : > { %v918_v29 = vmul.u32 2246822507, %v888_v20  ;;  %v919_v33 = vmul.u32 2246822507, %v889_v23  ;;  %v999_v2 = vmul.u32 3266489909, %v2619_v51 }
  0x49   : > { %v2606_v28 = vxor.u32 %v851_v12, %v821_v63  ;;  %v887_v49 = vxor.u32 %v857_v39, %v827_v21  ;;  %v946_v60 = vshrl.u32 %v916_v43, 13  ;;  %v975_v12 = vxor.u32 %v945_v59, %v915_v42 }
  0x4a   : > { %v948_v36 = vshrl.u32 %v918_v29, 13  ;;  %v949_v41 = vshrl.u32 %v919_v33, 13  ;;  %v824_v20 = vadd.s32 1540483477, %v794_v5  ;;  %v1000_v42 = vmul.u32 3266489909, %v2628_v1 }
  0x4b   : > { %v911_v46 = vmul.u32 2246822507, %v2606_v28  ;;  %v917_v57 = vmul.u32 2246822507, %v887_v49  ;;  %v2632_v13 = vxor.u32 %v946_v60, %v916_v43  ;;  %v1005_v40 = vmul.u32 3266489909, %v975_v12 }
  0x4c   : > { %v978_v48 = vxor.u32 %v948_v36, %v918_v29  ;;  %v979_v52 = vxor.u32 %v949_v41, %v919_v33  ;;  %v667_v41 = vadd.s32 %v2215_v14, %v2535_v27  ;;  %v854_v37 = vshrl.u32 %v824_v20, 15  ;;  %v2288_v33 = vld [vmem:[%s2601_s14 + $0x30] sm:$0xff] }
  0x4d   : > { %v941_v63 = vshrl.u32 %v911_v46, 13  ;;  %v947_v10 = vshrl.u32 %v917_v57, 13  ;;  %v1006_v43 = vmul.u32 3266489909, %v2632_v13  ;;  %v645_v1 = vadd.s32 2, %v2525_v16 }
  0x4e   : > { %v1008_v56 = vmul.u32 3266489909, %v978_v48  ;;  %v1009_v58 = vmul.u32 3266489909, %v979_v52  ;;  %v2665_v49 = vmul.u32 16, %v667_v41  ;;  %v740_v52 = vmul.u32 8, %v710_v34 }
  0x4f   : > { %v977_v29 = vxor.u32 %v947_v10, %v917_v57  ;;  %v971_v32 = vxor.u32 %v941_v63, %v911_v46  ;;  %v1036_v59 = vshrl.u32 %v1006_v43, 16  ;;  %v884_v60 = vxor.u32 %v854_v37, %v824_v20 }
  0x50   : > { %v1038_v0 = vshrl.u32 %v1008_v56, 16  ;;  %v1039_v3 = vshrl.u32 %v1009_v58, 16  ;;  %v687_v57 = vadd.s32 %v2543_v35, %v2665_v49  ;;  %v2216_v12 = vadd.s32 4294967295, %v645_v1 }
  0x51   : > { %v1007_v48 = vmul.u32 3266489909, %v977_v29  ;;  %v1066_v14 = vxor.u32 %v1036_v59, %v1006_v43  ;;  %v2697_v43 = vld [vmem:[%s2601_s14 + $0x44] sm:$0x1] }
  0x52   : > { %v1068_v9 = vxor.u32 %v1038_v0, %v1008_v56  ;;  %v1069_v11 = vxor.u32 %v1039_v3, %v1009_v58  ;;  %v1035_v56 = vshrl.u32 %v1005_v40, 16  ;;  %v1029_v58 = vshrl.u32 %v999_v2, 16  ;;  %v310_v3 = vld [vmem:[%s2601_s14 + $0x38] sm:$0x1] }
  0x53   : > { %v1037_v63 = vshrl.u32 %v1007_v48, 16  ;;  %v717_v0 = vmul.u32 8, %v687_v57  ;;  %v403_v59 = vunpack.c.l.b16 %v2697_v43 }
  0x54   : > { %v2249_v18 = vxor.u32 2147483648, %v1068_v9  ;;  %v2250_v23 = vxor.u32 2147483648, %v1069_v11  ;;  %v1065_v10 = vxor.u32 %v1035_v56, %v1005_v40  ;;  %v1059_v13 = vxor.u32 %v1029_v58, %v999_v2 }
  0x55   : > { %v747_v11 = vadd.s32 %v717_v0, %v2560_v47  ;;  %v1067_v25 = vxor.u32 %v1037_v63, %v1007_v48 }
  0x56   : > { %vm2641_vm5 = vcmp.ge.s32.totalorder %v2249_v18, 2576980378  ;;  %vm2648_vm6 = vcmp.ge.s32.totalorder %v2250_v23, 2576980378  ;;  %v669_v23 = vadd.s32 %v2216_v12, %v2535_v27 }
  0x57   : > { %vm1278_vm7 = vmpackc.low %vm2641_vm5, %vm2641_vm5 }
  0x58   : > { %vm1279_vm8 = vmpackc.low %vm2648_vm6, %vm2648_vm6 }
  0x71   : > { %v537_v44 = vpop.permute.xlu2 %536 }
  0x72   : > { %v599_v50 = vsel %vm556_vm0, %v2289_v31, %v537_v44  ;;  %v355_v31 = vld [vmem:[%s2507_s8 + $0x74] sm:$0x1] }
  0x73   : > { %v1182_v54 = vunpack.c.l.bf16 %v599_v50  ;;  %v1183_v55 = vunpack.c.h.bf16 %v599_v50  ;;  %v495_v44 = vunpack.c.l.b16 %v355_v31  ;;  %v1001_v50 = vmul.u32 3266489909, %v971_v32 }
  0x74   : > { %v2240_v32 = vxor.u32 2147483648, %v1059_v13 }
  0x75   : > { %v1212_v61 = vmul.f32 1.109375, %v1182_v54  ;;  %v1213_v62 = vmul.f32 1.109375, %v1183_v55  ;;  %v515_v53 = vpack.c.b16 %v495_v44, %v495_v44  ;;  %v1031_v9 = vshrl.u32 %v1001_v50, 16 }
  0x76   : > { %v2699_v44 = vmul.u32 16, %v669_v23  ;;  %vm2728_vm12 = vcmp.ge.s32.totalorder %v2240_v32, 2576980378 }
  0x77   : > { %v1242_v6 = vpack.c.bf16 %v1212_v61, %v1212_v61  ;;  %v1243_v8 = vpack.c.bf16 %v1213_v62, %v1213_v62  ;;  %v688_v61 = vadd.s32 %v2548_v38, %v2665_v49  ;;  %554 = vrot.lane.b32.xlu1 %v515_v53, %s2416_s9  ;;  %v1030_v62 = vshrl.u32 %v1000_v42, 16 }
  0x78   : > { %v2690_v2 = vxor.u32 %v1031_v9, %v1001_v50 }
  0x79   : > { %v1302_v15 = vsel %vm1272_vm3, %v1242_v6, 0  ;;  %v1303_v17 = vsel %vm1273_vm4, %v1243_v8, 0  ;;  %v545_v19 = vpop.permute.xlu2 %544  ;;  %v718_v6 = vmul.u32 8, %v688_v61  ;;  %v770_v8 = vadd.s32 %v740_v52, %v2560_v47  ;;  %v2702_v52 = vld [vmem:[%s2601_s14 + $0x5c] sm:$0x1]  ;;  %v2284_v61 = vld [vmem:[%s2601_s14] sm:$0xff]  ;;  %vm1269_vm3 = vmpackc.low %vm2728_vm12, %vm2728_vm12 }
  0x7a   : > { %v1343_v21 = vunpack.c.l.b16 %v1302_v15  ;;  %v1344_v22 = vunpack.c.l.b16 %v1303_v17  ;;  %v615_v24 = vsel %vm556_vm0, %v2291_v4, %v545_v19  ;;  %v316_v15 = vld [vmem:[%s2601_s14 + $0x50] sm:$0x1]  ;;  %v914_v17 = vmul.u32 2246822507, %v884_v60 }
  0x7b   : > { %v1188_v26 = vunpack.c.l.bf16 %v615_v24  ;;  %v1189_v28 = vunpack.c.h.bf16 %v615_v24  ;;  %v748_v18 = vadd.s32 %v718_v6, %v2560_v47  ;;  %v1060_v19 = vxor.u32 %v1030_v62, %v1000_v42  ;;  %v2290_v42 = vld [vmem:[%s2601_s14 + $0x48] sm:$0xff] }
  0x7c   : > { %v2646_v30 = vpack.c.b16 %v1344_v22, %v1343_v21  ;;  %v400_v21 = vunpack.c.l.b16 %v310_v3  ;;  %v777_v22 = vmul.u32 2654435761, %v747_v11  ;;  %v800_v51 = vmul.u32 2654435761, %v770_v8 }
  0x7d   : > { %v1218_v36 = vmul.f32 1.109375, %v1188_v26  ;;  %v1219_v39 = vmul.f32 1.109375, %v1189_v28  ;;  %v778_v26 = vmul.u32 2654435761, %v748_v18  ;;  %v2246_v28 = vxor.u32 2147483648, %v1065_v10 }
  0x7e   : > { %1548 = vrot.lane.b32.xlu0 %v2646_v30, %s2417_s15  ;;  %v406_v29 = vunpack.c.l.b16 %v316_v15  ;;  %v807_v31 = vadd.s32 1540483477, %v777_v22  ;;  %v2241_v41 = vxor.u32 2147483648, %v1060_v19  ;;  %v830_v50 = vadd.s32 1540483477, %v800_v51 }
  0x7f   : > { %v1248_v45 = vpack.c.bf16 %v1218_v36, %v1218_v36  ;;  %v1249_v46 = vpack.c.bf16 %v1219_v39, %v1219_v39  ;;  %v2247_v36 = vxor.u32 2147483648, %v1066_v14  ;;  %v944_v39 = vshrl.u32 %v914_v17, 13 }
  0x80   : > { %v808_v40 = vadd.s32 1540483477, %v778_v26  ;;  %v837_v37 = vshrl.u32 %v807_v31, 15  ;;  %v2242_v53 = vxor.u32 2147483648, %v2690_v2  ;;  %vm2705_vm9 = vcmp.ge.s32.totalorder %v2246_v28, 2576980378 }
  0x81   : > { %v1308_v54 = vsel %vm1278_vm7, %v1248_v45, 0  ;;  %v1309_v55 = vsel %vm1279_vm8, %v1249_v46, 0  ;;  %v425_v45 = vpack.c.b16 %v400_v21, %v400_v21  ;;  %v2248_v46 = vxor.u32 2147483648, %v1067_v25  ;;  %v517_v13 = vpop.permute.xlu2 %516  ;;  %vm1275_vm14 = vmpackc.low %vm2705_vm9, %vm2705_vm9 }
  0x82   : > { %v1347_v4 = vunpack.c.l.b16 %v1308_v54  ;;  %v1348_v5 = vunpack.c.l.b16 %v1309_v55  ;;  %v838_v48 = vshrl.u32 %v808_v40, 15  ;;  %v429_v55 = vpack.c.b16 %v406_v29, %v406_v29 }
  0x83   : > { %v867_v56 = vxor.u32 %v837_v37, %v807_v31  ;;  %vm2709_vm10 = vcmp.ge.s32.totalorder %v2247_v36, 2576980378  ;;  %v2713_v58 = vxor.u32 %v944_v39, %v914_v17  ;;  %v409_v1 = vunpack.c.l.b16 %v2702_v52 }
  0x84   : > { %v2688_v24 = vpack.c.b16 %v1348_v5, %v1347_v4  ;;  %v868_v60 = vxor.u32 %v838_v48, %v808_v40  ;;  %v693_v3 = vadd.s32 %v2543_v35, %v2699_v44  ;;  %vm2722_vm11 = vcmp.ge.s32.totalorder %v2248_v46, 2576980378  ;;  %vm1276_vm15 = vmpackc.low %vm2709_vm10, %vm2709_vm10 }
  0x85   : > { %v897_v0 = vmul.u32 2246822507, %v867_v56  ;;  %v860_v6 = vshrl.u32 %v830_v50, 15  ;;  %v694_v8 = vadd.s32 %v2548_v38, %v2699_v44  ;;  %v1004_v19 = vmul.u32 3266489909, %v2713_v58  ;;  %vm1277_vm2 = vmpackc.low %vm2722_vm11, %vm2722_vm11 }
  0x86   : > { %1552 = vrot.lane.b32.xlu1 %v2688_v24, %s2417_s15  ;;  %v898_v11 = vmul.u32 2246822507, %v868_v60  ;;  %vm2736_vm13 = vcmp.ge.s32.totalorder %v2241_v41, 2576980378  ;;  %v723_v26 = vmul.u32 8, %v693_v3 }
  0x87   : > { %v927_v12 = vshrl.u32 %v897_v0, 13  ;;  %v890_v29 = vxor.u32 %v860_v6, %v830_v50  ;;  %v724_v36 = vmul.u32 8, %v694_v8  ;;  %vm2748_vm1 = vcmp.ge.s32.totalorder %v2242_v53, 2576980378  ;;  %vm1270_vm4 = vmpackc.low %vm2736_vm13, %vm2736_vm13 }
  0x88   : > { %v928_v2 = vshrl.u32 %v898_v11, 13  ;;  %v1034_v3 = vshrl.u32 %v1004_v19, 16  ;;  %v689_v6 = vadd.s32 %v2572_v7, %v2665_v49  ;;  %vm1271_vm5 = vmpackc.low %vm2748_vm1, %vm2748_vm1 }
  0x89   : > { %v533_v20 = vpop.permute.xlu0 %532  ;;  %v957_v28 = vxor.u32 %v927_v12, %v897_v0 }
  0x8a   : > { %v591_v62 = vsel %vm556_vm0, %v2288_v33, %v533_v20  ;;  %v2734_v20 = vsel %vm556_vm0, %v2284_v61, %v517_v13  ;;  %v920_v61 = vmul.u32 2246822507, %v890_v29  ;;  %v1064_v14 = vxor.u32 %v1034_v3, %v1004_v19 }
  0x8b   : > { %v1179_v15 = vunpack.c.l.bf16 %v591_v62  ;;  %v1180_v17 = vunpack.c.h.bf16 %v591_v62  ;;  %v987_v37 = vmul.u32 3266489909, %v957_v28  ;;  %v1167_v5 = vunpack.c.l.bf16 %v2734_v20 }
  0x8c   : > { %v950_v49 = vshrl.u32 %v920_v61, 13  ;;  %v719_v43 = vmul.u32 8, %v689_v6 }
  0x8d   : > { %v535_v34 = vpop.permute.xlu1 %534  ;;  %v1209_v39 = vmul.f32 1.109375, %v1179_v15  ;;  %v1210_v57 = vmul.f32 1.109375, %v1180_v17  ;;  %v1017_v60 = vshrl.u32 %v987_v37, 16  ;;  %v427_v15 = vpack.c.b16 %v403_v59, %v403_v59 }
  0x8e   : > { %v595_v31 = vsel %vm556_vm0, %v425_v45, %v535_v34  ;;  %v753_v34 = vadd.s32 %v723_v26, %v2560_v47  ;;  %v754_v45 = vadd.s32 %v724_v36, %v2560_v47  ;;  %v1197_v26 = vmul.f32 1.109375, %v1167_v5 }
  0x8f   : > { %v1181_v50 = vunpack.c.l.bf16 %v595_v31  ;;  %v1239_v8 = vpack.c.bf16 %v1209_v39, %v1209_v39  ;;  %v1240_v12 = vpack.c.bf16 %v1210_v57, %v1210_v57  ;;  %v1047_v17 = vxor.u32 %v1017_v60, %v987_v37 }
  0x90   : > { %v784_v0 = vmul.u32 2654435761, %v754_v45  ;;  %v980_v31 = vxor.u32 %v950_v49, %v920_v61  ;;  %v749_v19 = vadd.s32 %v719_v43, %v2560_v47  ;;  %v2245_v39 = vxor.u32 2147483648, %v1064_v14  ;;  %v298_v45 = vld [vmem:[%s2601_s14 + $0x8] sm:$0x1]  ;;  %v2286_v61 = vld [vmem:[%s2601_s14 + $0x18] sm:$0xff] }
  0x91   : > { %v541_v63 = vpop.permute.xlu0 %540  ;;  %v1299_v59 = vsel %vm1269_vm3, %v1239_v8, 0  ;;  %v1300_v21 = vsel %vm1270_vm4, %v1240_v12, 0  ;;  %v388_v6 = vunpack.c.l.b16 %v298_v45  ;;  %v668_v57 = vadd.s32 %v2535_v27, %v2525_v16 }
  0x92   : > { %v607_v4 = vsel %vm556_vm0, %v2290_v42, %v541_v63  ;;  %v958_v42 = vxor.u32 %v928_v2, %v898_v11  ;;  %v783_v63 = vmul.u32 2654435761, %v753_v34  ;;  %v814_v11 = vadd.s32 1540483477, %v784_v0 }
  0x93   : > { %v1185_v9 = vunpack.c.l.bf16 %v607_v4  ;;  %v1186_v10 = vunpack.c.h.bf16 %v607_v4  ;;  %v1341_v36 = vunpack.c.l.b16 %v1299_v59  ;;  %v1342_v40 = vunpack.c.l.b16 %v1300_v21  ;;  %v2292_v21 = vld [vmem:[%s2601_s14 + $0x60] sm:$0xff] }
  0x94   : > { %v988_v58 = vmul.u32 3266489909, %v958_v42  ;;  %v779_v34 = vmul.u32 2654435761, %v749_v19  ;;  %vm2803_vm8 = vcmp.ge.s32.totalorder %v2245_v39, 2576980378  ;;  %v417_v43 = vpack.c.b16 %v388_v6, %v388_v6 }
  0x95   : > { %v543_v18 = vpop.permute.xlu1 %542  ;;  %v1215_v22 = vmul.f32 1.109375, %v1185_v9  ;;  %v1216_v23 = vmul.f32 1.109375, %v1186_v10  ;;  %v1211_v9 = vmul.f32 1.109375, %v1181_v50  ;;  %v813_v10 = vadd.s32 1540483477, %v783_v63  ;;  %vm1274_vm11 = vmpackc.low %vm2803_vm8, %vm2803_vm8 }
  0x96   : > { %v611_v25 = vsel %vm556_vm0, %v429_v55, %v543_v18  ;;  %v1018_v4 = vshrl.u32 %v988_v58, 16  ;;  %v809_v63 = vadd.s32 1540483477, %v779_v34  ;;  %v2807_v8 = vpack.c.b16 %v1342_v40, %v1341_v36 }
  0x97   : > { %v1187_v51 = vunpack.c.l.bf16 %v611_v25  ;;  %v1245_v32 = vpack.c.bf16 %v1215_v22, %v1215_v22  ;;  %v1246_v33 = vpack.c.bf16 %v1216_v23, %v1216_v23  ;;  %v1168_v22 = vunpack.c.h.bf16 %v2734_v20 }
  0x98   : > { %v1048_v18 = vxor.u32 %v1018_v4, %v988_v58  ;;  %v843_v23 = vshrl.u32 %v813_v10, 15  ;;  %v844_v25 = vshrl.u32 %v814_v11, 15  ;;  %v1241_v2 = vpack.c.bf16 %v1211_v9, %v1211_v9 }
  0x99   : > { %v1217_v41 = vmul.f32 1.109375, %v1187_v51  ;;  %v1305_v46 = vsel %vm1275_vm14, %v1245_v32, 0  ;;  %v1306_v48 = vsel %vm1276_vm15, %v1246_v33, 0  ;;  %v539_v13 = vpop.permute.xlu0 %538  ;;  %v2784_v51 = vpack.c.b16 %v409_v1, %v409_v1 }
  0x9a   : > { %v1345_v53 = vunpack.c.l.b16 %v1305_v46  ;;  %v1346_v55 = vunpack.c.l.b16 %v1306_v48  ;;  %v873_v28 = vxor.u32 %v843_v23, %v813_v10  ;;  %v874_v29 = vxor.u32 %v844_v25, %v814_v11 }
  0x9b   : > { %v1247_v56 = vpack.c.bf16 %v1217_v41, %v1217_v41  ;;  %v2228_v20 = vxor.u32 2147483648, %v1047_v17  ;;  %v603_v52 = vsel %vm556_vm0, %v427_v15, %v539_v13  ;;  %v2229_v32 = vxor.u32 2147483648, %v1048_v18 }
  0x9c   : > { %v2762_v54 = vpack.c.b16 %v1346_v55, %v1345_v53  ;;  %v1198_v1 = vmul.f32 1.109375, %v1168_v22  ;;  %v903_v33 = vmul.u32 2246822507, %v873_v28  ;;  %v1227_v41 = vpack.c.bf16 %v1197_v26, %v1197_v26  ;;  %v519_v28 = vpop.permute.xlu2 %518 }
  0x9d   : > { %v2764_v62 = vsel %vm1277_vm2, %v1247_v56, 0  ;;  %v2791_v42 = vpop.permute.xlu1 %546  ;;  %v904_v37 = vmul.u32 2246822507, %v874_v29  ;;  %v1301_v46 = vsel %vm1271_vm5, %v1241_v2, 0  ;;  %v1184_v50 = vunpack.c.l.bf16 %v603_v52 }
  0x9e   : > { %1619 = vrot.lane.b32.xlu0 %v2762_v54, %s2418_s16  ;;  %v933_v48 = vshrl.u32 %v903_v33, 13  ;;  %vm2794_vm6 = vcmp.ge.s32.totalorder %v2228_v20, 2576980378  ;;  %v1010_v55 = vmul.u32 3266489909, %v980_v31  ;;  %v1228_v58 = vpack.c.bf16 %v1198_v1, %v1198_v1 }
  0x9f   : > { %v934_v56 = vshrl.u32 %v904_v37, 13  ;;  %vm2798_vm7 = vcmp.ge.s32.totalorder %v2229_v32, 2576980378  ;;  %v1369_v0 = vunpack.c.l.b16 %v1301_v46  ;;  %vm1257_vm9 = vmpackc.low %vm2794_vm6, %vm2794_vm6  ;;  %v839_v10 = vshrl.u32 %v809_v63, 15 }
  0xa0   : > { %v963_v60 = vxor.u32 %v933_v48, %v903_v33  ;;  %v651_v11 = vadd.s32 8, %v2525_v16  ;;  %v1214_v12 = vmul.f32 1.109375, %v1184_v50  ;;  %vm1258_vm10 = vmpackc.low %vm2798_vm7, %vm2798_vm7  ;;  %v1040_v13 = vshrl.u32 %v1010_v55, 16 }
  0xa1   : > { %v964_v4 = vxor.u32 %v934_v56, %v904_v37  ;;  %v525_v5 = vpop.permute.xlu0 %524  ;;  %v695_v17 = vadd.s32 %v2572_v7, %v2699_v44  ;;  %v869_v22 = vxor.u32 %v839_v10, %v809_v63  ;;  %v2819_v25 = vpack.c.b16 %v1369_v0, %v1369_v0 }
  0xa2   : > { %v993_v9 = vmul.u32 3266489909, %v963_v60  ;;  %v575_v18 = vsel %vm556_vm0, %v2286_v61, %v525_v5  ;;  %v2222_v23 = vadd.s32 4294967295, %v651_v11  ;;  %v1287_v14 = vsel %vm1257_vm9, %v1227_v41, 0 }
  0xa3   : > { %v994_v15 = vmul.u32 3266489909, %v964_v4  ;;  %v1288_v59 = vsel %vm1258_vm10, %v1228_v58, 0  ;;  %v899_v2 = vmul.u32 2246822507, %v869_v22  ;;  %v725_v20 = vmul.u32 8, %v695_v17 }
  0xa4   : > { %v1023_v49 = vshrl.u32 %v993_v9, 16  ;;  %v675_v29 = vadd.s32 %v2222_v23, %v2535_v27  ;;  %v1244_v31 = vpack.c.bf16 %v1214_v12, %v1214_v12  ;;  %v2823_v19 = vxor.u32 %v1040_v13, %v1010_v55 }
  0xa5   : > { %v1024_v26 = vshrl.u32 %v994_v15, 16  ;;  %v1173_v52 = vunpack.c.l.bf16 %v575_v18  ;;  %v549_v32 = vpop.permute.xlu1 %548  ;;  %v1333_v1 = vunpack.c.l.b16 %v1287_v14  ;;  %v929_v33 = vshrl.u32 %v899_v2, 13 }
  0xa6   : > { %v1053_v44 = vxor.u32 %v1023_v49, %v993_v9  ;;  %v2825_v36 = vmul.u32 16, %v675_v29  ;;  %v755_v39 = vadd.s32 %v725_v20, %v2560_v47  ;;  %v1334_v41 = vunpack.c.l.b16 %v1288_v59 }
  0xa7   : > { %v1054_v37 = vxor.u32 %v1024_v26, %v994_v15  ;;  %v1174_v40 = vunpack.c.h.bf16 %v575_v18  ;;  %v563_v46 = vsel %vm556_vm0, %v417_v43, %v519_v28  ;;  %v959_v48 = vxor.u32 %v929_v33, %v899_v2  ;;  %v304_v43 = vld [vmem:[%s2601_s14 + $0x20] sm:$0x1] }
  0xa8   : > { %v711_v34 = vadd.s32 %v2543_v35, %v2825_v36  ;;  %v712_v45 = vadd.s32 %v2548_v38, %v2825_v36  ;;  %v623_v50 = vsel %vm556_vm0, %v2292_v21, %v549_v32  ;;  %v2234_v53 = vxor.u32 2147483648, %v1053_v44 }
  0xa9   : > { %v1203_v55 = vmul.f32 1.109375, %v1173_v52  ;;  %v785_v56 = vmul.u32 2654435761, %v755_v39  ;;  %v989_v58 = vmul.u32 3266489909, %v959_v48  ;;  %v1169_v60 = vunpack.c.l.bf16 %v563_v46 }
  0xaa   : > { %v741_v61 = vmul.u32 8, %v711_v34  ;;  %v742_v63 = vmul.u32 8, %v712_v45  ;;  %v2839_v0 = vsel %vm1274_vm11, %v1244_v31, 0  ;;  %v2235_v3 = vxor.u32 2147483648, %v1054_v37  ;;  %v2285_v34 = vld [vmem:[%s2601_s14 + $0xc] sm:$0xff] }
  0xab   : > { %v1204_v4 = vmul.f32 1.109375, %v1174_v40  ;;  %v1191_v5 = vunpack.c.l.bf16 %v623_v50  ;;  %v1019_v6 = vshrl.u32 %v989_v58, 16  ;;  %v815_v11 = vadd.s32 1540483477, %v785_v56 }
  0xac   : > { %v771_v9 = vadd.s32 %v741_v61, %v2560_v47  ;;  %v772_v10 = vadd.s32 %v742_v63, %v2560_v47  ;;  %v2843_v12 = vpack.c.b16 %v1334_v41, %v1333_v1  ;;  %vm2845_vm12 = vcmp.ge.s32.totalorder %v2234_v53, 2576980378 }
  0xad   : > { %v1192_v15 = vunpack.c.h.bf16 %v623_v50  ;;  %v2849_v17 = vmul.u32 16, %v668_v57  ;;  %v1233_v49 = vpack.c.bf16 %v1203_v55, %v1203_v55  ;;  %v2851_v18 = vmul.f32 1.109375, %v1169_v60  ;;  %vm1263_vm14 = vmpackc.low %vm2845_vm12, %vm2845_vm12 }
  0xae   : > { %v801_v22 = vmul.u32 2654435761, %v771_v9  ;;  %v802_v23 = vmul.u32 2654435761, %v772_v10  ;;  %vm2853_vm13 = vcmp.ge.s32.totalorder %v2235_v3, 2576980378  ;;  %v1049_v26 = vxor.u32 %v1019_v6, %v989_v58 }
  0xaf   : > { %v690_v59 = vadd.s32 %v2543_v35, %v2849_v17  ;;  %v691_v2 = vadd.s32 %v2548_v38, %v2849_v17  ;;  %v2865_v21 = vmul.f32 1.109375, %v1191_v5  ;;  %v845_v20 = vshrl.u32 %v815_v11, 15  ;;  %vm1264_vm15 = vmpackc.low %vm2853_vm13, %vm2853_vm13  ;;  %v521_v5 = vpop.permute.xlu2 %520  ;;  %v322_v6 = vld [vmem:[%s2601_s14 + $0x68] sm:$0x1] }
  0xb0   : > { %v831_v28 = vadd.s32 1540483477, %v801_v22  ;;  %v832_v29 = vadd.s32 1540483477, %v802_v23  ;;  %v1234_v31 = vpack.c.bf16 %v1204_v4, %v1204_v4  ;;  %v2867_v44 = vmul.f32 1.109375, %v1192_v15 }
  0xb1   : > { %v720_v52 = vmul.u32 8, %v690_v59  ;;  %v721_v32 = vmul.u32 8, %v691_v2  ;;  %v1229_v1 = vpack.c.bf16 %v2851_v18, %v2851_v18  ;;  %v394_v41 = vunpack.c.l.b16 %v304_v43 }
  0xb2   : > { %v861_v33 = vshrl.u32 %v831_v28, 15  ;;  %v862_v39 = vshrl.u32 %v832_v29, 15  ;;  %v2874_v37 = vsel %vm1263_vm14, %v1233_v49, 0  ;;  %v2230_v40 = vxor.u32 2147483648, %v1049_v26 }
  0xb3   : > { %v750_v46 = vadd.s32 %v720_v52, %v2560_v47  ;;  %v751_v48 = vadd.s32 %v721_v32, %v2560_v47  ;;  %v1251_v53 = vpack.c.bf16 %v2865_v21, %v2865_v21  ;;  %v875_v55 = vxor.u32 %v845_v20, %v815_v11 }
  0xb4   : > { %v891_v45 = vxor.u32 %v861_v33, %v831_v28  ;;  %v892_v50 = vxor.u32 %v862_v39, %v832_v29  ;;  %v2881_v56 = vsel %vm1264_vm15, %v1234_v31, 0  ;;  %v1252_v57 = vpack.c.bf16 %v2867_v44, %v2867_v44 }
  0xb5   : > { %v780_v58 = vmul.u32 2654435761, %v750_v46  ;;  %v781_v60 = vmul.u32 2654435761, %v751_v48  ;;  %v1337_v61 = vunpack.c.l.b16 %v2874_v37  ;;  %v2886_v4 = vpack.c.b16 %v394_v41, %v394_v41 }
  0xb6   : > { %v921_v63 = vmul.u32 2246822507, %v891_v45  ;;  %v922_v3 = vmul.u32 2246822507, %v892_v50  ;;  %vm2889_vm1 = vcmp.ge.s32.totalorder %v2230_v40, 2576980378  ;;  %v567_v13 = vsel %vm556_vm0, %v2285_v34, %v521_v5 }
  0xb7   : > { %v810_v10 = vadd.s32 1540483477, %v780_v58  ;;  %v811_v11 = vadd.s32 1540483477, %v781_v60  ;;  %v905_v18 = vmul.u32 2246822507, %v875_v55  ;;  %v713_v22 = vadd.s32 %v2572_v7, %v2825_v36  ;;  %vm1259_vm2 = vmpackc.low %vm2889_vm1, %vm2889_vm1 }
  0xb8   : > { %v951_v15 = vshrl.u32 %v921_v63, 13  ;;  %v952_v49 = vshrl.u32 %v922_v3, 13  ;;  %v412_v26 = vunpack.c.l.b16 %v322_v6  ;;  %v646_v43 = vadd.s32 3, %v2525_v16  ;;  %v551_v6 = vpop.permute.xlu1 %550 }
  0xb9   : > { %v840_v23 = vshrl.u32 %v810_v10, 15  ;;  %v841_v14 = vshrl.u32 %v811_v11, 15  ;;  %v1170_v28 = vunpack.c.l.bf16 %v567_v13  ;;  %v743_v29 = vmul.u32 8, %v713_v22 }
  0xba   : > { %v981_v59 = vxor.u32 %v951_v15, %v921_v63  ;;  %v982_v2 = vxor.u32 %v952_v49, %v922_v3  ;;  %v1171_v52 = vunpack.c.h.bf16 %v567_v13  ;;  %v2217_v32 = vadd.s32 4294967295, %v646_v43 }
  0xbb   : > { %v870_v20 = vxor.u32 %v840_v23, %v810_v10  ;;  %v871_v31 = vxor.u32 %v841_v14, %v811_v11  ;;  %v935_v36 = vshrl.u32 %v905_v18, 13  ;;  %v773_v41 = vadd.s32 %v743_v29, %v2560_v47 }
  0xbc   : > { %v1011_v33 = vmul.u32 3266489909, %v981_v59  ;;  %v1012_v39 = vmul.u32 3266489909, %v982_v2  ;;  %v2901_v40 = vsel %vm1259_vm2, %v1229_v1, 0  ;;  %v433_v34 = vpack.c.b16 %v412_v26, %v412_v26 }
  0xbd   : > { %v900_v46 = vmul.u32 2246822507, %v870_v20  ;;  %v901_v48 = vmul.u32 2246822507, %v871_v31  ;;  %v803_v55 = vmul.u32 2654435761, %v773_v41  ;;  %v670_v58 = vadd.s32 %v2217_v32, %v2535_v27  ;;  %v527_v20 = vpop.permute.xlu0 %526 }
  0xbe   : > { %v1041_v45 = vshrl.u32 %v1011_v33, 16  ;;  %v1042_v50 = vshrl.u32 %v1012_v39, 16  ;;  %v2904_v3 = vmul.f32 1.109375, %v1170_v28  ;;  %v2906_v5 = vmul.f32 1.109375, %v1171_v52 }
  0xbf   : > { %v930_v60 = vshrl.u32 %v900_v46, 13  ;;  %v931_v63 = vshrl.u32 %v901_v48, 13  ;;  %v833_v11 = vadd.s32 1540483477, %v803_v55  ;;  %v680_v1 = vmul.u32 16, %v670_v58 }
  0xc0   : > { %v1071_v9 = vxor.u32 %v1041_v45, %v1011_v33  ;;  %v1072_v10 = vxor.u32 %v1042_v50, %v1012_v39  ;;  %v1365_v13 = vunpack.c.l.b16 %v2901_v40  ;;  %v2909_v15 = vxor.u32 %v935_v36, %v905_v18 }
  0xc1   : > { %v960_v49 = vxor.u32 %v930_v60, %v900_v46  ;;  %v961_v22 = vxor.u32 %v931_v63, %v901_v48  ;;  %v863_v26 = vshrl.u32 %v833_v11, 15  ;;  %v627_v43 = vsel %vm556_vm0, %v433_v34, %v551_v6 }
  0xc2   : > { %v2252_v23 = vxor.u32 2147483648, %v1071_v9  ;;  %v2253_v14 = vxor.u32 2147483648, %v1072_v10  ;;  %v696_v28 = vadd.s32 %v2543_v35, %v680_v1  ;;  %v697_v29 = vadd.s32 %v2548_v38, %v680_v1 }
  0xc3   : > { %v990_v59 = vmul.u32 3266489909, %v960_v49  ;;  %v991_v2 = vmul.u32 3266489909, %v961_v22  ;;  %v1230_v18 = vpack.c.bf16 %v2904_v3, %v2904_v3  ;;  %v893_v31 = vxor.u32 %v863_v26, %v833_v11 }
  0xc4   : > { %vm1151_vm3 = vcmp.ge.s32.totalorder %v2252_v23, 2576980378  ;;  %vm1154_vm4 = vcmp.ge.s32.totalorder %v2253_v14, 2576980378  ;;  %v726_v33 = vmul.u32 8, %v696_v28  ;;  %v727_v39 = vmul.u32 8, %v697_v29 }
  0xc5   : > { %vm1281_vm5 = vmpackc.low %vm1151_vm3, %vm1151_vm3  ;;  %v1020_v52 = vshrl.u32 %v990_v59, 16  ;;  %v1021_v32 = vshrl.u32 %v991_v2, 16  ;;  %v995_v41 = vmul.u32 3266489909, %v2909_v15  ;;  %v923_v40 = vmul.u32 2246822507, %v893_v31 }
  0xc6   : > { %vm1282_vm6 = vmpackc.low %vm1154_vm4, %vm1154_vm4  ;;  %v1311_v36 = vsel %vm1281_vm5, %v1251_v53, 0  ;;  %v1193_v46 = vunpack.c.l.bf16 %v627_v43  ;;  %v756_v60 = vadd.s32 %v726_v33, %v2560_v47  ;;  %v757_v63 = vadd.s32 %v727_v39, %v2560_v47  ;;  %v2287_v43 = vld [vmem:[%s2601_s14 + $0x24] sm:$0xff]  ;;  %v307_v39 = vld [vmem:[%s2601_s14 + $0x2c] sm:$0x1] }
  0xc7   : > { %v1312_v48 = vsel %vm1282_vm6, %v1252_v57, 0  ;;  %v1537_v34 = vunpack.c.l.b16 %v1311_v36  ;;  %v1050_v45 = vxor.u32 %v1020_v52, %v990_v59  ;;  %v1051_v50 = vxor.u32 %v1021_v32, %v991_v2 }
  0xc8   : > { %v1538_v55 = vunpack.c.l.b16 %v1312_v48  ;;  %v953_v58 = vshrl.u32 %v923_v40, 13  ;;  %v1231_v53 = vpack.c.bf16 %v2906_v5, %v2906_v5  ;;  %v698_v6 = vadd.s32 %v2572_v7, %v680_v1 }
  0xc9   : > { %v2231_v3 = vxor.u32 2147483648, %v1050_v45  ;;  %v2232_v21 = vxor.u32 2147483648, %v1051_v50  ;;  %v786_v57 = vmul.u32 2654435761, %v756_v60  ;;  %v787_v10 = vmul.u32 2654435761, %v757_v63 }
  0xca   : > { %v2928_v9 = vpack.c.b16 %v1538_v55, %v1537_v34  ;;  %v983_v44 = vxor.u32 %v953_v58, %v923_v40  ;;  %v1025_v11 = vshrl.u32 %v995_v41, 16  ;;  %v1223_v15 = vmul.f32 1.109375, %v1193_v46 }
  0xcb   : > { %vm1088_vm7 = vcmp.ge.s32.totalorder %v2231_v3, 2576980378  ;;  %vm1091_vm8 = vcmp.ge.s32.totalorder %v2232_v21, 2576980378  ;;  %v2932_v49 = vsel %vm556_vm0, %v2886_v4, %v527_v20  ;;  %v816_v5 = vadd.s32 1540483477, %v786_v57  ;;  %v529_v20 = vpop.permute.xlu0 %528 }
  0xcc   : > { %vm1260_vm9 = vmpackc.low %vm1088_vm7, %vm1088_vm7  ;;  %v1013_v22 = vmul.u32 3266489909, %v983_v44  ;;  %1623 = vrot.lane.b32.xlu1 %v2928_v9, %s2418_s16  ;;  %v817_v1 = vadd.s32 1540483477, %v787_v10  ;;  %v1338_v23 = vunpack.c.l.b16 %v2881_v56  ;;  %v2937_v14 = vpack.c.b16 %v1365_v13, %v1365_v13 }
  0xcd   : > { %vm1261_vm10 = vmpackc.low %vm1091_vm8, %vm1091_vm8  ;;  %v1290_v26 = vsel %vm1260_vm9, %v1230_v18, 0  ;;  %v728_v59 = vmul.u32 8, %v698_v6  ;;  %v846_v29 = vshrl.u32 %v816_v5, 15  ;;  %v1055_v31 = vxor.u32 %v1025_v11, %v995_v41 }
  0xce   : > { %v1291_v2 = vsel %vm1261_vm10, %v1231_v53, 0  ;;  %v1335_v28 = vunpack.c.l.b16 %v1290_v26  ;;  %v1043_v4 = vshrl.u32 %v1013_v22, 16  ;;  %v847_v32 = vshrl.u32 %v817_v1, 15 }
  0xcf   : > { %v1336_v52 = vunpack.c.l.b16 %v1291_v2  ;;  %v758_v33 = vadd.s32 %v728_v59, %v2560_v47  ;;  %v1253_v40 = vpack.c.bf16 %v1223_v15, %v1223_v15  ;;  %v876_v56 = vxor.u32 %v846_v29, %v816_v5 }
  0xd0   : > { %v1073_v36 = vxor.u32 %v1043_v4, %v1013_v22  ;;  %v1495_v13 = vrot.slane %v2843_v12, 1  ;;  %v877_v18 = vxor.u32 %v847_v32, %v817_v1  ;;  %v583_v48 = vsel %vm556_vm0, %v2287_v43, %v529_v20  ;;  %v531_v43 = vpop.permute.xlu2 %530 }
  0xd1   : > { %v2943_v46 = vpack.c.b16 %v1336_v52, %v1335_v28  ;;  %v788_v34 = vmul.u32 2654435761, %v758_v33  ;;  %v906_v50 = vmul.u32 2246822507, %v876_v56  ;;  %v397_v55 = vunpack.c.l.b16 %v307_v39 }
  0xd2   : > { %v2254_v45 = vxor.u32 2147483648, %v1073_v36  ;;  %v1496_v41 = vrot.slane %v2937_v14, 1  ;;  %v907_v58 = vmul.u32 2246822507, %v877_v18  ;;  %vm1494_vm11 = vcmask 1046528  }
  0xd3   : > { %v818_v60 = vadd.s32 1540483477, %v788_v34  ;;  %v692_v63 = vadd.s32 %v2572_v7, %v2849_v17  ;;  %v936_v3 = vshrl.u32 %v906_v50, 13  ;;  %v1176_v21 = vunpack.c.l.bf16 %v583_v48 }
  0xd4   : > { %vm1157_vm12 = vcmp.ge.s32.totalorder %v2254_v45, 2576980378  ;;  %v1497_v53 = vsel %vm1494_vm11, %v1495_v13, %v1496_v41  ;;  %1540 = vrot.lane.b32.xlu1 %v2943_v46, %s2417_s15  ;;  %v1175_v6 = vunpack.c.l.bf16 %v2932_v49  ;;  %v937_v44 = vshrl.u32 %v907_v58, 13 }
  0xd5   : > { %vm1283_vm13 = vmpackc.low %vm1157_vm12, %vm1157_vm12  ;;  %v848_v57 = vshrl.u32 %v818_v60, 15  ;;  %1519 = vrot.lane.b32.xlu0 %v1497_v53, %s2419_s17  ;;  %v722_v10 = vmul.u32 8, %v692_v63  ;;  %v966_v15 = vxor.u32 %v936_v3, %v906_v50  ;;  %v1177_v17 = vunpack.c.h.bf16 %v583_v48 }
  0xd6   : > { %v1313_v11 = vsel %vm1283_vm13, %v1253_v40, 0  ;;  %v423_v22 = vpack.c.b16 %v397_v55, %v397_v55  ;;  %v967_v1 = vxor.u32 %v937_v44, %v907_v58  ;;  %v2957_v49 = vpack.c.b16 %v1338_v23, %v1337_v61 }
  0xd7   : > { %v1557_v5 = vunpack.c.l.b16 %v1313_v11  ;;  %v878_v26 = vxor.u32 %v848_v57, %v818_v60  ;;  %v752_v59 = vadd.s32 %v722_v10, %v2560_v47  ;;  %v2236_v2 = vxor.u32 2147483648, %v1055_v31 }
  0xd8   : > { %v996_v28 = vmul.u32 3266489909, %v966_v15  ;;  %v1206_v4 = vmul.f32 1.109375, %v1176_v21  ;;  %v997_v20 = vmul.u32 3266489909, %v967_v1  ;;  %v1207_v39 = vmul.f32 1.109375, %v1177_v17 }
  0xd9   : > { %v2959_v29 = vpack.c.b16 %v1557_v5, %v1557_v5  ;;  %v908_v52 = vmul.u32 2246822507, %v878_v26  ;;  %v782_v32 = vmul.u32 2654435761, %v752_v59  ;;  %v587_v36 = vsel %vm556_vm0, %v423_v22, %v531_v43 }
  0xda   : > { %v1026_v33 = vshrl.u32 %v996_v28, 16  ;;  %v1587_v40 = vrot.slane %v2928_v9, 1  ;;  %v1027_v56 = vshrl.u32 %v997_v20, 16  ;;  %v619_v61 = vsel %vm556_vm0, %v2784_v51, %v2791_v42 }
  0xdb   : > { %v938_v13 = vshrl.u32 %v908_v52, 13  ;;  %v812_v18 = vadd.s32 1540483477, %v782_v32  ;;  %v1588_v37 = vrot.slane %v2959_v29, 1  ;;  %vm2967_vm14 = vcmp.ge.s32.totalorder %v2236_v2, 2576980378 }
  0xdc   : > { %v1205_v31 = vmul.f32 1.109375, %v1175_v6  ;;  %v1056_v48 = vxor.u32 %v1026_v33, %v996_v28  ;;  %1611 = vrot.lane.b32.xlu1 %v2957_v49, %s2418_s16  ;;  %v1057_v34 = vxor.u32 %v1027_v56, %v997_v20  ;;  %v1178_v50 = vunpack.c.l.bf16 %v587_v36  ;;  %vm1265_vm15 = vmpackc.low %vm2967_vm14, %vm2967_vm14 }
  0xdd   : > { %v968_v45 = vxor.u32 %v938_v13, %v908_v52  ;;  %v2974_v55 = vsel %vm1494_vm11, %v1587_v40, %v1588_v37  ;;  %v1370_v41 = vunpack.c.l.b16 %v2839_v0  ;;  %v1236_v60 = vpack.c.bf16 %v1206_v4, %v1206_v4 }
  0xde   : > { %v2237_v58 = vxor.u32 2147483648, %v1056_v48  ;;  %v842_v51 = vshrl.u32 %v812_v18, 15  ;;  %1673 = vrot.lane.b32.xlu0 %v2974_v55, %s2420_s18  ;;  %v2238_v42 = vxor.u32 2147483648, %v1057_v34  ;;  %v1237_v63 = vpack.c.bf16 %v1207_v39, %v1207_v39  ;;  %v301_v34 = vld [vmem:[%s2601_s14 + $0x14] sm:$0x1] }
  0xdf   : > { %v998_v3 = vmul.u32 3266489909, %v968_v45  ;;  %v1508_v21 = vrot.slane %v2819_v25, 1  ;;  %v1190_v53 = vunpack.c.l.bf16 %v619_v61  ;;  %v1235_v6 = vpack.c.bf16 %v1205_v31, %v1205_v31 }
  0xe0   : > { %vm1106_vm1 = vcmp.ge.s32.totalorder %v2237_v58, 2576980378  ;;  %vm1109_vm2 = vcmp.ge.s32.totalorder %v2238_v42, 2576980378  ;;  %v1208_v44 = vmul.f32 1.109375, %v1178_v50  ;;  %v1507_v57 = vrot.slane %v2807_v8, 1 }
  0xe1   : > { %vm1266_vm3 = vmpackc.low %vm1106_vm1, %vm1106_vm1  ;;  %v1028_v0 = vshrl.u32 %v998_v3, 16  ;;  %v2984_v10 = vpack.c.b16 %v1370_v41, %v1370_v41  ;;  %v2251_v11 = vxor.u32 2147483648, %v2823_v19  ;;  %v872_v17 = vxor.u32 %v842_v51, %v812_v18 }
  0xe2   : > { %vm1267_vm4 = vmpackc.low %vm1109_vm2, %vm1109_vm2  ;;  %v1296_v15 = vsel %vm1266_vm3, %v1236_v60, 0  ;;  %v2988_v26 = vsel %vm1494_vm11, %v1507_v57, %v1508_v21  ;;  %v1220_v43 = vmul.f32 1.109375, %v1190_v53  ;;  %v1295_v59 = vsel %vm1265_vm15, %v1235_v6, 0 }
  0xe3   : > { %v1297_v22 = vsel %vm1267_vm4, %v1237_v63, 0  ;;  %v1339_v5 = vunpack.c.l.b16 %v1296_v15  ;;  %v1058_v1 = vxor.u32 %v1028_v0, %v998_v3  ;;  %v1238_v28 = vpack.c.bf16 %v1208_v44, %v1208_v44  ;;  %v523_v0 = vpop.permute.xlu1 %522 }
  0xe4   : > { %v1340_v2 = vunpack.c.l.b16 %v1297_v22  ;;  %1527 = vrot.lane.b32.xlu1 %v2988_v26, %s2419_s17  ;;  %vm2997_vm5 = vcmp.ge.s32.totalorder %v2251_v11, 2576980378  ;;  %v902_v52 = vmul.u32 2246822507, %v872_v17  ;;  %v1367_v32 = vunpack.c.l.b16 %v1295_v59 }
  0xe5   : > { %v2239_v19 = vxor.u32 2147483648, %v1058_v1  ;;  %v1511_v33 = vrot.slane %v2984_v10, 1  ;;  %v1250_v39 = vpack.c.bf16 %v1220_v43, %v1220_v43  ;;  %vm1280_vm8 = vmpackc.low %vm2997_vm5, %vm2997_vm5  ;;  %v1510_v40 = vrot.slane %v2646_v30, 1 }
  0xe6   : > { %v3001_v20 = vpack.c.b16 %v1340_v2, %v1339_v5  ;;  %v932_v13 = vshrl.u32 %v902_v52, 13  ;;  %v3010_v18 = vpack.c.b16 %v1367_v32, %v1367_v32  ;;  %v391_v60 = vunpack.c.l.b16 %v301_v34 }
  0xe7   : > { %vm1112_vm6 = vcmp.ge.s32.totalorder %v2239_v19, 2576980378  ;;  %v3013_v37 = vsel %vm1494_vm11, %v1510_v40, %v1511_v33  ;;  %v1310_v61 = vsel %vm1280_vm8, %v1250_v39, 0  ;;  %v1501_v51 = vrot.slane %v2957_v49, 1 }
  0xe8   : > { %vm1268_vm7 = vmpackc.low %vm1112_vm6, %vm1112_vm6  ;;  %1544 = vrot.lane.b32.xlu2 %v3001_v20, %s2417_s15  ;;  %v1504_v31 = vrot.slane %v3001_v20, 1  ;;  %v962_v48 = vxor.u32 %v932_v13, %v902_v52  ;;  %v1372_v50 = vunpack.c.l.b16 %v1310_v61  ;;  %v1502_v41 = vrot.slane %v3010_v18, 1 }
  0xe9   : > { %v1298_v36 = vsel %vm1268_vm7, %v1238_v28, 0  ;;  %v1371_v63 = vunpack.c.l.b16 %v2764_v62  ;;  %v419_v53 = vpack.c.b16 %v391_v60, %v391_v60  ;;  %v1457_v57 = vshll.u32 %v2762_v54, 16 }
  0xea   : > { %v1368_v56 = vunpack.c.l.b16 %v1298_v36  ;;  %v992_v42 = vmul.u32 3266489909, %v962_v48  ;;  %v1380_v3 = vpack.c.b16 %v1372_v50, %v1372_v50  ;;  %v3030_v21 = vsel %vm1494_vm11, %v1501_v51, %v1502_v41 }
  0xeb   : > { %v1379_v44 = vpack.c.b16 %v1371_v63, %v1371_v63  ;;  %v571_v15 = vsel %vm556_vm0, %v419_v53, %v523_v0  ;;  %v1516_v62 = vrot.slane %v2688_v24, 1  ;;  %v1459_v5 = vrot.slane %v1457_v57, 1 }
  0xec   : > { %v1376_v23 = vpack.c.b16 %v1368_v56, %v1368_v56  ;;  %1598 = vrot.lane.b32.xlu1 %v3013_v37, %s2421_s19  ;;  %v1022_v6 = vshrl.u32 %v992_v42, 16  ;;  %v1517_v11 = vrot.slane %v1380_v3, 1  ;;  %v1172_v59 = vunpack.c.l.bf16 %v571_v15 }
  0xed   : > { %v1514_v22 = vrot.slane %v1379_v44, 1  ;;  %v1462_v1 = vshll.u32 %v1379_v44, 16  ;;  %v1513_v2 = vrot.slane %v2762_v54, 1  ;;  %v1455_v19 = vshrl.u32 %v2762_v54, 16 }
  0xee   : > { %v1505_v45 = vrot.slane %v1376_v23, 1  ;;  %v1052_v17 = vxor.u32 %v1022_v6, %v992_v42  ;;  %v3042_v43 = vsel %vm1494_vm11, %v1516_v62, %v1517_v11  ;;  %v1421_v33 = vshll.u32 %v3001_v20, 16 }
  0xef   : > { %v3049_v4 = vsel %vm1494_vm11, %v1513_v2, %v1514_v22  ;;  %v1460_v52 = vor.u32 %v1459_v5, %v1455_v19  ;;  %v1464_v32 = vrot.slane %v1462_v1, 1  ;;  %v1202_v39 = vmul.f32 1.109375, %v1172_v59 }
  0xf0   : > { %v3021_v58 = vsel %vm1494_vm11, %v1504_v31, %v1505_v45  ;;  %1615 = vrot.lane.b32.xlu2 %v2807_v8, %s2418_s16  ;;  %v2233_v28 = vxor.u32 2147483648, %v1052_v17  ;;  %vm1381_vm10 = vsmask.f32 7424  ;;  %v1423_v40 = vrot.slane %v1421_v33, 1 }
  0xf1   : > { %1594 = vrot.lane.b32.xlu0 %v3021_v58, %s2421_s19  ;;  %v3057_v36 = vsel %vm1381_vm10, %v1460_v52, %v1464_v32  ;;  %v1426_v56 = vshll.u32 %v1376_v23, 16  ;;  %v1232_v13 = vpack.c.bf16 %v1202_v39, %v1202_v39  ;;  %v1419_v61 = vshrl.u32 %v3001_v20, 16 }
  0xf2   : > { %vm1094_vm9 = vcmp.ge.s32.totalorder %v2233_v28, 2576980378  ;;  %v1469_v31 = vshll.u32 %v2688_v24, 16  ;;  %v1433_v45 = vshll.u32 %v2807_v8, 16  ;;  %v1474_v41 = vshll.u32 %v1380_v3, 16 }
  0xf3   : > { %vm1262_vm12 = vmpackc.low %vm1094_vm9, %vm1094_vm9  ;;  %v1424_v48 = vor.u32 %v1423_v40, %v1419_v61  ;;  %v1428_v34 = vrot.slane %v1426_v56, 1  ;;  %v652_v23 = vadd.s32 9, %v2525_v16  ;;  %v1467_v60 = vshrl.u32 %v2688_v24, 16 }
  0xf4   : > { %1523 = vrot.lane.b32.xlu1 %v3030_v21, %s2419_s17  ;;  %v1292_v50 = vsel %vm1262_vm12, %v1232_v13, 0  ;;  %v1471_v51 = vrot.slane %v1469_v31, 1  ;;  %v1438_v42 = vshll.u32 %v2819_v25, 16  ;;  %v1435_v6 = vrot.slane %v1433_v45, 1 }
  0xf5   : > { %v1366_v63 = vunpack.c.l.b16 %v1292_v50  ;;  %v3072_v53 = vsel %vm1381_vm10, %v1424_v48, %v1428_v34  ;;  %v2223_v0 = vadd.s32 4294967295, %v652_v23  ;;  %v1476_v44 = vrot.slane %v1474_v41, 1 }
  0xf6   : > { %v1431_v3 = vshrl.u32 %v2807_v8, 16  ;;  %v1472_v57 = vor.u32 %v1471_v51, %v1467_v60  ;;  %v1409_v11 = vshll.u32 %v2957_v49, 16  ;;  %v1440_v62 = vrot.slane %v1438_v42, 1 }
  0xf7   : > { %v676_v16 = vadd.s32 %v2223_v0, %v2535_v27  ;;  %v1374_v15 = vpack.c.b16 %v1366_v63, %v1366_v63  ;;  %v1414_v5 = vshll.u32 %v3010_v18, 16  ;;  %v1445_v59 = vshll.u32 %v2646_v30, 16 }
  0xf8   : > { %1550 = vrot.lane.b32.xlu2 %v2762_v54, %s2417_s15  ;;  %v1436_v25 = vor.u32 %v1435_v6, %v1431_v3  ;;  %v3080_v22 = vsel %vm1381_vm10, %v1472_v57, %v1476_v44  ;;  %v1411_v2 = vrot.slane %v1409_v11, 1  ;;  %v1450_v19 = vshll.u32 %v2984_v10, 16  ;;  %v2293_v3 = vld [vmem:[%s2601_s14 + $0x6c] sm:$0xff] }
  0xf9   : > { %1665 = vrot.lane.b32.xlu0 %v2988_v26, %s2420_s18  ;;  %v686_v17 = vmul.u32 16, %v676_v16  ;;  %v1499_v28 = vrot.slane %v1374_v15, 1  ;;  %v1407_v18 = vshrl.u32 %v2957_v49, 16  ;;  %v1416_v39 = vrot.slane %v1414_v5, 1  ;;  %v325_v5 = vld [vmem:[%s2601_s14 + $0x74] sm:$0x1] }
  0xfa   : > { %v3092_v52 = vsel %vm1381_vm10, %v1436_v25, %v1440_v62  ;;  %v1498_v40 = vrot.slane %v2943_v46, 1  ;;  %v1443_v10 = vshrl.u32 %v2646_v30, 16  ;;  %v1447_v56 = vrot.slane %v1445_v59, 1 }
  0xfb   : > { %v714_v27 = vadd.s32 %v2543_v35, %v686_v17  ;;  %v715_v1 = vadd.s32 %v2548_v38, %v686_v17  ;;  %v1412_v13 = vor.u32 %v1411_v2, %v1407_v18  ;;  %v1397_v61 = vshll.u32 %v2943_v46, 16 }
  0xfc   : > { %1533 = vrot.lane.b32.xlu1 %v3042_v43, %s2419_s17  ;;  %v3103_v31 = vsel %vm1494_vm11, %v1498_v40, %v1499_v28  ;;  %v1452_v45 = vrot.slane %v1450_v19, 1  ;;  %v1402_v41 = vshll.u32 %v1374_v15, 16  ;;  %v1448_v51 = vor.u32 %v1447_v56, %v1443_v10 }
  0xfd   : > { %v744_v32 = vmul.u32 8, %v714_v27  ;;  %v745_v33 = vmul.u32 8, %v715_v1  ;;  %v3106_v50 = vsel %vm1381_vm10, %v1412_v13, %v1416_v39  ;;  %v716_v42 = vadd.s32 %v2572_v7, %v686_v17  ;;  %v553_v17 = vpop.permute.xlu0 %552 }
  0xfe   : > { %v1395_v63 = vshrl.u32 %v2943_v46, 16  ;;  %v1399_v6 = vrot.slane %v1397_v61, 1  ;;  %v3116_v16 = vsel %vm1381_vm10, %v1448_v51, %v1452_v45  ;;  %v1404_v11 = vrot.slane %v1402_v41, 1 }
  0xff   : > { %v774_v35 = vadd.s32 %v744_v32, %v2560_v47  ;;  %v775_v38 = vadd.s32 %v745_v33, %v2560_v47  ;;  %v746_v57 = vmul.u32 8, %v716_v42  ;;  %v631_v59 = vsel %vm556_vm0, %v2293_v3, %v553_v17 }
 0x100   : > { %1531 = vrot.lane.b32.xlu2 %v3049_v4, %s2419_s17  ;;  %v1400_v7 = vor.u32 %v1399_v6, %v1395_v63  ;;  %v415_v28 = vunpack.c.l.b16 %v325_v5  ;;  %v1390_v5 = vshll.u32 %v2937_v14, 16  ;;  %vm1866_vm3 = vcmask 1043456  }
 0x101   : > { %1529 = vrot.lane.b32.xlu0 %v3013_v37, %s2419_s17  ;;  %v804_v48 = vmul.u32 2654435761, %v774_v35  ;;  %v805_v34 = vmul.u32 2654435761, %v775_v38  ;;  %v776_v62 = vadd.s32 %v746_v57, %v2560_v47  ;;  %v1194_v47 = vunpack.c.l.bf16 %v631_v59 }
 0x102   : > { %v1405_v19 = vsel %vm1381_vm10, %v1400_v7, %v1404_v11  ;;  %v1195_v38 = vunpack.c.h.bf16 %v631_v59  ;;  %v435_v10 = vpack.c.b16 %v415_v28, %v415_v28  ;;  %vm1694_vm4 = vcmask 130048  }
 0x103   : > { %v834_v23 = vadd.s32 1540483477, %v804_v48  ;;  %v835_v60 = vadd.s32 1540483477, %v805_v34  ;;  %v806_v2 = vmul.u32 2654435761, %v776_v62  ;;  %v555_v48 = vpop.permute.xlu1 %554 }
 0x104   : > { %1650 = vrot.lane.b32.xlu1 %v3057_v36, %s2422_s27  ;;  %v1224_v34 = vmul.f32 1.109375, %v1194_v47  ;;  %v635_v51 = vsel %vm556_vm0, %v435_v10, %v555_v48  ;;  %v1383_v62 = vshrl.u32 %v2843_v12, 16  ;;  %vm1711_vm5 = vcmask 195584  }
 0x105   : > { %v864_v0 = vshrl.u32 %v834_v23, 15  ;;  %v865_v44 = vshrl.u32 %v835_v60, 15  ;;  %v836_v18 = vadd.s32 1540483477, %v806_v2  ;;  %v1196_v11 = vunpack.c.l.bf16 %v635_v51 }
 0x106   : > { %v1254_v6 = vpack.c.bf16 %v1224_v34, %v1224_v34  ;;  %vm1728_vm6 = vcmask 261120   ;;  %vm1745_vm7 = vcmask 326656   ;;  %vm1762_vm8 = vcmask 392192  }
 0x107   : > { %v894_v15 = vxor.u32 %v864_v0, %v834_v23  ;;  %v895_v25 = vxor.u32 %v865_v44, %v835_v60  ;;  %v866_v35 = vshrl.u32 %v836_v18, 15  ;;  %v1225_v60 = vmul.f32 1.109375, %v1195_v38 }
 0x108   : > { %1602 = vrot.lane.b32.xlu2 %v3042_v43, %s2421_s19  ;;  %v1385_v0 = vshll.u32 %v2843_v12, 16  ;;  %vm1779_vm9 = vcmask 457728   ;;  %vm1849_vm12 = vcmask 588800  }
 0x109   : > { %1490 = vrot.lane.b32.xlu0 %v3057_v36, %s2423_s28  ;;  %v924_v27 = vmul.u32 2246822507, %v894_v15  ;;  %v925_v1 = vmul.u32 2246822507, %v895_v25  ;;  %v896_v61 = vxor.u32 %v866_v35, %v836_v18  ;;  %v1255_v15 = vpack.c.bf16 %v1225_v60, %v1225_v60 }
 0x10b   : > { %v954_v32 = vshrl.u32 %v924_v27, 13  ;;  %v955_v33 = vshrl.u32 %v925_v1, 13  ;;  %v926_v23 = vmul.u32 2246822507, %v896_v61  ;;  %v3148_v35 = vpop.permute.xlu1 %1552 }
 0x10c   : > { %1575 = vrot.lane.b32.xlu1 %v3072_v53, %s2424_s29 }
 0x10d   : > { %v984_v39 = vxor.u32 %v954_v32, %v924_v27  ;;  %v985_v40 = vxor.u32 %v955_v33, %v925_v1  ;;  %v956_v63 = vshrl.u32 %v926_v23, 13  ;;  %v1226_v27 = vmul.f32 1.109375, %v1196_v11 }
 0x10e   : > { %v1387_v1 = vrot.slane %v1385_v0, 1  ;;  %v1392_v32 = vrot.slane %v1390_v5, 1 }
 0x10f   : > { %v1014_v56 = vmul.u32 3266489909, %v984_v39  ;;  %v1015_v13 = vmul.u32 3266489909, %v985_v40  ;;  %v986_v57 = vxor.u32 %v956_v63, %v926_v23  ;;  %v1256_v18 = vpack.c.bf16 %v1226_v27, %v1226_v27 }
 0x110   : > { %1669 = vrot.lane.b32.xlu2 %v3049_v4, %s2420_s18  ;;  %v1388_v47 = vor.u32 %v1387_v1, %v1383_v62  ;;  %v1562_v39 = vshll.u32 %v2928_v9, 16  ;;  %v2307_v1 = vld [vmem:[%s3457_s2 + $0x18] sm:$0xff] }
 0x111   : > { %1583 = vrot.lane.b32.xlu0 %v3080_v22, %s2424_s29  ;;  %v1044_v45 = vshrl.u32 %v1014_v56, 16  ;;  %v1045_v41 = vshrl.u32 %v1015_v13, 16  ;;  %v1016_v25 = vmul.u32 3266489909, %v986_v57 }
 0x112   : > { %v1393_v10 = vsel %vm1381_vm10, %v1388_v47, %v1392_v32  ;;  %v1564_v34 = vrot.slane %v1562_v39, 1 }
 0x113   : > { %v1074_v42 = vxor.u32 %v1044_v45, %v1014_v56  ;;  %v1046_v17 = vshrl.u32 %v1016_v25, 16  ;;  %v1567_v56 = vshll.u32 %v2959_v29, 16 }
 0x114   : > { %1646 = vrot.lane.b32.xlu1 %v3092_v52, %s2422_s27 }
 0x115   : > { %v2255_v44 = vxor.u32 2147483648, %v1074_v42 }
 0x117   : > { %vm1160_vm13 = vcmp.ge.s32.totalorder %v2255_v44, 2576980378 }
 0x118   : > { %1590 = vrot.lane.b32.xlu2 %v3103_v31, %s2421_s19  ;;  %vm1284_vm0 = vmpackc.low %vm1160_vm13, %vm1160_vm13  ;;  %vm1991_vm13 = vcmask 27648  }
 0x119   : > { %1482 = vrot.lane.b32.xlu0 %v3106_v50, %s2423_s28  ;;  %v1314_v7 = vsel %vm1284_vm0, %v1254_v6, 0 }
 0x11a   : > { %v1608_v2 = vunpack.c.l.b16 %v1314_v7 }
 0x11c   : > { %1488 = vrot.lane.b32.xlu1 %v3116_v16, %s2423_s28 }
 0x120   : > { %1661 = vrot.lane.b32.xlu2 %v3030_v21, %s2420_s18 }
 0x121   : > { %1571 = vrot.lane.b32.xlu0 %v1405_v19, %s2424_s29 }
 0x124   : > { %1581 = vrot.lane.b32.xlu1 %v3057_v36, %s2424_s29  ;;  %v1075_v36 = vxor.u32 %v1045_v41, %v1015_v13  ;;  %v1569_v41 = vrot.slane %v1567_v56, 1 }
 0x126   : > { %v2256_v3 = vxor.u32 2147483648, %v1075_v36  ;;  %v3162_v36 = vpop.permute.xlu0 %1548 }
 0x128   : > { %1486 = vrot.lane.b32.xlu2 %v3092_v52, %s2423_s28  ;;  %vm1163_vm14 = vcmp.ge.s32.totalorder %v2256_v3, 2576980378 }
 0x129   : > { %1642 = vrot.lane.b32.xlu0 %v3106_v50, %s2422_s27  ;;  %vm1285_vm15 = vmpackc.low %vm1163_vm14, %vm1163_vm14 }
 0x12a   : > { %v1315_v59 = vsel %vm1285_vm15, %v1255_v15, 0 }
 0x12b   : > { %v1609_v28 = vunpack.c.l.b16 %v1315_v59 }
 0x12c   : > { %1604 = vrot.lane.b32.xlu1 %v2974_v55, %s2421_s19  ;;  %v1076_v55 = vxor.u32 %v1046_v17, %v1016_v25  ;;  %v1821_v25 = vld [vmem:[%s3457_s2 + $0x20] sm:$0xf] }
 0x12d   : > { %v3143_v14 = vpack.c.b16 %v1609_v28, %v1608_v2  ;;  %v1839_v5 = vunpack.c.l.b16 %v1821_v25 }
 0x12e   : > { %v2257_v33 = vxor.u32 2147483648, %v1076_v55  ;;  %v3176_v0 = vpop.permute.xlu0 %1619 }
 0x12f   : > { %v1633_v40 = vshll.u32 %v3143_v14, 16  ;;  %v1631_v61 = vshrl.u32 %v3143_v14, 16  ;;  %v1844_v7 = vpack.c.b16 %v1839_v5, %v1839_v5  ;;  %v1658_v55 = vrot.slane %v3143_v14, 1 }
 0x130   : > { %1579 = vrot.lane.b32.xlu2 %v3116_v16, %s2424_s29  ;;  %vm1166_vm1 = vcmp.ge.s32.totalorder %v2257_v33, 2576980378 }
 0x131   : > { %1554 = vrot.lane.b32.xlu0 %v2928_v9, %s2417_s15  ;;  %vm1286_vm2 = vmpackc.low %vm1166_vm1, %vm1166_vm1  ;;  %v1635_v48 = vrot.slane %v1633_v40, 1  ;;  %v1868_v17 = vsel %vm1866_vm3, %v1844_v7, 0 }
 0x132   : > { %v1316_v38 = vsel %vm1286_vm2, %v1256_v18, 0  ;;  %2309 = vmatpush.bf16.msra.mxu2 %v1868_v17  ;;  %2308 = vmatpush.bf16.msra.mxu1 %v1868_v17  ;;  %v2304_v18 = vld [vmem:[%s3457_s2] sm:$0xff] }
 0x133   : > { %v1628_v13 = vunpack.c.l.b16 %v1316_v38  ;;  %v1636_v23 = vor.u32 %v1635_v48, %v1631_v61  ;;  %1873 = vmatpush.bf16.msra.mxu0 %v1868_v17  ;;  %2310 = vmatpush.bf16.msra.mxu3 %v1868_v17 }
 0x134   : > { %1480 = vrot.lane.b32.xlu1 %v1405_v19, %s2423_s28  ;;  %v1560_v19 = vshrl.u32 %v2928_v9, 16 }
 0x135   : > { %v3157_v45 = vpack.c.b16 %v1628_v13, %v1628_v13 }
 0x136   : > { %v1565_v51 = vor.u32 %v1564_v34, %v1560_v19  ;;  %2312 = vmatpush.bf16.msra.mxu2 %v2307_v1  ;;  %2311 = vmatpush.bf16.msra.mxu1 %v2307_v1 }
 0x137   : > { %v1638_v60 = vshll.u32 %v3157_v45, 16  ;;  %1874 = vmatpush.bf16.msra.mxu0 %v2307_v1  ;;  %2313 = vmatpush.bf16.msra.mxu3 %v2307_v1  ;;  %v1659_v32 = vrot.slane %v3157_v45, 1 }
 0x138   : > { %1478 = vrot.lane.b32.xlu2 %v1393_v10, %s2423_s28  ;;  %v1570_v63 = vsel %vm1381_vm10, %v1565_v51, %v1569_v41 }
 0x139   : > { %1600 = vrot.lane.b32.xlu0 %v3049_v4, %s2421_s19  ;;  %v1640_v29 = vrot.slane %v1638_v60, 1 }
 0x13b   : > { %v1641_v4 = vsel %vm1381_vm10, %v1636_v23, %v1640_v29  ;;  %vm1796_vm10 = vcmask 523264  }
 0x13c   : > { %1656 = vrot.lane.b32.xlu1 %v1641_v4, %s2422_s27 }
 0x13e   : > { %v3160_v42 = vpop.permute.xlu1 %1623 }
 0x140   : > { %1654 = vrot.lane.b32.xlu2 %v1570_v63, %s2422_s27 }
 0x141   : > { %1625 = vrot.lane.b32.xlu0 %v3143_v14, %s2418_s16 }
 0x142   : > { %v3170_v9 = vpop.permute.xlu2 %1544 }
 0x144   : > { %1671 = vrot.lane.b32.xlu1 %v3042_v43, %s2420_s18 }
 0x146   : > { %v3172_v6 = vpop.permute.xlu1 %1540 }
 0x147   : > { %v3189_v57 = vpop.permute.xlu0 %1519 }
 0x148   : > { %1492 = vrot.lane.b32.xlu2 %v3080_v22, %s2423_s28 }
 0x149   : > { %1652 = vrot.lane.b32.xlu0 %v3080_v22, %s2422_s27 }
 0x14a   : > { %v3182_v44 = vpop.permute.xlu2 %1615 }
 0x14c   : > { %1546 = vrot.lane.b32.xlu1 %v2807_v8, %s2417_s15 }
 0x14e   : > { %v3184_v3 = vpop.permute.xlu1 %1611 }
 0x150   : > { %1585 = vrot.lane.b32.xlu2 %v1570_v63, %s2424_s29  ;;  %v3201_v43 = vpop.permute.xlu0 %1673 }
 0x151   : > { %1525 = vrot.lane.b32.xlu0 %v3021_v58, %s2419_s17 }
 0x152   : > { %v3193_v11 = vpop.permute.xlu2 %1550 }
 0x154   : > { %1592 = vrot.lane.b32.xlu1 %v3030_v21, %s2421_s19 }
 0x156   : > { %v3195_v22 = vpop.permute.xlu1 %1527 }
 0x158   : > { %1621 = vrot.lane.b32.xlu2 %v2688_v24, %s2418_s16 }
 0x159   : > { %1542 = vrot.lane.b32.xlu0 %v2957_v49, %s2417_s15  ;;  %s2131_s15 = sshll.u32 %s2495_s26, 4 }
 0x15a   : > { %v1532_v15 = vpop.permute.xlu2 %1531 }
 0x15c   : > { %1617 = vrot.lane.b32.xlu1 %v2646_v30, %s2418_s16 }
 0x15e   : > { %v3208_v62 = vpop.permute.xlu1 %1598 }
 0x160   : > { %1484 = vrot.lane.b32.xlu2 %v3072_v53, %s2423_s28 }
 0x161   : > { %1577 = vrot.lane.b32.xlu0 %v3092_v52, %s2424_s29  ;;  %v2306_v52 = vld [vmem:[%s3457_s2 + $0x10] sm:$0xff] }
 0x162   : > { %v1603_v21 = vpop.permute.xlu2 %1602  ;;  %2315 = vmatpush.bf16.msra.mxu2 %v2306_v52  ;;  %2314 = vmatpush.bf16.msra.mxu1 %v2306_v52 }
 0x163   : > { %v3216_v27 = vpop.permute.xlu0 %1594  ;;  %1875 = vmatpush.bf16.msra.mxu0 %v2306_v52  ;;  %2316 = vmatpush.bf16.msra.mxu3 %v2306_v52 }
 0x164   : > { %1663 = vrot.lane.b32.xlu1 %v3021_v58, %s2420_s18  ;;  %v1660_v58 = vsel %vm1494_vm11, %v1658_v55, %v1659_v32  ;;  %vm1677_vm11 = vcmask 64512  }
 0x166   : > { %v3221_v59 = vpop.permute.xlu1 %1523 }
 0x168   : > { %1521 = vrot.lane.b32.xlu2 %v3103_v31, %s2419_s17  ;;  %v2305_v31 = vld [vmem:[%s3457_s2 + $0x8] sm:$0xff] }
 0x169   : > { %1613 = vrot.lane.b32.xlu0 %v3001_v20, %s2418_s16  ;;  %2318 = vmatpush.bf16.msra.mxu2 %v2305_v31  ;;  %s2132_s16 = sshll.u32 %s2492_s25, 5 }
 0x16a   : > { %v3232_v2 = vpop.permute.xlu2 %1669  ;;  %2317 = vmatpush.bf16.msra.mxu1 %v2305_v31  ;;  %1876 = vmatpush.bf16.msra.mxu0 %v2305_v31  ;;  %s292_s28 = sadd.s32 %s2132_s16, %s2131_s15 }
 0x16b   : > { %v3234_v28 = vpop.permute.xlu0 %1665  ;;  %2319 = vmatpush.bf16.msra.mxu3 %v2305_v31  ;;  %s2133_s25 = sshll.u32 %s292_s28, 2 }
 0x16c   : > { %s3378_s30 = scalar_lea.vmem %s3460_s5, %s2133_s25 }
 0x16d   : > { %2321 = vmatpush.bf16.msra.mxu2 %v2304_v18 }
 0x16e   : > { %v3241_v33 = vpop.permute.xlu1 %1533  ;;  %2320 = vmatpush.bf16.msra.mxu1 %v2304_v18  ;;  %1877 = vmatpush.bf16.msra.mxu0 %v2304_v18 }
 0x16f   : > { %2322 = vmatpush.bf16.msra.mxu3 %v2304_v18 }
 0x170   : > { %1675 = vrot.lane.b32.xlu2 %v1660_v58, %s2420_s18 }
 0x171   : > { %1648 = vrot.lane.b32.xlu0 %v3116_v16, %s2422_s27 }
 0x172   : > { %v3250_v47 = vpop.permute.xlu2 %1590 }
 0x173   : > { %v1530_v14 = vpop.permute.xlu0 %1529 }
 0x176   : > { %v1651_v39 = vpop.permute.xlu1 %1650 }
 0x178   : > { %1573 = vrot.lane.b32.xlu2 %v3106_v50, %s2424_s29 }
 0x17a   : > { %v1662_v40 = vpop.permute.xlu2 %1661 }
 0x17b   : > { %v1491_v38 = vpop.permute.xlu0 %1490 }
 0x17c   : > { %v1691_v10 = vsel %vm1677_vm11, %v2762_v54, %v1491_v38 }
 0x17d   : > { %v1708_v56 = vsel %vm1694_vm4, %v1691_v10, %v1532_v15 }
 0x17e   : > { %v1576_v16 = vpop.permute.xlu1 %1575  ;;  %v1725_v50 = vsel %vm1711_vm5, %v1708_v56, %v3148_v35 }
 0x180   : > { %1596 = vrot.lane.b32.xlu2 %v2988_v26, %s2421_s19 }
 0x182   : > { %v1487_v13 = vpop.permute.xlu2 %1486 }
 0x183   : > { %v1584_v61 = vpop.permute.xlu0 %1583  ;;  %v1687_v54 = vsel %vm1677_vm11, %v2807_v8, %v1487_v13 }
 0x184   : > { %v1742_v48 = vsel %vm1728_vm6, %v1725_v50, %v1584_v61  ;;  %v1704_v26 = vsel %vm1694_vm4, %v1687_v54, %v3195_v22 }
 0x185   : > { %v1759_v19 = vsel %vm1745_vm7, %v1742_v48, %v1603_v21  ;;  %v1721_v35 = vsel %vm1711_vm5, %v1704_v26, %v3162_v36 }
 0x186   : > { %v1647_v34 = vpop.permute.xlu1 %1646  ;;  %v1776_v45 = vsel %vm1762_vm8, %v1759_v19, %v3160_v42 }
 0x188   : > { %1644 = vrot.lane.b32.xlu2 %v3072_v53, %s2422_s27 }
 0x18a   : > { %v1580_v41 = vpop.permute.xlu2 %1579 }
 0x18b   : > { %v1483_v23 = vpop.permute.xlu0 %1482  ;;  %v1738_v60 = vsel %vm1728_vm6, %v1721_v35, %v1580_v41 }
 0x18c   : > { %v1683_v8 = vsel %vm1677_vm11, %v2957_v49, %v1483_v23  ;;  %v1755_v51 = vsel %vm1745_vm7, %v1738_v60, %v3208_v62 }
 0x18d   : > { %v1700_v29 = vsel %vm1694_vm4, %v1683_v8, %v3221_v59  ;;  %v1772_v53 = vsel %vm1762_vm8, %v1755_v51, %v3176_v0 }
 0x18e   : > { %v1717_v42 = vsel %vm1711_vm5, %v1700_v29, %v3170_v9  ;;  %v1789_v36 = vsel %vm1779_vm9, %v1772_v53, %v1651_v39  ;;  %v1489_v63 = vpop.permute.xlu1 %1488 }
 0x18f   : > { %v1734_v4 = vsel %vm1728_vm6, %v1717_v42, %v1576_v16  ;;  %v1806_v49 = vsel %vm1796_vm10, %v1789_v36, %v3232_v2  ;;  %v1689_v22 = vsel %vm1677_vm11, %v2646_v30, %v1489_v63 }
 0x190   : > { %v1751_v15 = vsel %vm1745_vm7, %v1734_v4, %v3216_v27  ;;  %2278 = vmatmul.msk.bf16.vlgmr.msra.gmra.mxu2 %vm1849_vm12, %v1806_v49  ;;  %1667 = vrot.lane.b32.xlu2 %v3013_v37, %s2420_s18  ;;  %v1706_v9 = vsel %vm1694_vm4, %v1689_v22, %v1530_v14 }
 0x191   : > { %v1768_v0 = vsel %vm1762_vm8, %v1751_v15, %v3182_v44  ;;  %v1723_v25 = vsel %vm1711_vm5, %v1706_v9, %v3193_v11 }
 0x192   : > { %v1479_v62 = vpop.permute.xlu2 %1478  ;;  %v1785_v5 = vsel %vm1779_vm9, %v1768_v0, %v1647_v34 }
 0x193   : > { %v1572_v30 = vpop.permute.xlu0 %1571  ;;  %v1679_v7 = vsel %vm1677_vm11, %v2843_v12, %v1479_v62  ;;  %v1802_v21 = vsel %vm1796_vm10, %v1785_v5, %v3234_v28 }
 0x194   : > { %v1696_v37 = vsel %vm1694_vm4, %v1679_v7, %v3189_v57  ;;  %2276 = vmatmul.msk.bf16.vlgmr.msra.gmra.mxu1 %vm1849_vm12, %v1802_v21 }
 0x195   : > { %v1713_v44 = vsel %vm1711_vm5, %v1696_v37, %v3172_v6 }
 0x196   : > { %v1730_v11 = vsel %vm1728_vm6, %v1713_v44, %v1572_v30  ;;  %v1582_v17 = vpop.permute.xlu1 %1581 }
 0x197   : > { %v1747_v27 = vsel %vm1745_vm7, %v1730_v11, %v3250_v47  ;;  %v1740_v39 = vsel %vm1728_vm6, %v1723_v25, %v1582_v17 }
 0x198   : > { %v1764_v12 = vsel %vm1762_vm8, %v1747_v27, %v3184_v3  ;;  %v3364_v27 = vld [vmem:[%s3458_s3] ss:$0 sm:$0xff] }
 0x19a   : > { %v1655_v1 = vpop.permute.xlu2 %1654 }
 0x19b   : > { %v1643_v59 = vpop.permute.xlu0 %1642  ;;  %v1793_v52 = vsel %vm1779_vm9, %v1776_v45, %v1655_v1  ;;  %v3369_v1 = vld [vmem:[%s3459_s4] ss:$0 sm:$0xff] }
 0x19c   : > { %v1781_v57 = vsel %vm1779_vm9, %v1764_v12, %v1643_v59  ;;  %v1810_v2 = vsel %vm1796_vm10, %v1793_v52, %v3201_v43 }
 0x19d   : > { %v1798_v6 = vsel %vm1796_vm10, %v1781_v57, %v1662_v40  ;;  %2280 = vmatmul.msk.bf16.vlgmr.msra.gmra.mxu3 %vm1849_vm12, %v1810_v2 }
 0x19e   : > { %2274 = vmatmul.msk.bf16.vlgmr.msra.gmra.mxu0 %vm1849_vm12, %v1798_v6  ;;  %v1605_v28 = vpop.permute.xlu1 %1604 }
 0x1a2   : > { %v1493_v55 = vpop.permute.xlu2 %1492 }
 0x1a3   : > { %v1555_v32 = vpop.permute.xlu0 %1554  ;;  %v1693_v50 = vsel %vm1677_vm11, %v2688_v24, %v1493_v55 }
 0x1a4   : > { %v1710_v48 = vsel %vm1694_vm4, %v1693_v50, %v3241_v33 }
 0x1a5   : > { %v1727_v34 = vsel %vm1711_vm5, %v1710_v48, %v1555_v32 }
 0x1a6   : > { %v1481_v31 = vpop.permute.xlu1 %1480 }
 0x1a7   : > { %v1681_v42 = vsel %vm1677_vm11, %v2943_v46, %v1481_v31 }
 0x1aa   : > { %v1586_v3 = vpop.permute.xlu2 %1585 }
 0x1ab   : > { %v1601_v58 = vpop.permute.xlu0 %1600  ;;  %v1744_v45 = vsel %vm1728_vm6, %v1727_v34, %v1586_v3 }
 0x1ac   : > { %v1757_v38 = vsel %vm1745_vm7, %v1740_v39, %v1601_v58  ;;  %v1761_v26 = vsel %vm1745_vm7, %v1744_v45, %v1605_v28 }
 0x1ae   : > { %v1657_v14 = vpop.permute.xlu1 %1656 }
 0x1b2   : > { %v1622_v18 = vpop.permute.xlu2 %1621 }
 0x1b3   : > { %v1626_v47 = vpop.permute.xlu0 %1625  ;;  %v1774_v40 = vsel %vm1762_vm8, %v1757_v38, %v1622_v18 }
 0x1b4   : > { %v1778_v35 = vsel %vm1762_vm8, %v1761_v26, %v1626_v47 }
 0x1b5   : > { %v1795_v41 = vsel %vm1779_vm9, %v1778_v35, %v1657_v14 }
 0x1b6   : > { %v1672_v16 = vpop.permute.xlu1 %1671 }
 0x1ba   : > { %v1485_v43 = vpop.permute.xlu2 %1484 }
 0x1bb   : > { %v1653_v10 = vpop.permute.xlu0 %1652  ;;  %v1685_v46 = vsel %vm1677_vm11, %v3001_v20, %v1485_v43 }
 0x1bc   : > { %v1791_v56 = vsel %vm1779_vm9, %v1774_v40, %v1653_v10 }
 0x1bd   : > { %v1808_v13 = vsel %vm1796_vm10, %v1791_v56, %v1672_v16 }
 0x1be   : > { %2279 = vmatmul.msk.bf16.gmra.mxu2 %vm1849_vm12, %v1808_v13  ;;  %v1547_v19 = vpop.permute.xlu1 %1546 }
 0x1c2   : > { %v1522_v61 = vpop.permute.xlu2 %1521 }
 0x1c3   : > { %v1526_v54 = vpop.permute.xlu0 %1525  ;;  %v1698_v63 = vsel %vm1694_vm4, %v1681_v42, %v1522_v61 }
 0x1c4   : > { %v1702_v5 = vsel %vm1694_vm4, %v1685_v46, %v1526_v54 }
 0x1c5   : > { %v1719_v30 = vsel %vm1711_vm5, %v1702_v5, %v1547_v19 }
 0x1c6   : > { %v1593_v8 = vpop.permute.xlu1 %1592 }
 0x1ca   : > { %v1676_v23 = vpop.permute.xlu2 %1675 }
 0x1cb   : > { %v1543_v60 = vpop.permute.xlu0 %1542  ;;  %v1812_v24 = vsel %vm1796_vm10, %v1795_v41, %v1676_v23 }
 0x1cc   : > { %2281 = vmatmul.msk.bf16.gmra.mxu3 %vm1849_vm12, %v1812_v24  ;;  %v1715_v4 = vsel %vm1711_vm5, %v1698_v63, %v1543_v60 }
 0x1ce   : > { %v1618_v29 = vpop.permute.xlu1 %1617 }
 0x1d2   : > { %v1574_v33 = vpop.permute.xlu2 %1573 }
 0x1d3   : > { %v1578_v51 = vpop.permute.xlu0 %1577  ;;  %v1732_v49 = vsel %vm1728_vm6, %v1715_v4, %v1574_v33 }
 0x1d4   : > { %v1749_v22 = vsel %vm1745_vm7, %v1732_v49, %v1593_v8  ;;  %v1736_v7 = vsel %vm1728_vm6, %v1719_v30, %v1578_v51 }
 0x1d6   : > { %v1664_v15 = vpop.permute.xlu1 %1663 }
 0x1da   : > { %v1597_v53 = vpop.permute.xlu2 %1596 }
 0x1db   : > { %v1614_v36 = vpop.permute.xlu0 %1613  ;;  %v1753_v37 = vsel %vm1745_vm7, %v1736_v7, %v1597_v53 }
 0x1dc   : > { %v1766_v9 = vsel %vm1762_vm8, %v1749_v22, %v1614_v36  ;;  %v1770_v44 = vsel %vm1762_vm8, %v1753_v37, %v1618_v29 }
 0x1e2   : > { %v1645_v0 = vpop.permute.xlu2 %1644 }
 0x1e3   : > { %v1783_v25 = vsel %vm1779_vm9, %v1766_v9, %v1645_v0  ;;  %v1649_v21 = vpop.permute.xlu0 %1648 }
 0x1e4   : > { %v1800_v62 = vsel %vm1796_vm10, %v1783_v25, %v1664_v15  ;;  %v1787_v11 = vsel %vm1779_vm9, %v1770_v44, %v1649_v21 }
 0x1e5   : > { %2275 = vmatmul.msk.bf16.gmra.mxu0 %vm1849_vm12, %v1800_v62 }
 0x1ea   : > { %v1668_v17 = vpop.permute.xlu2 %1667 }
 0x1eb   : > { %v1804_v20 = vsel %vm1796_vm10, %v1787_v11, %v1668_v17 }
 0x1ec   : > { %2277 = vmatmul.msk.bf16.gmra.mxu1 %vm1849_vm12, %v1804_v20 }
 0x211   : > { %v1889_v12 = vpop.f32.mrf.mxu1 }
 0x212   : > { %v1927_v59 = vmul.f32 %v3364_v27, %v1889_v12 }
 0x213   : > { %v1899_v52 = vpop.f32.mrf.mxu2 }
 0x214   : > { %v1931_v57 = vmul.f32 %v3364_v27, %v1899_v52  ;;  %v1947_v2 = vadd.f32 %v3369_v1, %v1927_v59 }
 0x216   : > { %v1951_v6 = vadd.f32 %v3369_v1, %v1931_v57  ;;  %v1963_v28 = vmax.f32 %v1947_v2, 0.0 }
 0x218   : > { %v1967_v55 = vmax.f32 %v1951_v6, 0.0  ;;  %v1979_v32 = vpack.c.bf16 %v1963_v28, %v1963_v28 }
 0x219   : > { %v1891_v31 = vpop.f32.mrf.mxu1 }
 0x21a   : > { %v1983_v3 = vpack.c.bf16 %v1967_v55, %v1967_v55  ;;  %1996 = vst.msk [vmem:[%s3378_s30 + $0x10] sm:$0xf] %vm1991_vm13, %v1979_v32  ;;  %v1928_v58 = vmul.f32 %v3364_v27, %v1891_v31 }
 0x21b   : > { %v1879_v18 = vpop.f32.mrf.mxu0  ;;  %v1901_v47 = vpop.f32.mrf.mxu2 }
 0x21c   : > { %2000 = vst.msk [vmem:[%s3378_s30 + $0x20] sm:$0xf] %vm1991_vm13, %v1983_v3  ;;  %v1923_v14 = vmul.f32 %v3364_v27, %v1879_v18  ;;  %v1932_v39 = vmul.f32 %v3364_v27, %v1901_v47  ;;  %v1948_v38 = vadd.f32 %v3369_v1, %v1928_v58 }
 0x21e   : > { %v1943_v43 = vadd.f32 %v3369_v1, %v1923_v14  ;;  %v1952_v40 = vadd.f32 %v3369_v1, %v1932_v39  ;;  %v1964_v10 = vmax.f32 %v1948_v38, 0.0 }
 0x220   : > { %v1959_v16 = vmax.f32 %v1943_v43, 0.0  ;;  %v1968_v56 = vmax.f32 %v1952_v40, 0.0  ;;  %v1980_v13 = vpack.c.bf16 %v1964_v10, %v1964_v10  ;;  %v1909_v50 = vpop.f32.mrf.mxu3 }
 0x221   : > { %v1935_v61 = vmul.f32 %v3364_v27, %v1909_v50 }
 0x222   : > { %v1975_v48 = vpack.c.bf16 %v1959_v16, %v1959_v16  ;;  %v1984_v54 = vpack.c.bf16 %v1968_v56, %v1968_v56  ;;  %1997 = vst.msk [vmem:[%s3378_s30 + $0x14] sm:$0xf] %vm1991_vm13, %v1980_v13 }
 0x223   : > { %v1881_v19 = vpop.f32.mrf.mxu0  ;;  %v1955_v34 = vadd.f32 %v3369_v1, %v1935_v61 }
 0x224   : > { %1992 = vst.msk [vmem:[%s3378_s30] sm:$0xf] %vm1991_vm13, %v1975_v48  ;;  %v1924_v45 = vmul.f32 %v3364_v27, %v1881_v19 }
 0x225   : > { %2001 = vst.msk [vmem:[%s3378_s30 + $0x24] sm:$0xf] %vm1991_vm13, %v1984_v54  ;;  %v1971_v26 = vmax.f32 %v1955_v34, 0.0 }
 0x226   : > { %v1944_v35 = vadd.f32 %v3369_v1, %v1924_v45 }
 0x227   : > { %v1987_v41 = vpack.c.bf16 %v1971_v26, %v1971_v26 }
 0x228   : > { %v1960_v23 = vmax.f32 %v1944_v35, 0.0  ;;  %v1911_v60 = vpop.f32.mrf.mxu3 }
 0x229   : > { %2004 = vst.msk [vmem:[%s3378_s30 + $0x30] sm:$0xf] %vm1991_vm13, %v1987_v41  ;;  %v1936_v24 = vmul.f32 %v3364_v27, %v1911_v60 }
 0x22a   : > { %v1976_v8 = vpack.c.bf16 %v1960_v23, %v1960_v23 }
 0x22b   : > { %v1956_v33 = vadd.f32 %v3369_v1, %v1936_v24 }
 0x22c   : > { %1993 = vst.msk [vmem:[%s3378_s30 + $0x4] sm:$0xf] %vm1991_vm13, %v1976_v8 }
 0x22d   : > { %v1972_v51 = vmax.f32 %v1956_v33, 0.0 }
 0x22f   : > { %v1988_v29 = vpack.c.bf16 %v1972_v51, %v1972_v51 }
 0x231   : > { %2005 = vst.msk [vmem:[%s3378_s30 + $0x34] sm:$0xf] %vm1991_vm13, %v1988_v29 }
 0x241   : > { %v1904_v53 = vpop.f32.mrf.mxu2 }
 0x242   : > { %v1933_v42 = vmul.f32 %v3364_v27, %v1904_v53 }
 0x244   : > { %v1953_v36 = vadd.f32 %v3369_v1, %v1933_v42 }
 0x246   : > { %v1969_v63 = vmax.f32 %v1953_v36, 0.0 }
 0x248   : > { %v1985_v4 = vpack.c.bf16 %v1969_v63, %v1969_v63 }
 0x249   : > { %v1906_v49 = vpop.f32.mrf.mxu2 }
 0x24a   : > { %2002 = vst.msk [vmem:[%s3378_s30 + $0x28] sm:$0xf] %vm1991_vm13, %v1985_v4  ;;  %v1934_v22 = vmul.f32 %v3364_v27, %v1906_v49 }
 0x24c   : > { %v1954_v15 = vadd.f32 %v3369_v1, %v1934_v22 }
 0x24e   : > { %v1970_v9 = vmax.f32 %v1954_v15, 0.0 }
 0x24f   : > { %v1914_v0 = vpop.f32.mrf.mxu3 }
 0x250   : > { %v1937_v25 = vmul.f32 %v3364_v27, %v1914_v0  ;;  %v1986_v46 = vpack.c.bf16 %v1970_v9, %v1970_v9 }
 0x252   : > { %v1957_v62 = vadd.f32 %v3369_v1, %v1937_v25  ;;  %2003 = vst.msk [vmem:[%s3378_s30 + $0x2c] sm:$0xf] %vm1991_vm13, %v1986_v46 }
 0x254   : > { %v1973_v5 = vmax.f32 %v1957_v62, 0.0 }
 0x256   : > { %v1989_v30 = vpack.c.bf16 %v1973_v5, %v1973_v5 }
 0x257   : > { %v1916_v7 = vpop.f32.mrf.mxu3 }
 0x258   : > { %2006 = vst.msk [vmem:[%s3378_s30 + $0x38] sm:$0xf] %vm1991_vm13, %v1989_v30  ;;  %v1938_v21 = vmul.f32 %v3364_v27, %v1916_v7 }
 0x25a   : > { %v1958_v37 = vadd.f32 %v3369_v1, %v1938_v21 }
 0x25c   : > { %v1974_v44 = vmax.f32 %v1958_v37, 0.0 }
 0x25e   : > { %v1990_v11 = vpack.c.bf16 %v1974_v44, %v1974_v44 }
 0x260   : > { %2007 = vst.msk [vmem:[%s3378_s30 + $0x3c] sm:$0xf] %vm1991_vm13, %v1990_v11 }
 0x262   : > { %v1884_v17 = vpop.f32.mrf.mxu0 }
 0x263   : > { %v1925_v20 = vmul.f32 %v3364_v27, %v1884_v17 }
 0x265   : > { %v1945_v12 = vadd.f32 %v3369_v1, %v1925_v20 }
 0x267   : > { %v1961_v59 = vmax.f32 %v1945_v12, 0.0 }
 0x269   : > { %v1977_v52 = vpack.c.bf16 %v1961_v59, %v1961_v59  ;;  %v1894_v57 = vpop.f32.mrf.mxu1 }
 0x26a   : > { %v1929_v2 = vmul.f32 %v3364_v27, %v1894_v57  ;;  %v1886_v6 = vpop.f32.mrf.mxu0 }
 0x26b   : > { %1994 = vst.msk [vmem:[%s3378_s30 + $0x8] sm:$0xf] %vm1991_vm13, %v1977_v52  ;;  %v1926_v28 = vmul.f32 %v3364_v27, %v1886_v6 }
 0x26c   : > { %v1949_v55 = vadd.f32 %v3369_v1, %v1929_v2 }
 0x26d   : > { %v1946_v32 = vadd.f32 %v3369_v1, %v1926_v28 }
 0x26e   : > { %v1965_v31 = vmax.f32 %v1949_v55, 0.0 }
 0x26f   : > { %v1962_v3 = vmax.f32 %v1946_v32, 0.0 }
 0x270   : > { %v1981_v58 = vpack.c.bf16 %v1965_v31, %v1965_v31 }
 0x271   : > { %v1978_v18 = vpack.c.bf16 %v1962_v3, %v1962_v3  ;;  %v1896_v47 = vpop.f32.mrf.mxu1 }
 0x272   : > { %1998 = vst.msk [vmem:[%s3378_s30 + $0x18] sm:$0xf] %vm1991_vm13, %v1981_v58  ;;  %v1930_v14 = vmul.f32 %v3364_v27, %v1896_v47 }
 0x273   : > { %1995 = vst.msk [vmem:[%s3378_s30 + $0xc] sm:$0xf] %vm1991_vm13, %v1978_v18 }
 0x274   : > { %v1950_v39 = vadd.f32 %v3369_v1, %v1930_v14 }
 0x276   : > { %v1966_v38 = vmax.f32 %v1950_v39, 0.0 }
 0x278   : > { %v1982_v43 = vpack.c.bf16 %v1966_v38, %v1966_v38 }
 0x27a   : > { %1999 = vst.msk [vmem:[%s3378_s30 + $0x1c] sm:$0xf] %vm1991_vm13, %v1982_v43 }
 0x27b PF: > { %s15_s22 = sadd.s32 1, %s2414_s22   ;;  %s3497_s18 = smov %s2406_s20 }
 0x27c   : > { %p12_p7 = scmp.ge.s32.totalorder %s15_s22, 6   ;;  %s3498_s19 = smov %s2410_s21 }
 0x27d   : > { %s3499_s20 = smov %s3502_s23  ;;  %s3500_s21 = smov %s3506_s24 }
 0x27e   :  { %14 = sbr.rel (!%p12_p7) target bundleno = 3 (0x3), region = 73 }

</bundles_post_ra>
